<compile_context>
chip_gen: v6e
topology: v6e:2x2x1
jax: 0.10.0
libtpu: 0.0.40
codegen_flags: <defaults>
</compile_context>

<pallas_src>
import jax
import jax.numpy as jnp
from jax.experimental import pallas as pl
from jax.experimental.pallas import tpu as pltpu

HIDDEN = 50        # CfC units (ActorCfC: CfC(obs_shape, 50))
BACKBONE = 128     # ncps CfCCell default backbone_units
H_PAD = 128        # hidden padded to full lane width
A_PAD = 128        # actor head padded to full lane width (lane-dense stores)


def _lecun_tanh(x):
    return 1.7159 * jnp.tanh(0.666 * x)


def cfc_actor_kernel(x_ref,
                     wbx_ref, bbb_ref, wbh_ref,
                     wf_ref, bf_ref,
                     wo_ref, bo_ref,
                     out_ref,
                     h_scr, zx_scr, hall_scr):
    tb = pl.program_id(0)

    @pl.when(tb == 0)
    def _():
        h_scr[...] = jnp.zeros_like(h_scr)          # hx=None -> zero initial state

    tc, bp, d = x_ref.shape

    # x-part of the backbone for the whole time-chunk: one big MXU matmul,
    # independent of the recurrence.  bbb bias folded in here (hoisted).
    x2d = x_ref[...].reshape(tc * bp, d)
    zx = jnp.dot(x2d, wbx_ref[...], preferred_element_type=jnp.float32) + bbb_ref[...]
    zx_scr[...] = zx.reshape(tc, bp, BACKBONE)

    bf = bf_ref[...]                                # (1, 3*H_PAD), hoisted
    h0 = h_scr[...]                                 # (bp, H_PAD)

    def step(i, h):
        # backbone: lecun_tanh(x_t @ Wbx + h @ Wbh + b)
        z = zx_scr[i] + jnp.dot(h, wbh_ref[...], preferred_element_type=jnp.float32)
        bb = _lecun_tanh(z)
        # fused ff1 / ff2 / time-gate: one (bp,128)@(128,384) matmul,
        # then 128-lane-aligned slices.
        proj = jnp.dot(bb, wf_ref[...], preferred_element_type=jnp.float32) + bf
        ff1 = jnp.tanh(proj[:, 0:H_PAD])
        ff2 = jnp.tanh(proj[:, H_PAD:2 * H_PAD])
        ti = jax.nn.sigmoid(proj[:, 2 * H_PAD:3 * H_PAD])    # ts=1.0 folded into Wt/bt
        h_new = ff1 * (1.0 - ti) + ti * ff2                  # padded lanes stay 0
        hall_scr[i] = h_new
        return h_new

    h_last = jax.lax.fori_loop(0, tc, step, h0, unroll=True)
    h_scr[...] = h_last                             # carry h to the next chunk

    # actor head for the whole chunk: one big matmul, lane-dense (128) output.
    h2d = hall_scr[...].reshape(tc * bp, H_PAD)
    y = jnp.dot(h2d, wo_ref[...], preferred_element_type=jnp.float32) + bo_ref[...]
    out_ref[...] = y.reshape(tc, bp, A_PAD).astype(out_ref.dtype)


def _pad_to(x, axis, n):
    pad = [(0, 0)] * x.ndim
    pad[axis] = (0, n - x.shape[axis])
    return jnp.pad(x, pad)


def actor_cfc_forward(x_btd, params, *, time_chunk=8):
    """x_btd: (B, T, D) float32 -> logits (B, T, A) float32 (batch_first)."""
    B, T, D = x_btd.shape
    A = params["wo"].shape[1]

    Bp = max(8, ((B + 7) // 8) * 8)                       # full sublane group
    Tp = ((T + time_chunk - 1) // time_chunk) * time_chunk

    x = _pad_to(_pad_to(x_btd.astype(jnp.float32), 0, Bp), 1, Tp)
    x_tbd = jnp.transpose(x, (1, 0, 2))                   # time-major (Tp, Bp, D)

    # ---- one-time weight fusion / lane padding (zero padding keeps real
    #      outputs bit-for-bit unaffected) ----
    wbx = params["wbx"].astype(jnp.float32)                              # (D, 128)
    bbb = params["bbb"].astype(jnp.float32)                              # (1, 128)
    wbh = _pad_to(params["wbh"].astype(jnp.float32), 0, H_PAD)           # (128, 128)
    w1 = _pad_to(params["w1"], 1, H_PAD)
    w2 = _pad_to(params["w2"], 1, H_PAD)
    wt = _pad_to(params["wta"] + params["wtb"], 1, H_PAD)                # ts = 1.0
    wf = jnp.concatenate([w1, w2, wt], axis=1).astype(jnp.float32)       # (128, 384)
    b1 = _pad_to(params["b1"], 1, H_PAD)
    b2 = _pad_to(params["b2"], 1, H_PAD)
    bt = _pad_to(params["bta"] + params["btb"], 1, H_PAD)
    bf = jnp.concatenate([b1, b2, bt], axis=1).astype(jnp.float32)       # (1, 384)
    wo = _pad_to(_pad_to(params["wo"], 0, H_PAD), 1, A_PAD).astype(jnp.float32)
    bo = _pad_to(params["bo"], 1, A_PAD).astype(jnp.float32)

    weights = (wbx, bbb, wbh, wf, bf, wo, bo)

    in_specs = [pl.BlockSpec((time_chunk, Bp, D), lambda tb: (tb, 0, 0))]
    in_specs += [pl.BlockSpec(w.shape, lambda tb: (0, 0)) for w in weights]
    out_spec = pl.BlockSpec((time_chunk, Bp, A_PAD), lambda tb: (tb, 0, 0))

    out_tba = pl.pallas_call(
        cfc_actor_kernel,
        out_shape=jax.ShapeDtypeStruct((Tp, Bp, A_PAD), jnp.float32),
        grid_spec=pltpu.PrefetchScalarGridSpec(
            num_scalar_prefetch=0,
            grid=(Tp // time_chunk,),
            in_specs=in_specs,
            out_specs=out_spec,
            scratch_shapes=[
                pltpu.VMEM((Bp, H_PAD), jnp.float32),               # recurrent h
                pltpu.VMEM((time_chunk, Bp, BACKBONE), jnp.float32),  # x-projection
                pltpu.VMEM((time_chunk, Bp, H_PAD), jnp.float32),   # per-step h
            ],
        ),
        compiler_params=pltpu.CompilerParams(
            dimension_semantics=("arbitrary",)),    # serial recurrence over time
    )(x_tbd, *weights)

    # unpad + back to batch_first
    return jnp.transpose(out_tba[:T, :B, :A], (1, 0, 2))


def init_params(key, obs_dim, action_dim):
    """Deterministic synthetic parameters (shapes match ncps CfCCell + Linear)."""
    ks = jax.random.split(key, 8)

    def xavier(k, shape):
        lim = jnp.sqrt(6.0 / (shape[0] + shape[1]))
        return jax.random.uniform(k, shape, jnp.float32, -lim, lim)

    return {
        # backbone Linear(obs+H -> 128), split along the input axis
        "wbx": xavier(ks[0], (obs_dim, BACKBONE)),
        "wbh": xavier(ks[1], (HIDDEN, BACKBONE)),
        "bbb": jnp.zeros((1, BACKBONE), jnp.float32),
        # ff1 / ff2 / time_a / time_b: Linear(128 -> 50)
        "w1": xavier(ks[2], (BACKBONE, HIDDEN)), "b1": jnp.zeros((1, HIDDEN), jnp.float32),
        "w2": xavier(ks[3], (BACKBONE, HIDDEN)), "b2": jnp.zeros((1, HIDDEN), jnp.float32),
        "wta": xavier(ks[4], (BACKBONE, HIDDEN)), "bta": jnp.zeros((1, HIDDEN), jnp.float32),
        "wtb": xavier(ks[5], (BACKBONE, HIDDEN)), "btb": jnp.zeros((1, HIDDEN), jnp.float32),
        # actor head Linear(50 -> A)
        "wo": xavier(ks[6], (HIDDEN, action_dim)),
        "bo": jax.random.uniform(ks[7], (1, action_dim), jnp.float32, -0.1, 0.1),
    }


def actor_cfc_reference(x_btd, params):
    """Pure-JAX reference (lax.scan) matching the PyTorch module exactly."""
    def step(h, x_t):
        z = x_t @ params["wbx"] + h @ params["wbh"] + params["bbb"]
        bb = _lecun_tanh(z)
        ff1 = jnp.tanh(bb @ params["w1"] + params["b1"])
        ff2 = jnp.tanh(bb @ params["w2"] + params["b2"])
        ti = jax.nn.sigmoid((bb @ params["wta"] + params["bta"])
                            + (bb @ params["wtb"] + params["btb"]))
        h_new = ff1 * (1.0 - ti) + ti * ff2
        y = h_new @ params["wo"] + params["bo"]
        return h_new, y

    B = x_btd.shape[0]
    h0 = jnp.zeros((B, HIDDEN), jnp.float32)
    _, ys = jax.lax.scan(step, h0, jnp.transpose(x_btd, (1, 0, 2)))
    return jnp.transpose(ys, (1, 0, 2))


if __name__ == "__main__":
    # batch, seq, obs_shape, action_shape (minigrid-like); T=16 exercises the
    # cross-chunk hidden-state carry with time_chunk=8 (grid of 2 steps).
    B, T, D, A = 4, 16, 32, 7
    key = jax.random.PRNGKey(0)
    kx, kp = jax.random.split(key)
    x = jax.random.normal(kx, (B, T, D), jnp.float32)
    params = init_params(kp, D, A)

    logits = jax.block_until_ready(actor_cfc_forward(x, params))
    ref = actor_cfc_reference(x, params)
    assert logits.shape == (B, T, A)
    assert jnp.allclose(logits, ref, atol=1e-4, rtol=1e-4), \
        float(jnp.max(jnp.abs(logits - ref)))
    print("KERNEL_OK")
</pallas_src>

<mosaic_0001>
module attributes {stable_mosaic.version = 11 : i64} {
  func.func @cfc_actor_kernel(%arg0: i32, %arg1: memref<8x8x32xf32, #tpu.memory_space<vmem>>, %arg2: memref<32x128xf32, #tpu.memory_space<vmem>>, %arg3: memref<1x128xf32, #tpu.memory_space<vmem>>, %arg4: memref<128x128xf32, #tpu.memory_space<vmem>>, %arg5: memref<128x384xf32, #tpu.memory_space<vmem>>, %arg6: memref<1x384xf32, #tpu.memory_space<vmem>>, %arg7: memref<128x128xf32, #tpu.memory_space<vmem>>, %arg8: memref<1x128xf32, #tpu.memory_space<vmem>>, %arg9: memref<8x8x128xf32, #tpu.memory_space<vmem>>, %arg10: memref<8x128xf32, #tpu.memory_space<vmem>>, %arg11: memref<8x8x128xf32, #tpu.memory_space<vmem>>, %arg12: memref<8x8x128xf32, #tpu.memory_space<vmem>>) attributes {dimension_semantics = [#tpu.dimension_semantics<arbitrary>], iteration_bounds = array<i64: 2>, scalar_prefetch = 0 : i64, scratch_operands = 3 : i64, tpu.core_type = #tpu.core_type<tc>, window_params = [{transform_indices = @transform_0, window_bounds = array<i64: 8, 8, 32>}, {pipeline_mode = #tpu.pipeline_mode<synchronous>, transform_indices = @transform_1, window_bounds = array<i64: 32, 128>}, {pipeline_mode = #tpu.pipeline_mode<synchronous>, transform_indices = @transform_2, window_bounds = array<i64: 1, 128>}, {pipeline_mode = #tpu.pipeline_mode<synchronous>, transform_indices = @transform_3, window_bounds = array<i64: 128, 128>}, {pipeline_mode = #tpu.pipeline_mode<synchronous>, transform_indices = @transform_4, window_bounds = array<i64: 128, 384>}, {pipeline_mode = #tpu.pipeline_mode<synchronous>, transform_indices = @transform_5, window_bounds = array<i64: 1, 384>}, {pipeline_mode = #tpu.pipeline_mode<synchronous>, transform_indices = @transform_6, window_bounds = array<i64: 128, 128>}, {pipeline_mode = #tpu.pipeline_mode<synchronous>, transform_indices = @transform_7, window_bounds = array<i64: 1, 128>}, {transform_indices = @transform_8, window_bounds = array<i64: 8, 8, 128>}]} {
    %c0_i32 = arith.constant 0 : i32
    %0 = arith.cmpi eq, %arg0, %c0_i32 : i32
    %1 = arith.extui %0 : i1 to i32
    %c0_i32_0 = arith.constant 0 : i32
    %2 = arith.cmpi ne, %1, %c0_i32_0 : i32
    scf.if %2 {
      %cst_140 = arith.constant 0.000000e+00 : f32
      %296 = vector.broadcast %cst_140 : f32 to vector<8x128xf32>
      %c0_141 = arith.constant 0 : index
      %c0_142 = arith.constant 0 : index
      %297 = vector.load %arg10[%c0_141, %c0_142] : memref<8x128xf32, #tpu.memory_space<vmem>>, vector<8x128xf32>
      tpu.vector_store %arg10[%c0_141, %c0_142], %296 {strides = array<i32>} : memref<8x128xf32, #tpu.memory_space<vmem>>, vector<8x128xf32>,
    } else {
    }
    %c0 = arith.constant 0 : index
    %c0_1 = arith.constant 0 : index
    %c0_2 = arith.constant 0 : index
    %3 = vector.load %arg1[%c0, %c0_1, %c0_2] : memref<8x8x32xf32, #tpu.memory_space<vmem>>, vector<8x8x32xf32>
    %4 = vector.shape_cast %3 : vector<8x8x32xf32> to vector<64x32xf32>
    %c0_3 = arith.constant 0 : index
    %c0_4 = arith.constant 0 : index
    %5 = vector.load %arg2[%c0_3, %c0_4] : memref<32x128xf32, #tpu.memory_space<vmem>>, vector<32x128xf32>
    %cst = arith.constant dense<0.000000e+00> : vector<64x128xf32>
    %6 = tpu.matmul %4, %5, %cst {dimension_numbers = #tpu.dot_dimension_numbers<[1], [0], [0], [1], [0, 0, 1, 1], [], []>} : vector<64x32xf32>, vector<32x128xf32>, vector<64x128xf32> -> vector<64x128xf32>
    %c0_5 = arith.constant 0 : index
    %c0_6 = arith.constant 0 : index
    %7 = vector.load %arg3[%c0_5, %c0_6] : memref<1x128xf32, #tpu.memory_space<vmem>>, vector<1x128xf32>
    %8 = vector.broadcast %7 : vector<1x128xf32> to vector<64x128xf32>
    %9 = arith.addf %6, %8 : vector<64x128xf32>
    %10 = vector.shape_cast %9 : vector<64x128xf32> to vector<8x8x128xf32>
    %c0_7 = arith.constant 0 : index
    %c0_8 = arith.constant 0 : index
    %c0_9 = arith.constant 0 : index
    %11 = vector.load %arg11[%c0_7, %c0_8, %c0_9] : memref<8x8x128xf32, #tpu.memory_space<vmem>>, vector<8x8x128xf32>
    tpu.vector_store %arg11[%c0_7, %c0_8, %c0_9], %10 {strides = array<i32>} : memref<8x8x128xf32, #tpu.memory_space<vmem>>, vector<8x8x128xf32>,
    %c0_10 = arith.constant 0 : index
    %c0_11 = arith.constant 0 : index
    %12 = vector.load %arg6[%c0_10, %c0_11] : memref<1x384xf32, #tpu.memory_space<vmem>>, vector<1x384xf32>
    %c0_12 = arith.constant 0 : index
    %c0_13 = arith.constant 0 : index
    %13 = vector.load %arg10[%c0_12, %c0_13] : memref<8x128xf32, #tpu.memory_space<vmem>>, vector<8x128xf32>
    %c0_i32_14 = arith.constant 0 : i32
    %14 = arith.index_cast %c0_i32_14 : i32 to index
    %c0_15 = arith.constant 0 : index
    %c0_16 = arith.constant 0 : index
    %15 = vector.load %arg11[%14, %c0_15, %c0_16] : memref<8x8x128xf32, #tpu.memory_space<vmem>>, vector<1x8x128xf32>
    %16 = vector.shape_cast %15 : vector<1x8x128xf32> to vector<8x128xf32>
    %c0_17 = arith.constant 0 : index
    %c0_18 = arith.constant 0 : index
    %17 = vector.load %arg4[%c0_17, %c0_18] : memref<128x128xf32, #tpu.memory_space<vmem>>, vector<128x128xf32>
    %cst_19 = arith.constant dense<0.000000e+00> : vector<8x128xf32>
    %18 = tpu.matmul %13, %17, %cst_19 {dimension_numbers = #tpu.dot_dimension_numbers<[1], [0], [0], [1], [0, 0, 1, 1], [], []>} : vector<8x128xf32>, vector<128x128xf32>, vector<8x128xf32> -> vector<8x128xf32>
    %19 = arith.addf %16, %18 : vector<8x128xf32>
    %cst_20 = arith.constant 6.660000e-01 : f32
    %20 = vector.broadcast %cst_20 : f32 to vector<8x128xf32>
    %21 = arith.mulf %20, %19 : vector<8x128xf32>
    %22 = math.tanh %21 : vector<8x128xf32>
    %cst_21 = arith.constant 1.715900e+00 : f32
    %23 = vector.broadcast %cst_21 : f32 to vector<8x128xf32>
    %24 = arith.mulf %23, %22 : vector<8x128xf32>
    %c0_22 = arith.constant 0 : index
    %c0_23 = arith.constant 0 : index
    %25 = vector.load %arg5[%c0_22, %c0_23] : memref<128x384xf32, #tpu.memory_space<vmem>>, vector<128x384xf32>
    %cst_24 = arith.constant dense<0.000000e+00> : vector<8x384xf32>
    %26 = tpu.matmul %24, %25, %cst_24 {dimension_numbers = #tpu.dot_dimension_numbers<[1], [0], [0], [1], [0, 0, 1, 1], [], []>} : vector<8x128xf32>, vector<128x384xf32>, vector<8x384xf32> -> vector<8x384xf32>
    %27 = vector.broadcast %12 : vector<1x384xf32> to vector<8x384xf32>
    %28 = arith.addf %26, %27 : vector<8x384xf32>
    %29 = vector.extract_strided_slice %28 {offsets = [0, 0], sizes = [8, 128], strides = [1, 1]} : vector<8x384xf32> to vector<8x128xf32>
    %30 = math.tanh %29 : vector<8x128xf32>
    %31 = vector.extract_strided_slice %28 {offsets = [0, 128], sizes = [8, 128], strides = [1, 1]} : vector<8x384xf32> to vector<8x128xf32>
    %32 = math.tanh %31 : vector<8x128xf32>
    %33 = vector.extract_strided_slice %28 {offsets = [0, 256], sizes = [8, 128], strides = [1, 1]} : vector<8x384xf32> to vector<8x128xf32>
    %34 = arith.negf %33 : vector<8x128xf32>
    %35 = math.exp %34 : vector<8x128xf32>
    %cst_25 = arith.constant 1.000000e+00 : f32
    %36 = vector.broadcast %cst_25 : f32 to vector<8x128xf32>
    %37 = arith.addf %36, %35 : vector<8x128xf32>
    %38 = arith.divf %36, %37 : vector<8x128xf32>
    %cst_26 = arith.constant 1.000000e+00 : f32
    %39 = vector.broadcast %cst_26 : f32 to vector<8x128xf32>
    %40 = arith.subf %39, %38 : vector<8x128xf32>
    %41 = arith.mulf %30, %40 : vector<8x128xf32>
    %42 = arith.mulf %38, %32 : vector<8x128xf32>
    %43 = arith.addf %41, %42 : vector<8x128xf32>
    %44 = arith.index_cast %c0_i32_14 : i32 to index
    %c0_27 = arith.constant 0 : index
    %c0_28 = arith.constant 0 : index
    %45 = vector.load %arg12[%44, %c0_27, %c0_28] : memref<8x8x128xf32, #tpu.memory_space<vmem>>, vector<1x8x128xf32>
    %46 = vector.shape_cast %45 : vector<1x8x128xf32> to vector<8x128xf32>
    %47 = vector.shape_cast %43 : vector<8x128xf32> to vector<1x8x128xf32>
    tpu.vector_store %arg12[%44, %c0_27, %c0_28], %47 {strides = array<i32>} : memref<8x8x128xf32, #tpu.memory_space<vmem>>, vector<1x8x128xf32>,
    %c1_i32 = arith.constant 1 : i32
    %48 = arith.index_cast %c1_i32 : i32 to index
    %c0_29 = arith.constant 0 : index
    %c0_30 = arith.constant 0 : index
    %49 = vector.load %arg11[%48, %c0_29, %c0_30] : memref<8x8x128xf32, #tpu.memory_space<vmem>>, vector<1x8x128xf32>
    %50 = vector.shape_cast %49 : vector<1x8x128xf32> to vector<8x128xf32>
    %c0_31 = arith.constant 0 : index
    %c0_32 = arith.constant 0 : index
    %51 = vector.load %arg4[%c0_31, %c0_32] : memref<128x128xf32, #tpu.memory_space<vmem>>, vector<128x128xf32>
    %cst_33 = arith.constant dense<0.000000e+00> : vector<8x128xf32>
    %52 = tpu.matmul %43, %51, %cst_33 {dimension_numbers = #tpu.dot_dimension_numbers<[1], [0], [0], [1], [0, 0, 1, 1], [], []>} : vector<8x128xf32>, vector<128x128xf32>, vector<8x128xf32> -> vector<8x128xf32>
    %53 = arith.addf %50, %52 : vector<8x128xf32>
    %cst_34 = arith.constant 6.660000e-01 : f32
    %54 = vector.broadcast %cst_34 : f32 to vector<8x128xf32>
    %55 = arith.mulf %54, %53 : vector<8x128xf32>
    %56 = math.tanh %55 : vector<8x128xf32>
    %cst_35 = arith.constant 1.715900e+00 : f32
    %57 = vector.broadcast %cst_35 : f32 to vector<8x128xf32>
    %58 = arith.mulf %57, %56 : vector<8x128xf32>
    %c0_36 = arith.constant 0 : index
    %c0_37 = arith.constant 0 : index
    %59 = vector.load %arg5[%c0_36, %c0_37] : memref<128x384xf32, #tpu.memory_space<vmem>>, vector<128x384xf32>
    %cst_38 = arith.constant dense<0.000000e+00> : vector<8x384xf32>
    %60 = tpu.matmul %58, %59, %cst_38 {dimension_numbers = #tpu.dot_dimension_numbers<[1], [0], [0], [1], [0, 0, 1, 1], [], []>} : vector<8x128xf32>, vector<128x384xf32>, vector<8x384xf32> -> vector<8x384xf32>
    %61 = vector.broadcast %12 : vector<1x384xf32> to vector<8x384xf32>
    %62 = arith.addf %60, %61 : vector<8x384xf32>
    %63 = vector.extract_strided_slice %62 {offsets = [0, 0], sizes = [8, 128], strides = [1, 1]} : vector<8x384xf32> to vector<8x128xf32>
    %64 = math.tanh %63 : vector<8x128xf32>
    %65 = vector.extract_strided_slice %62 {offsets = [0, 128], sizes = [8, 128], strides = [1, 1]} : vector<8x384xf32> to vector<8x128xf32>
    %66 = math.tanh %65 : vector<8x128xf32>
    %67 = vector.extract_strided_slice %62 {offsets = [0, 256], sizes = [8, 128], strides = [1, 1]} : vector<8x384xf32> to vector<8x128xf32>
    %68 = arith.negf %67 : vector<8x128xf32>
    %69 = math.exp %68 : vector<8x128xf32>
    %cst_39 = arith.constant 1.000000e+00 : f32
    %70 = vector.broadcast %cst_39 : f32 to vector<8x128xf32>
    %71 = arith.addf %70, %69 : vector<8x128xf32>
    %72 = arith.divf %70, %71 : vector<8x128xf32>
    %cst_40 = arith.constant 1.000000e+00 : f32
    %73 = vector.broadcast %cst_40 : f32 to vector<8x128xf32>
    %74 = arith.subf %73, %72 : vector<8x128xf32>
    %75 = arith.mulf %64, %74 : vector<8x128xf32>
    %76 = arith.mulf %72, %66 : vector<8x128xf32>
    %77 = arith.addf %75, %76 : vector<8x128xf32>
    %78 = arith.index_cast %c1_i32 : i32 to index
    %c0_41 = arith.constant 0 : index
    %c0_42 = arith.constant 0 : index
    %79 = vector.load %arg12[%78, %c0_41, %c0_42] : memref<8x8x128xf32, #tpu.memory_space<vmem>>, vector<1x8x128xf32>
    %80 = vector.shape_cast %79 : vector<1x8x128xf32> to vector<8x128xf32>
    %81 = vector.shape_cast %77 : vector<8x128xf32> to vector<1x8x128xf32>
    tpu.vector_store %arg12[%78, %c0_41, %c0_42], %81 {strides = array<i32>} : memref<8x8x128xf32, #tpu.memory_space<vmem>>, vector<1x8x128xf32>,
    %c2_i32 = arith.constant 2 : i32
    %82 = arith.index_cast %c2_i32 : i32 to index
    %c0_43 = arith.constant 0 : index
    %c0_44 = arith.constant 0 : index
    %83 = vector.load %arg11[%82, %c0_43, %c0_44] : memref<8x8x128xf32, #tpu.memory_space<vmem>>, vector<1x8x128xf32>
    %84 = vector.shape_cast %83 : vector<1x8x128xf32> to vector<8x128xf32>
    %c0_45 = arith.constant 0 : index
    %c0_46 = arith.constant 0 : index
    %85 = vector.load %arg4[%c0_45, %c0_46] : memref<128x128xf32, #tpu.memory_space<vmem>>, vector<128x128xf32>
    %cst_47 = arith.constant dense<0.000000e+00> : vector<8x128xf32>
    %86 = tpu.matmul %77, %85, %cst_47 {dimension_numbers = #tpu.dot_dimension_numbers<[1], [0], [0], [1], [0, 0, 1, 1], [], []>} : vector<8x128xf32>, vector<128x128xf32>, vector<8x128xf32> -> vector<8x128xf32>
    %87 = arith.addf %84, %86 : vector<8x128xf32>
    %cst_48 = arith.constant 6.660000e-01 : f32
    %88 = vector.broadcast %cst_48 : f32 to vector<8x128xf32>
    %89 = arith.mulf %88, %87 : vector<8x128xf32>
    %90 = math.tanh %89 : vector<8x128xf32>
    %cst_49 = arith.constant 1.715900e+00 : f32
    %91 = vector.broadcast %cst_49 : f32 to vector<8x128xf32>
    %92 = arith.mulf %91, %90 : vector<8x128xf32>
    %c0_50 = arith.constant 0 : index
    %c0_51 = arith.constant 0 : index
    %93 = vector.load %arg5[%c0_50, %c0_51] : memref<128x384xf32, #tpu.memory_space<vmem>>, vector<128x384xf32>
    %cst_52 = arith.constant dense<0.000000e+00> : vector<8x384xf32>
    %94 = tpu.matmul %92, %93, %cst_52 {dimension_numbers = #tpu.dot_dimension_numbers<[1], [0], [0], [1], [0, 0, 1, 1], [], []>} : vector<8x128xf32>, vector<128x384xf32>, vector<8x384xf32> -> vector<8x384xf32>
    %95 = vector.broadcast %12 : vector<1x384xf32> to vector<8x384xf32>
    %96 = arith.addf %94, %95 : vector<8x384xf32>
    %97 = vector.extract_strided_slice %96 {offsets = [0, 0], sizes = [8, 128], strides = [1, 1]} : vector<8x384xf32> to vector<8x128xf32>
    %98 = math.tanh %97 : vector<8x128xf32>
    %99 = vector.extract_strided_slice %96 {offsets = [0, 128], sizes = [8, 128], strides = [1, 1]} : vector<8x384xf32> to vector<8x128xf32>
    %100 = math.tanh %99 : vector<8x128xf32>
    %101 = vector.extract_strided_slice %96 {offsets = [0, 256], sizes = [8, 128], strides = [1, 1]} : vector<8x384xf32> to vector<8x128xf32>
    %102 = arith.negf %101 : vector<8x128xf32>
    %103 = math.exp %102 : vector<8x128xf32>
    %cst_53 = arith.constant 1.000000e+00 : f32
    %104 = vector.broadcast %cst_53 : f32 to vector<8x128xf32>
    %105 = arith.addf %104, %103 : vector<8x128xf32>
    %106 = arith.divf %104, %105 : vector<8x128xf32>
    %cst_54 = arith.constant 1.000000e+00 : f32
    %107 = vector.broadcast %cst_54 : f32 to vector<8x128xf32>
    %108 = arith.subf %107, %106 : vector<8x128xf32>
    %109 = arith.mulf %98, %108 : vector<8x128xf32>
    %110 = arith.mulf %106, %100 : vector<8x128xf32>
    %111 = arith.addf %109, %110 : vector<8x128xf32>
    %112 = arith.index_cast %c2_i32 : i32 to index
    %c0_55 = arith.constant 0 : index
    %c0_56 = arith.constant 0 : index
    %113 = vector.load %arg12[%112, %c0_55, %c0_56] : memref<8x8x128xf32, #tpu.memory_space<vmem>>, vector<1x8x128xf32>
    %114 = vector.shape_cast %113 : vector<1x8x128xf32> to vector<8x128xf32>
    %115 = vector.shape_cast %111 : vector<8x128xf32> to vector<1x8x128xf32>
    tpu.vector_store %arg12[%112, %c0_55, %c0_56], %115 {strides = array<i32>} : memref<8x8x128xf32, #tpu.memory_space<vmem>>, vector<1x8x128xf32>,
    %c3_i32 = arith.constant 3 : i32
    %116 = arith.index_cast %c3_i32 : i32 to index
    %c0_57 = arith.constant 0 : index
    %c0_58 = arith.constant 0 : index
    %117 = vector.load %arg11[%116, %c0_57, %c0_58] : memref<8x8x128xf32, #tpu.memory_space<vmem>>, vector<1x8x128xf32>
    %118 = vector.shape_cast %117 : vector<1x8x128xf32> to vector<8x128xf32>
    %c0_59 = arith.constant 0 : index
    %c0_60 = arith.constant 0 : index
    %119 = vector.load %arg4[%c0_59, %c0_60] : memref<128x128xf32, #tpu.memory_space<vmem>>, vector<128x128xf32>
    %cst_61 = arith.constant dense<0.000000e+00> : vector<8x128xf32>
    %120 = tpu.matmul %111, %119, %cst_61 {dimension_numbers = #tpu.dot_dimension_numbers<[1], [0], [0], [1], [0, 0, 1, 1], [], []>} : vector<8x128xf32>, vector<128x128xf32>, vector<8x128xf32> -> vector<8x128xf32>
    %121 = arith.addf %118, %120 : vector<8x128xf32>
    %cst_62 = arith.constant 6.660000e-01 : f32
    %122 = vector.broadcast %cst_62 : f32 to vector<8x128xf32>
    %123 = arith.mulf %122, %121 : vector<8x128xf32>
    %124 = math.tanh %123 : vector<8x128xf32>
    %cst_63 = arith.constant 1.715900e+00 : f32
    %125 = vector.broadcast %cst_63 : f32 to vector<8x128xf32>
    %126 = arith.mulf %125, %124 : vector<8x128xf32>
    %c0_64 = arith.constant 0 : index
    %c0_65 = arith.constant 0 : index
    %127 = vector.load %arg5[%c0_64, %c0_65] : memref<128x384xf32, #tpu.memory_space<vmem>>, vector<128x384xf32>
    %cst_66 = arith.constant dense<0.000000e+00> : vector<8x384xf32>
    %128 = tpu.matmul %126, %127, %cst_66 {dimension_numbers = #tpu.dot_dimension_numbers<[1], [0], [0], [1], [0, 0, 1, 1], [], []>} : vector<8x128xf32>, vector<128x384xf32>, vector<8x384xf32> -> vector<8x384xf32>
    %129 = vector.broadcast %12 : vector<1x384xf32> to vector<8x384xf32>
    %130 = arith.addf %128, %129 : vector<8x384xf32>
    %131 = vector.extract_strided_slice %130 {offsets = [0, 0], sizes = [8, 128], strides = [1, 1]} : vector<8x384xf32> to vector<8x128xf32>
    %132 = math.tanh %131 : vector<8x128xf32>
    %133 = vector.extract_strided_slice %130 {offsets = [0, 128], sizes = [8, 128], strides = [1, 1]} : vector<8x384xf32> to vector<8x128xf32>
    %134 = math.tanh %133 : vector<8x128xf32>
    %135 = vector.extract_strided_slice %130 {offsets = [0, 256], sizes = [8, 128], strides = [1, 1]} : vector<8x384xf32> to vector<8x128xf32>
    %136 = arith.negf %135 : vector<8x128xf32>
    %137 = math.exp %136 : vector<8x128xf32>
    %cst_67 = arith.constant 1.000000e+00 : f32
    %138 = vector.broadcast %cst_67 : f32 to vector<8x128xf32>
    %139 = arith.addf %138, %137 : vector<8x128xf32>
    %140 = arith.divf %138, %139 : vector<8x128xf32>
    %cst_68 = arith.constant 1.000000e+00 : f32
    %141 = vector.broadcast %cst_68 : f32 to vector<8x128xf32>
    %142 = arith.subf %141, %140 : vector<8x128xf32>
    %143 = arith.mulf %132, %142 : vector<8x128xf32>
    %144 = arith.mulf %140, %134 : vector<8x128xf32>
    %145 = arith.addf %143, %144 : vector<8x128xf32>
    %146 = arith.index_cast %c3_i32 : i32 to index
    %c0_69 = arith.constant 0 : index
    %c0_70 = arith.constant 0 : index
    %147 = vector.load %arg12[%146, %c0_69, %c0_70] : memref<8x8x128xf32, #tpu.memory_space<vmem>>, vector<1x8x128xf32>
    %148 = vector.shape_cast %147 : vector<1x8x128xf32> to vector<8x128xf32>
    %149 = vector.shape_cast %145 : vector<8x128xf32> to vector<1x8x128xf32>
    tpu.vector_store %arg12[%146, %c0_69, %c0_70], %149 {strides = array<i32>} : memref<8x8x128xf32, #tpu.memory_space<vmem>>, vector<1x8x128xf32>,
    %c4_i32 = arith.constant 4 : i32
    %150 = arith.index_cast %c4_i32 : i32 to index
    %c0_71 = arith.constant 0 : index
    %c0_72 = arith.constant 0 : index
    %151 = vector.load %arg11[%150, %c0_71, %c0_72] : memref<8x8x128xf32, #tpu.memory_space<vmem>>, vector<1x8x128xf32>
    %152 = vector.shape_cast %151 : vector<1x8x128xf32> to vector<8x128xf32>
    %c0_73 = arith.constant 0 : index
    %c0_74 = arith.constant 0 : index
    %153 = vector.load %arg4[%c0_73, %c0_74] : memref<128x128xf32, #tpu.memory_space<vmem>>, vector<128x128xf32>
    %cst_75 = arith.constant dense<0.000000e+00> : vector<8x128xf32>
    %154 = tpu.matmul %145, %153, %cst_75 {dimension_numbers = #tpu.dot_dimension_numbers<[1], [0], [0], [1], [0, 0, 1, 1], [], []>} : vector<8x128xf32>, vector<128x128xf32>, vector<8x128xf32> -> vector<8x128xf32>
    %155 = arith.addf %152, %154 : vector<8x128xf32>
    %cst_76 = arith.constant 6.660000e-01 : f32
    %156 = vector.broadcast %cst_76 : f32 to vector<8x128xf32>
    %157 = arith.mulf %156, %155 : vector<8x128xf32>
    %158 = math.tanh %157 : vector<8x128xf32>
    %cst_77 = arith.constant 1.715900e+00 : f32
    %159 = vector.broadcast %cst_77 : f32 to vector<8x128xf32>
    %160 = arith.mulf %159, %158 : vector<8x128xf32>
    %c0_78 = arith.constant 0 : index
    %c0_79 = arith.constant 0 : index
    %161 = vector.load %arg5[%c0_78, %c0_79] : memref<128x384xf32, #tpu.memory_space<vmem>>, vector<128x384xf32>
    %cst_80 = arith.constant dense<0.000000e+00> : vector<8x384xf32>
    %162 = tpu.matmul %160, %161, %cst_80 {dimension_numbers = #tpu.dot_dimension_numbers<[1], [0], [0], [1], [0, 0, 1, 1], [], []>} : vector<8x128xf32>, vector<128x384xf32>, vector<8x384xf32> -> vector<8x384xf32>
    %163 = vector.broadcast %12 : vector<1x384xf32> to vector<8x384xf32>
    %164 = arith.addf %162, %163 : vector<8x384xf32>
    %165 = vector.extract_strided_slice %164 {offsets = [0, 0], sizes = [8, 128], strides = [1, 1]} : vector<8x384xf32> to vector<8x128xf32>
    %166 = math.tanh %165 : vector<8x128xf32>
    %167 = vector.extract_strided_slice %164 {offsets = [0, 128], sizes = [8, 128], strides = [1, 1]} : vector<8x384xf32> to vector<8x128xf32>
    %168 = math.tanh %167 : vector<8x128xf32>
    %169 = vector.extract_strided_slice %164 {offsets = [0, 256], sizes = [8, 128], strides = [1, 1]} : vector<8x384xf32> to vector<8x128xf32>
    %170 = arith.negf %169 : vector<8x128xf32>
    %171 = math.exp %170 : vector<8x128xf32>
    %cst_81 = arith.constant 1.000000e+00 : f32
    %172 = vector.broadcast %cst_81 : f32 to vector<8x128xf32>
    %173 = arith.addf %172, %171 : vector<8x128xf32>
    %174 = arith.divf %172, %173 : vector<8x128xf32>
    %cst_82 = arith.constant 1.000000e+00 : f32
    %175 = vector.broadcast %cst_82 : f32 to vector<8x128xf32>
    %176 = arith.subf %175, %174 : vector<8x128xf32>
    %177 = arith.mulf %166, %176 : vector<8x128xf32>
    %178 = arith.mulf %174, %168 : vector<8x128xf32>
    %179 = arith.addf %177, %178 : vector<8x128xf32>
    %180 = arith.index_cast %c4_i32 : i32 to index
    %c0_83 = arith.constant 0 : index
    %c0_84 = arith.constant 0 : index
    %181 = vector.load %arg12[%180, %c0_83, %c0_84] : memref<8x8x128xf32, #tpu.memory_space<vmem>>, vector<1x8x128xf32>
    %182 = vector.shape_cast %181 : vector<1x8x128xf32> to vector<8x128xf32>
    %183 = vector.shape_cast %179 : vector<8x128xf32> to vector<1x8x128xf32>
    tpu.vector_store %arg12[%180, %c0_83, %c0_84], %183 {strides = array<i32>} : memref<8x8x128xf32, #tpu.memory_space<vmem>>, vector<1x8x128xf32>,
    %c5_i32 = arith.constant 5 : i32
    %184 = arith.index_cast %c5_i32 : i32 to index
    %c0_85 = arith.constant 0 : index
    %c0_86 = arith.constant 0 : index
    %185 = vector.load %arg11[%184, %c0_85, %c0_86] : memref<8x8x128xf32, #tpu.memory_space<vmem>>, vector<1x8x128xf32>
    %186 = vector.shape_cast %185 : vector<1x8x128xf32> to vector<8x128xf32>
    %c0_87 = arith.constant 0 : index
    %c0_88 = arith.constant 0 : index
    %187 = vector.load %arg4[%c0_87, %c0_88] : memref<128x128xf32, #tpu.memory_space<vmem>>, vector<128x128xf32>
    %cst_89 = arith.constant dense<0.000000e+00> : vector<8x128xf32>
    %188 = tpu.matmul %179, %187, %cst_89 {dimension_numbers = #tpu.dot_dimension_numbers<[1], [0], [0], [1], [0, 0, 1, 1], [], []>} : vector<8x128xf32>, vector<128x128xf32>, vector<8x128xf32> -> vector<8x128xf32>
    %189 = arith.addf %186, %188 : vector<8x128xf32>
    %cst_90 = arith.constant 6.660000e-01 : f32
    %190 = vector.broadcast %cst_90 : f32 to vector<8x128xf32>
    %191 = arith.mulf %190, %189 : vector<8x128xf32>
    %192 = math.tanh %191 : vector<8x128xf32>
    %cst_91 = arith.constant 1.715900e+00 : f32
    %193 = vector.broadcast %cst_91 : f32 to vector<8x128xf32>
    %194 = arith.mulf %193, %192 : vector<8x128xf32>
    %c0_92 = arith.constant 0 : index
    %c0_93 = arith.constant 0 : index
    %195 = vector.load %arg5[%c0_92, %c0_93] : memref<128x384xf32, #tpu.memory_space<vmem>>, vector<128x384xf32>
    %cst_94 = arith.constant dense<0.000000e+00> : vector<8x384xf32>
    %196 = tpu.matmul %194, %195, %cst_94 {dimension_numbers = #tpu.dot_dimension_numbers<[1], [0], [0], [1], [0, 0, 1, 1], [], []>} : vector<8x128xf32>, vector<128x384xf32>, vector<8x384xf32> -> vector<8x384xf32>
    %197 = vector.broadcast %12 : vector<1x384xf32> to vector<8x384xf32>
    %198 = arith.addf %196, %197 : vector<8x384xf32>
    %199 = vector.extract_strided_slice %198 {offsets = [0, 0], sizes = [8, 128], strides = [1, 1]} : vector<8x384xf32> to vector<8x128xf32>
    %200 = math.tanh %199 : vector<8x128xf32>
    %201 = vector.extract_strided_slice %198 {offsets = [0, 128], sizes = [8, 128], strides = [1, 1]} : vector<8x384xf32> to vector<8x128xf32>
    %202 = math.tanh %201 : vector<8x128xf32>
    %203 = vector.extract_strided_slice %198 {offsets = [0, 256], sizes = [8, 128], strides = [1, 1]} : vector<8x384xf32> to vector<8x128xf32>
    %204 = arith.negf %203 : vector<8x128xf32>
    %205 = math.exp %204 : vector<8x128xf32>
    %cst_95 = arith.constant 1.000000e+00 : f32
    %206 = vector.broadcast %cst_95 : f32 to vector<8x128xf32>
    %207 = arith.addf %206, %205 : vector<8x128xf32>
    %208 = arith.divf %206, %207 : vector<8x128xf32>
    %cst_96 = arith.constant 1.000000e+00 : f32
    %209 = vector.broadcast %cst_96 : f32 to vector<8x128xf32>
    %210 = arith.subf %209, %208 : vector<8x128xf32>
    %211 = arith.mulf %200, %210 : vector<8x128xf32>
    %212 = arith.mulf %208, %202 : vector<8x128xf32>
    %213 = arith.addf %211, %212 : vector<8x128xf32>
    %214 = arith.index_cast %c5_i32 : i32 to index
    %c0_97 = arith.constant 0 : index
    %c0_98 = arith.constant 0 : index
    %215 = vector.load %arg12[%214, %c0_97, %c0_98] : memref<8x8x128xf32, #tpu.memory_space<vmem>>, vector<1x8x128xf32>
    %216 = vector.shape_cast %215 : vector<1x8x128xf32> to vector<8x128xf32>
    %217 = vector.shape_cast %213 : vector<8x128xf32> to vector<1x8x128xf32>
    tpu.vector_store %arg12[%214, %c0_97, %c0_98], %217 {strides = array<i32>} : memref<8x8x128xf32, #tpu.memory_space<vmem>>, vector<1x8x128xf32>,
    %c6_i32 = arith.constant 6 : i32
    %218 = arith.index_cast %c6_i32 : i32 to index
    %c0_99 = arith.constant 0 : index
    %c0_100 = arith.constant 0 : index
    %219 = vector.load %arg11[%218, %c0_99, %c0_100] : memref<8x8x128xf32, #tpu.memory_space<vmem>>, vector<1x8x128xf32>
    %220 = vector.shape_cast %219 : vector<1x8x128xf32> to vector<8x128xf32>
    %c0_101 = arith.constant 0 : index
    %c0_102 = arith.constant 0 : index
    %221 = vector.load %arg4[%c0_101, %c0_102] : memref<128x128xf32, #tpu.memory_space<vmem>>, vector<128x128xf32>
    %cst_103 = arith.constant dense<0.000000e+00> : vector<8x128xf32>
    %222 = tpu.matmul %213, %221, %cst_103 {dimension_numbers = #tpu.dot_dimension_numbers<[1], [0], [0], [1], [0, 0, 1, 1], [], []>} : vector<8x128xf32>, vector<128x128xf32>, vector<8x128xf32> -> vector<8x128xf32>
    %223 = arith.addf %220, %222 : vector<8x128xf32>
    %cst_104 = arith.constant 6.660000e-01 : f32
    %224 = vector.broadcast %cst_104 : f32 to vector<8x128xf32>
    %225 = arith.mulf %224, %223 : vector<8x128xf32>
    %226 = math.tanh %225 : vector<8x128xf32>
    %cst_105 = arith.constant 1.715900e+00 : f32
    %227 = vector.broadcast %cst_105 : f32 to vector<8x128xf32>
    %228 = arith.mulf %227, %226 : vector<8x128xf32>
    %c0_106 = arith.constant 0 : index
    %c0_107 = arith.constant 0 : index
    %229 = vector.load %arg5[%c0_106, %c0_107] : memref<128x384xf32, #tpu.memory_space<vmem>>, vector<128x384xf32>
    %cst_108 = arith.constant dense<0.000000e+00> : vector<8x384xf32>
    %230 = tpu.matmul %228, %229, %cst_108 {dimension_numbers = #tpu.dot_dimension_numbers<[1], [0], [0], [1], [0, 0, 1, 1], [], []>} : vector<8x128xf32>, vector<128x384xf32>, vector<8x384xf32> -> vector<8x384xf32>
    %231 = vector.broadcast %12 : vector<1x384xf32> to vector<8x384xf32>
    %232 = arith.addf %230, %231 : vector<8x384xf32>
    %233 = vector.extract_strided_slice %232 {offsets = [0, 0], sizes = [8, 128], strides = [1, 1]} : vector<8x384xf32> to vector<8x128xf32>
    %234 = math.tanh %233 : vector<8x128xf32>
    %235 = vector.extract_strided_slice %232 {offsets = [0, 128], sizes = [8, 128], strides = [1, 1]} : vector<8x384xf32> to vector<8x128xf32>
    %236 = math.tanh %235 : vector<8x128xf32>
    %237 = vector.extract_strided_slice %232 {offsets = [0, 256], sizes = [8, 128], strides = [1, 1]} : vector<8x384xf32> to vector<8x128xf32>
    %238 = arith.negf %237 : vector<8x128xf32>
    %239 = math.exp %238 : vector<8x128xf32>
    %cst_109 = arith.constant 1.000000e+00 : f32
    %240 = vector.broadcast %cst_109 : f32 to vector<8x128xf32>
    %241 = arith.addf %240, %239 : vector<8x128xf32>
    %242 = arith.divf %240, %241 : vector<8x128xf32>
    %cst_110 = arith.constant 1.000000e+00 : f32
    %243 = vector.broadcast %cst_110 : f32 to vector<8x128xf32>
    %244 = arith.subf %243, %242 : vector<8x128xf32>
    %245 = arith.mulf %234, %244 : vector<8x128xf32>
    %246 = arith.mulf %242, %236 : vector<8x128xf32>
    %247 = arith.addf %245, %246 : vector<8x128xf32>
    %248 = arith.index_cast %c6_i32 : i32 to index
    %c0_111 = arith.constant 0 : index
    %c0_112 = arith.constant 0 : index
    %249 = vector.load %arg12[%248, %c0_111, %c0_112] : memref<8x8x128xf32, #tpu.memory_space<vmem>>, vector<1x8x128xf32>
    %250 = vector.shape_cast %249 : vector<1x8x128xf32> to vector<8x128xf32>
    %251 = vector.shape_cast %247 : vector<8x128xf32> to vector<1x8x128xf32>
    tpu.vector_store %arg12[%248, %c0_111, %c0_112], %251 {strides = array<i32>} : memref<8x8x128xf32, #tpu.memory_space<vmem>>, vector<1x8x128xf32>,
    %c7_i32 = arith.constant 7 : i32
    %252 = arith.index_cast %c7_i32 : i32 to index
    %c0_113 = arith.constant 0 : index
    %c0_114 = arith.constant 0 : index
    %253 = vector.load %arg11[%252, %c0_113, %c0_114] : memref<8x8x128xf32, #tpu.memory_space<vmem>>, vector<1x8x128xf32>
    %254 = vector.shape_cast %253 : vector<1x8x128xf32> to vector<8x128xf32>
    %c0_115 = arith.constant 0 : index
    %c0_116 = arith.constant 0 : index
    %255 = vector.load %arg4[%c0_115, %c0_116] : memref<128x128xf32, #tpu.memory_space<vmem>>, vector<128x128xf32>
    %cst_117 = arith.constant dense<0.000000e+00> : vector<8x128xf32>
    %256 = tpu.matmul %247, %255, %cst_117 {dimension_numbers = #tpu.dot_dimension_numbers<[1], [0], [0], [1], [0, 0, 1, 1], [], []>} : vector<8x128xf32>, vector<128x128xf32>, vector<8x128xf32> -> vector<8x128xf32>
    %257 = arith.addf %254, %256 : vector<8x128xf32>
    %cst_118 = arith.constant 6.660000e-01 : f32
    %258 = vector.broadcast %cst_118 : f32 to vector<8x128xf32>
    %259 = arith.mulf %258, %257 : vector<8x128xf32>
    %260 = math.tanh %259 : vector<8x128xf32>
    %cst_119 = arith.constant 1.715900e+00 : f32
    %261 = vector.broadcast %cst_119 : f32 to vector<8x128xf32>
    %262 = arith.mulf %261, %260 : vector<8x128xf32>
    %c0_120 = arith.constant 0 : index
    %c0_121 = arith.constant 0 : index
    %263 = vector.load %arg5[%c0_120, %c0_121] : memref<128x384xf32, #tpu.memory_space<vmem>>, vector<128x384xf32>
    %cst_122 = arith.constant dense<0.000000e+00> : vector<8x384xf32>
    %264 = tpu.matmul %262, %263, %cst_122 {dimension_numbers = #tpu.dot_dimension_numbers<[1], [0], [0], [1], [0, 0, 1, 1], [], []>} : vector<8x128xf32>, vector<128x384xf32>, vector<8x384xf32> -> vector<8x384xf32>
    %265 = vector.broadcast %12 : vector<1x384xf32> to vector<8x384xf32>
    %266 = arith.addf %264, %265 : vector<8x384xf32>
    %267 = vector.extract_strided_slice %266 {offsets = [0, 0], sizes = [8, 128], strides = [1, 1]} : vector<8x384xf32> to vector<8x128xf32>
    %268 = math.tanh %267 : vector<8x128xf32>
    %269 = vector.extract_strided_slice %266 {offsets = [0, 128], sizes = [8, 128], strides = [1, 1]} : vector<8x384xf32> to vector<8x128xf32>
    %270 = math.tanh %269 : vector<8x128xf32>
    %271 = vector.extract_strided_slice %266 {offsets = [0, 256], sizes = [8, 128], strides = [1, 1]} : vector<8x384xf32> to vector<8x128xf32>
    %272 = arith.negf %271 : vector<8x128xf32>
    %273 = math.exp %272 : vector<8x128xf32>
    %cst_123 = arith.constant 1.000000e+00 : f32
    %274 = vector.broadcast %cst_123 : f32 to vector<8x128xf32>
    %275 = arith.addf %274, %273 : vector<8x128xf32>
    %276 = arith.divf %274, %275 : vector<8x128xf32>
    %cst_124 = arith.constant 1.000000e+00 : f32
    %277 = vector.broadcast %cst_124 : f32 to vector<8x128xf32>
    %278 = arith.subf %277, %276 : vector<8x128xf32>
    %279 = arith.mulf %268, %278 : vector<8x128xf32>
    %280 = arith.mulf %276, %270 : vector<8x128xf32>
    %281 = arith.addf %279, %280 : vector<8x128xf32>
    %282 = arith.index_cast %c7_i32 : i32 to index
    %c0_125 = arith.constant 0 : index
    %c0_126 = arith.constant 0 : index
    %283 = vector.load %arg12[%282, %c0_125, %c0_126] : memref<8x8x128xf32, #tpu.memory_space<vmem>>, vector<1x8x128xf32>
    %284 = vector.shape_cast %283 : vector<1x8x128xf32> to vector<8x128xf32>
    %285 = vector.shape_cast %281 : vector<8x128xf32> to vector<1x8x128xf32>
    tpu.vector_store %arg12[%282, %c0_125, %c0_126], %285 {strides = array<i32>} : memref<8x8x128xf32, #tpu.memory_space<vmem>>, vector<1x8x128xf32>,
    %c8_i32 = arith.constant 8 : i32
    %c0_127 = arith.constant 0 : index
    %c0_128 = arith.constant 0 : index
    %286 = vector.load %arg10[%c0_127, %c0_128] : memref<8x128xf32, #tpu.memory_space<vmem>>, vector<8x128xf32>
    tpu.vector_store %arg10[%c0_127, %c0_128], %281 {strides = array<i32>} : memref<8x128xf32, #tpu.memory_space<vmem>>, vector<8x128xf32>,
    %c0_129 = arith.constant 0 : index
    %c0_130 = arith.constant 0 : index
    %c0_131 = arith.constant 0 : index
    %287 = vector.load %arg12[%c0_129, %c0_130, %c0_131] : memref<8x8x128xf32, #tpu.memory_space<vmem>>, vector<8x8x128xf32>
    %288 = vector.shape_cast %287 : vector<8x8x128xf32> to vector<64x128xf32>
    %c0_132 = arith.constant 0 : index
    %c0_133 = arith.constant 0 : index
    %289 = vector.load %arg7[%c0_132, %c0_133] : memref<128x128xf32, #tpu.memory_space<vmem>>, vector<128x128xf32>
    %cst_134 = arith.constant dense<0.000000e+00> : vector<64x128xf32>
    %290 = tpu.matmul %288, %289, %cst_134 {dimension_numbers = #tpu.dot_dimension_numbers<[1], [0], [0], [1], [0, 0, 1, 1], [], []>} : vector<64x128xf32>, vector<128x128xf32>, vector<64x128xf32> -> vector<64x128xf32>
    %c0_135 = arith.constant 0 : index
    %c0_136 = arith.constant 0 : index
    %291 = vector.load %arg8[%c0_135, %c0_136] : memref<1x128xf32, #tpu.memory_space<vmem>>, vector<1x128xf32>
    %292 = vector.broadcast %291 : vector<1x128xf32> to vector<64x128xf32>
    %293 = arith.addf %290, %292 : vector<64x128xf32>
    %294 = vector.shape_cast %293 : vector<64x128xf32> to vector<8x8x128xf32>
    %c0_137 = arith.constant 0 : index
    %c0_138 = arith.constant 0 : index
    %c0_139 = arith.constant 0 : index
    %295 = vector.load %arg9[%c0_137, %c0_138, %c0_139] : memref<8x8x128xf32, #tpu.memory_space<vmem>>, vector<8x8x128xf32>
    tpu.vector_store %arg9[%c0_137, %c0_138, %c0_139], %294 {strides = array<i32>} : memref<8x8x128xf32, #tpu.memory_space<vmem>>, vector<8x8x128xf32>,
    return
  }
  func.func @transform_0(%arg0: i32) -> (i32, i32, i32) {
    %c0_i32 = arith.constant 0 : i32
    %c0_i32_0 = arith.constant 0 : i32
    %c0_i32_1 = arith.constant 0 : i32
    return %arg0, %c0_i32, %c0_i32_0 : i32, i32, i32
  }
  func.func @transform_1(%arg0: i32) -> (i32, i32) {
    %c0_i32 = arith.constant 0 : i32
    %c0_i32_0 = arith.constant 0 : i32
    %c0_i32_1 = arith.constant 0 : i32
    return %c0_i32, %c0_i32_0 : i32, i32
  }
  func.func @transform_2(%arg0: i32) -> (i32, i32) {
    %c0_i32 = arith.constant 0 : i32
    %c0_i32_0 = arith.constant 0 : i32
    %c0_i32_1 = arith.constant 0 : i32
    return %c0_i32, %c0_i32_0 : i32, i32
  }
  func.func @transform_3(%arg0: i32) -> (i32, i32) {
    %c0_i32 = arith.constant 0 : i32
    %c0_i32_0 = arith.constant 0 : i32
    %c0_i32_1 = arith.constant 0 : i32
    return %c0_i32, %c0_i32_0 : i32, i32
  }
  func.func @transform_4(%arg0: i32) -> (i32, i32) {
    %c0_i32 = arith.constant 0 : i32
    %c0_i32_0 = arith.constant 0 : i32
    %c0_i32_1 = arith.constant 0 : i32
    return %c0_i32, %c0_i32_0 : i32, i32
  }
  func.func @transform_5(%arg0: i32) -> (i32, i32) {
    %c0_i32 = arith.constant 0 : i32
    %c0_i32_0 = arith.constant 0 : i32
    %c0_i32_1 = arith.constant 0 : i32
    return %c0_i32, %c0_i32_0 : i32, i32
  }
  func.func @transform_6(%arg0: i32) -> (i32, i32) {
    %c0_i32 = arith.constant 0 : i32
    %c0_i32_0 = arith.constant 0 : i32
    %c0_i32_1 = arith.constant 0 : i32
    return %c0_i32, %c0_i32_0 : i32, i32
  }
  func.func @transform_7(%arg0: i32) -> (i32, i32) {
    %c0_i32 = arith.constant 0 : i32
    %c0_i32_0 = arith.constant 0 : i32
    %c0_i32_1 = arith.constant 0 : i32
    return %c0_i32, %c0_i32_0 : i32, i32
  }
  func.func @transform_8(%arg0: i32) -> (i32, i32, i32) {
    %c0_i32 = arith.constant 0 : i32
    %c0_i32_0 = arith.constant 0 : i32
    %c0_i32_1 = arith.constant 0 : i32
    return %arg0, %c0_i32, %c0_i32_0 : i32, i32, i32
  }
}

</mosaic_0001>

<bundles_post_ra>
// kernel: tpu_custom_call.1
= control target key start
LH: loop header
LB: loop body
LE: loop exit
PB: predicated region body
PF: predicated region fallthrough
CT: control target
= control target key end

     0   :  { %s6157_s0 = inlined_call_operand.hbm [shape: f32[16,8,32], index: 0, kind: input, shape index: {}]   ;;  %s6158_s1 = inlined_call_operand.hbm [shape: f32[32,128], index: 1, kind: input, shape index: {}]   ;;  %s6159_s2 = inlined_call_operand.vmem [shape: f32[1,128], index: 2, kind: input, shape index: {}]   ;;  %s6160_s3 = inlined_call_operand.hbm [shape: f32[128,128], index: 3, kind: input, shape index: {}]   ;;  %s6161_s4 = inlined_call_operand.hbm [shape: f32[128,384], index: 4, kind: input, shape index: {}]   ;;  %s6162_s5 = inlined_call_operand.vmem [shape: f32[1,384], index: 5, kind: input, shape index: {}]   ;;  %s6163_s6 = inlined_call_operand.hbm [shape: f32[128,128], index: 6, kind: input, shape index: {}]   ;;  %s6164_s7 = inlined_call_operand.vmem [shape: f32[1,128], index: 7, kind: input, shape index: {}]   ;;  %s6165_s8 = inlined_call_operand.hbm [shape: f32[16,8,128], index: 8, kind: output, shape index: {}]  }
   0x1   :  { %6257 = sst [smem:[#allocation46_spill]] %s6158_s1 }
   0x2   :  { %6258 = sst [smem:[#allocation47_spill]] %s6160_s3 }
   0x3   :  { %13 = vsyncpa [#allocation6], 0 }
   0x4   :  { %15 = vsyncpa [#allocation6 + $0x1], 0 }
   0x5   :  { %16 = vsyncpa [#allocation9], 0 }
   0x6   :  { %17 = vsyncpa [#allocation12], 0 }
   0x7   :  { %18 = vsyncpa [#allocation7], 0 }
   0x8   :  { %20 = vsyncpa [#allocation7 + $0x1], 0  ;;  %s4610_s27 = smov 0   ;;  %s4612_s28 = smov 0  }
   0x9   :  { %s4614_s29 = smov 0   ;;  %s4616_s30 = smov 0  }
   0xa LB: > { %s4631_s9 = sadd.s32 4294967295, %s4548_s30   ;;  %s3192_s10 = sadd.s32 4294967294, %s4548_s30   ;;  %s4548_s30 = sphi %s4616_s30, %s6423_s30   ;;  %s4544_s29 = sphi %s4614_s29, %s6422_s29   ;;  %s4540_s28 = sphi %s4612_s28, %s6421_s28   ;;  %s4536_s27 = sphi %s4610_s27, %s6420_s27  }
   0xb   : > { %p46_p0 = scmp.ne.s32.totalorder %s4540_s28, %s4536_s27  ;;  %p6166_p1 = scmp.eq.s32.totalorder %s4631_s9, 0 }
   0xc   : > { %p223_p3 = scmp.eq.s32.totalorder %s3192_s10, 1  ;;  %p3193_p5 = scmp.ge.s32.totalorder %s4548_s30, 1 }
   0xd   : > { %p4640_p4 = por %p6166_p1, %p46_p0  ;;  %p230_p7 = scmp.lt.s32.totalorder %s4548_s30, 3 }
   0xe   : > { %p4645_p6 = por %p223_p3, %p46_p0  ;;  %s4550_s14 = smov [#allocation8]  }
   0xf   : > { %s6259_s11 = scalar_select %p4640_p4, 1, 0 }
  0x10   : > { %s6260_s12 = scalar_select %p4645_p6, 1, 0 }
  0x11   : > { %p4651_p9 = pnand %p3193_p5, %p230_p7  ;;  %s242_s15 = sshll.u32 %s4550_s14, 4  ;;  %s243_s15 = int_to_ptr.vmem [resolvable:$true] %s242_s15 }
  0x12   : > { %s4551_s17 = smov [#allocation11]   ;;  %s4355_s19 = scalar_lea.vmem %s243_s15, 512 }
  0x13   : > { %s6261_s13 = scalar_select %p4651_p9, 1, 0 }
  0x14   : > { %p4187_p10 = pneg %p4651_p9  ;;  %s271_s18 = sshll.u32 %s4551_s17, 4  ;;  %s272_s18 = int_to_ptr.vmem [resolvable:$true] %s271_s18 }
  0x15   : > { %p4356_p0 = scmp.ne.s32.totalorder %s243_s15, %s4355_s19  ;;  %p4363_p7 = scmp.lt.s32.totalorder %s243_s15, %s243_s15 }
  0x16   : > { %p4660_p12 = pnand %p4187_p10, %p6166_p1  ;;  %p4364_p11 = scmp.lt.s32.totalorder %s4355_s19, %s4355_s19 }
  0x18   : > { %p4346_p13 = pneg %p4660_p12  ;;  %p4365_p8 = por %p4364_p11, %p4363_p7 }
  0x1a   : > { %p4358_p3 = pnand %p4356_p0, %p4346_p13 }
  0x1c   : > { %p4359_p5 = pneg %p4358_p3 }
  0x1e   : > { %p4366_p10 = pnand %p4365_p8, %p4359_p5 }
  0x20   : > { %4369 = shalt.err (!%p4366_p10)
}
  0x21   : > { %s6167_s20 = smov 128   ;;  %s6168_s21 = smov 8  }
  0x22   : > { %s6263_s1 = sld [smem:[#allocation46_spill]]  ;;  %s4381_s24 = scalar_lea.vmem %s272_s18, 6144 }
  0x23   : > { %p4382_p0 = scmp.ne.s32.totalorder %s272_s18, %s4381_s24  ;;  %p4389_p8 = scmp.lt.s32.totalorder %s272_s18, %s272_s18 }
  0x24   : > { %p4390_p5 = scmp.lt.s32.totalorder %s4381_s24, %s4381_s24 }
  0x25   : > { %p4384_p3 = pnand %p4382_p0, %p4346_p13 }
  0x26   : > { %p4391_p7 = por %p4390_p5, %p4389_p8 }
  0x27   : > { %p4385_p11 = pneg %p4384_p3 }
  0x28   : > { %4190 = dma.hbm_to_vmem [thread:$0]  (!%p4660_p12), %s6263_s1, 512, %s243_s15, [#allocation9], %s6167_s20, %s6167_s20, %s6168_s21  }
  0x29   : > { %p4392_p10 = pnand %p4391_p7, %p4385_p11 }
  0x2b   : > { %4395 = shalt.err (!%p4392_p10)
}
  0x2c   : > { %s4554_s25 = smov 384   ;;  %s4555_s26 = smov 24  }
  0x2d   : > { %4196 = dma.hbm_to_vmem [thread:$0]  (!%p4660_p12), %s6161_s4, 6144, %s272_s18, [#allocation12], %s4554_s25, %s4554_s25, %s4555_s26  }
  0x2e   : > { %s4556_s15 = smov [#allocation10]   ;;  %s4557_s19 = smov [#allocation13]  }
  0x2f   : > { %s258_s17 = sshll.u32 %s4556_s15, 4  ;;  %s287_s22 = sshll.u32 %s4557_s19, 4  ;;  %s259_s17 = int_to_ptr.vmem [resolvable:$true] %s258_s17  ;;  %s288_s22 = int_to_ptr.vmem [resolvable:$true] %s287_s22 }
  0x30   : > { %s4407_s23 = scalar_lea.vmem %s259_s17, 2048  ;;  %p4415_p8 = scmp.lt.s32.totalorder %s259_s17, %s259_s17 }
  0x31   : > { %p4408_p0 = scmp.ne.s32.totalorder %s259_s17, %s4407_s23  ;;  %p4416_p5 = scmp.lt.s32.totalorder %s4407_s23, %s4407_s23 }
  0x33   : > { %p4410_p3 = pnand %p4408_p0, %p4346_p13  ;;  %p4417_p7 = por %p4416_p5, %p4415_p8 }
  0x35   : > { %p4411_p11 = pneg %p4410_p3 }
  0x37   : > { %p4418_p10 = pnand %p4417_p7, %p4411_p11 }
  0x39   : > { %4421 = shalt.err (!%p4418_p10)
}
  0x3a   : > { %s6264_s3 = sld [smem:[#allocation47_spill]]  ;;  %s4433_s25 = scalar_lea.vmem %s288_s22, 2048 }
  0x3b   : > { %p4434_p1 = scmp.ne.s32.totalorder %s288_s22, %s4433_s25  ;;  %p4441_p2 = scmp.lt.s32.totalorder %s288_s22, %s288_s22 }
  0x3c   : > { %p4442_p8 = scmp.lt.s32.totalorder %s4433_s25, %s4433_s25 }
  0x3d   : > { %p4436_p0 = pnand %p4434_p1, %p4346_p13 }
  0x3e   : > { %p4443_p11 = por %p4442_p8, %p4441_p2 }
  0x3f   : > { %p4437_p3 = pneg %p4436_p0 }
  0x40   : > { %4193 = dma.hbm_to_vmem [thread:$0]  (!%p4660_p12), %s6264_s3, 2048, %s259_s17, [#allocation9], %s6167_s20, %s6167_s20, %s6168_s21  }
  0x41   : > { %p4444_p5 = pnand %p4443_p11, %p4437_p3 }
  0x43   : > { %4447 = shalt.err (!%p4444_p5)
}
  0x44   : > { %4199 = dma.hbm_to_vmem [thread:$0]  (!%p4660_p12), %s6163_s6, 2048, %s288_s22, [#allocation12], %s6167_s20, %s6167_s20, %s6168_s21  }
  0x45   : > { %s4708_s14 = sadd.s32 1, %s4548_s30   ;;  %s33_s15 = sadd.s32 1, %s4544_s29 }
  0x46   : > { %s30_s16 = ssub.s32 %s4548_s30, %s4708_s14  ;;  %p40_p2 = scmp.ne.s32.totalorder %s4544_s29, %s4540_s28 }
  0x47   : > { %p31_p1 = scmp.eq.s32.totalorder %s30_s16, 0  ;;  %p41_p13 = scmp.eq.s32.totalorder %s4548_s30, 0 }
  0x48   : > { %p6265_p10 = scmp.eq.s32.totalorder %s4631_s9, 1  ;;  %p4212_p3 = scmp.lt.s32.totalorder %s4548_s30, 2 }
  0x49   : > { %s4717_s17 = scalar_select %p31_p1, %s4544_s29, %s33_s15  }
  0x4a   : > { %p42_p7 = por %p41_p13, %p40_p2  ;;  %p4721_p0 = por %p6265_p10, %p40_p2 }
  0x4b   : > { %s304_s23 = sand.u32 1, %s4544_s29   ;;  %s3233_s22 = sshll.u32 %s4548_s30, 10 }
  0x4c   : > { %s6266_s19 = scalar_select %p4721_p0, 1, 0 }
  0x4d   : > { %s3199_s18 = sshll.u32 %s304_s23, 6  ;;  %s4731_s26 = scalar_lea.hbm %s6157_s0, %s3233_s22 }
  0x4e   : > { %s308_s10 = scalar_lea.vmem [#allocation5], %s3199_s18  ;;  %p4735_p12 = pnand %p4212_p3, %p42_p7 }
  0x4f   : > { %s315_s16 = sshll.u32 %s308_s10, 4  ;;  %s4739_s20 = scalar_lea.sflag [#allocation6], %s304_s23  ;;  %s4733_s16 = int_to_ptr.vmem [resolvable:$true] %s315_s16 }
  0x50   : > { %s4448_s21 = scalar_lea.hbm %s4731_s26, 1024  ;;  %p4450_p11 = pneg %p4735_p12 }
  0x51   : > { %p4449_p8 = scmp.ne.s32.totalorder %s4731_s26, %s4448_s21  ;;  %s4453_s18 = scalar_lea.hbm %s6157_s0, 2048 }
  0x52   : > { %p4454_p2 = scmp.lt.s32.totalorder %s4731_s26, %s6157_s0  ;;  %p4455_p13 = scmp.lt.s32.totalorder %s4453_s18, %s4448_s21 }
  0x53   : > { %p4451_p5 = pnand %p4450_p11, %p4449_p8 }
  0x54   : > { %p4456_p7 = por %p4455_p13, %p4454_p2 }
  0x55   : > { %p4452_p1 = pneg %p4451_p5 }
  0x57   : > { %p4457_p10 = pnand %p4456_p7, %p4452_p1 }
  0x59   : > { %4460 = shalt.err (!%p4457_p10)
}
  0x5a   : > { %s4461_s23 = scalar_lea.vmem %s4733_s16, 1024  ;;  %s4558_s1 = smov [#allocation5]  }
  0x5b   : > { %p4462_p3 = scmp.ne.s32.totalorder %s4733_s16, %s4461_s23  ;;  %s4466_s3 = sshll.u32 %s4558_s1, 4  ;;  %s4467_s3 = int_to_ptr.vmem [resolvable:$false] %s4466_s3 }
  0x5c   : > { %s4468_s22 = scalar_lea.vmem %s4467_s3, 2048  ;;  %p4469_p5 = scmp.lt.s32.totalorder %s4733_s16, %s4467_s3 }
  0x5d   : > { %p4464_p6 = pnand %p4462_p3, %p4450_p11  ;;  %p4470_p0 = scmp.lt.s32.totalorder %s4468_s22, %s4461_s23 }
  0x5f   : > { %p4465_p8 = pneg %p4464_p6  ;;  %p4471_p4 = por %p4470_p0, %p4469_p5 }
  0x61   : > { %p4472_p9 = pnand %p4471_p4, %p4465_p8 }
  0x63   : > { %4475 = shalt.err (!%p4472_p9)
}
  0x64   : > { %s6268_s21 = smov 8   ;;  %s6269_s24 = smov 128  }
  0x65   : > { %4203 = dma.hbm_to_vmem [thread:$0]  (!%p4735_p12), %s4731_s26, 1024, %s4733_s16, %s4739_s20, %s6269_s24, %s6269_s24, %s6268_s21  }
  0x66   : > { %p6270_p6 = scmp.ne.s32.totalorder %s6261_s13, 0 }
  0x68   : > { %327 = sbr.rel (%p6270_p6) target bundleno = 3941 (0xf65), region = 52 }
  0x6d   : > { %s4766_s1 = sand.u32 1, %s4540_s28   ;;  %p6271_p4 = scmp.ne.s32.totalorder %s6259_s11, 0 }
  0x6e   : > { %s3203_s3 = sshll.u32 %s4766_s1, 6  ;;  %s330_s18 = scalar_lea.sflag [#allocation6], %s4766_s1 }
  0x6f   : > { %s4770_s25 = scalar_lea.vmem [#allocation5], %s3203_s3 }
  0x70   : > { %4519 = dma.done.wait (%p6271_p4), %s330_s18, 1024  }
  0x71   : > { %4521 = vsyncadd (%p6271_p4), %s330_s18, 4294966272  ;;  %p6272_p9 = scmp.eq.s32.totalorder %s4631_s9, 0 }
  0x73   : > { %4523 = dma.done.wait (%p6272_p9), [#allocation9], 2560   ;;  %p6273_p0 = pmov %p6272_p9 }
  0x75   : > { %4525 = vsyncadd (%p6273_p0), [#allocation9], 4294964736  ;;  %p6274_p12 = pmov %p6273_p0 }
  0x76   : > { %p6275_p11 = pmov %p6273_p0 }
  0x77   : > { %4527 = dma.done.wait (%p6274_p12), [#allocation12], 8192  }
  0x78   : > { %4529 = vsyncadd (%p6275_p11), [#allocation12], 4294959104  ;;  %s4784_s13 = scalar_lea.vmem [#allocation14], %s3203_s3  ;;  %p6276_p1 = scmp.ne.s32.totalorder %s4631_s9, 0 }
  0x7a   : > { %387 = sbr.rel (%p6276_p1) target bundleno = 129 (0x81), region = 76 }
  0x7f   : > { %v4559_v0 = vmov 0.0  }
  0x80   : > { %388 = vst [vmem:[#allocation2] sm:$0xff] %v4559_v0 }
  0x81 PF: > { %v4788_v1 = vld [vmem:[#allocation10 + $0x78] sm:$0xff]  ;;  %v6196_v2 = vmov 0.0   ;;  %v4791_v3 = vld [vmem:[#allocation10 + $0x70] sm:$0xff]  ;;  %vm4561_vm0 = vmmov 0   ;;  %v4797_v4 = vld [vmem:[#allocation10 + $0x68] sm:$0xff]  ;;  %vm408_vm1 = vcmask 261120  }
  0x82   : > { %3563 = vmatprep.subr.mxu0 %v6196_v2  ;;  %3595 = vmatprep.mubr.msk.f32.mxu0 %vm4561_vm0, %v6196_v2  ;;  %v400_v5 = vld [vmem:[#allocation8 + $0x18] sm:$0xff]  ;;  %v399_v6 = vld [vmem:[#allocation8 + $0x10] sm:$0xff]  ;;  %v4801_v7 = vld [vmem:[#allocation10 + $0x60] sm:$0xff]  ;;  %s3234_s21 = sshll.u32 %s4631_s9, 10  ;;  %s3081_s24 = sshll.u32 %s4784_s13, 4  ;;  %s6112_s24 = int_to_ptr.vmem [resolvable:$true] %s3081_s24 }
  0x83   : > { %3564 = vmatpush3.msra.mxu0 %v4788_v1  ;;  %3543 = vmatprep.subr.mxu1 %v400_v5  ;;  %v398_v8 = vld [vmem:[#allocation8 + $0x8] sm:$0xff]  ;;  %v4805_v9 = vld [vmem:[#allocation10 + $0x58] sm:$0xff]  ;;  %v397_v10 = vld [vmem:[#allocation8] sm:$0xff]  ;;  %s3068_s11 = scalar_lea.sflag [#allocation7], %s4766_s1  ;;  %s4476_s20 = scalar_lea.vmem %s6112_s24, 1024 }
  0x84   : > { %3565 = vmatprep.subr.mxu0 %v6196_v2  ;;  %3544 = vmatpush3.msra.mxu1 %v400_v5  ;;  %v4809_v11 = vld [vmem:[#allocation10 + $0x50] sm:$0xff]  ;;  %v389_v12 = vld [vmem:[%s4770_s25] sm:$0xff]  ;;  %v390_v13 = vld [vmem:[%s4770_s25 + $0x8] sm:$0xff]  ;;  %p4477_p2 = scmp.ne.s32.totalorder %s6112_s24, %s4476_s20  ;;  %p6417_p13 = scmp.ne.s32.totalorder %s6266_s19, 0 }
  0x85   : > { %3566 = vmatpush3.msra.mxu0 %v4791_v3  ;;  %3545 = vmatprep.subr.mxu1 %v399_v6  ;;  %v4815_v14 = vld [vmem:[#allocation10 + $0x48] sm:$0xff]  ;;  %v4819_v15 = vld [vmem:[#allocation11 + $0x178] sm:$0xff]  ;;  %v4822_v16 = vld [vmem:[#allocation10 + $0x40] sm:$0xff]  ;;  %s4562_s9 = smov [#allocation14]  }
  0x86   : > { %3567 = vmatprep.subr.mxu0 %v6196_v2  ;;  %3546 = vmatpush3.msra.mxu1 %v399_v6  ;;  %v4827_v17 = vld [vmem:[#allocation11 + $0x160] sm:$0xff]  ;;  %v4830_v18 = vld [vmem:[#allocation10 + $0x38] sm:$0xff]  ;;  %v4836_v19 = vld [vmem:[#allocation10 + $0x30] sm:$0xff]  ;;  %p4478_p7 = pnand %p4477_p2, %p6417_p13  ;;  %s4480_s26 = sshll.u32 %s4562_s9, 4  ;;  %s4481_s26 = int_to_ptr.vmem [resolvable:$false] %s4480_s26 }
  0x87   : > { %3568 = vmatpush3.msra.mxu0 %v4797_v4  ;;  %3547 = vmatprep.subr.mxu1 %v398_v8  ;;  %v4842_v20 = vld [vmem:[#allocation10 + $0x28] sm:$0xff]  ;;  %v4846_v21 = vld [vmem:[#allocation10 + $0x20] sm:$0xff]  ;;  %v4850_v22 = vld [vmem:[#allocation10 + $0x18] sm:$0xff]  ;;  %s4482_s16 = scalar_lea.vmem %s4481_s26, 2048  ;;  %p4483_p3 = scmp.lt.s32.totalorder %s6112_s24, %s4481_s26 }
  0x88   : > { %3569 = vmatprep.subr.mxu0 %v6196_v2  ;;  %3548 = vmatpush3.msra.mxu1 %v398_v8  ;;  %v4854_v23 = vld [vmem:[#allocation10 + $0x10] sm:$0xff]  ;;  %v4858_v24 = vld [vmem:[#allocation10 + $0x8] sm:$0xff]  ;;  %v4862_v25 = vld [vmem:[#allocation10] sm:$0xff]  ;;  %p4479_p10 = pneg %p4478_p7  ;;  %p4484_p8 = scmp.lt.s32.totalorder %s4482_s16, %s4476_s20 }
  0x89   : > { %3570 = vmatpush3.msra.mxu0 %v4801_v7  ;;  %3549 = vmatprep.subr.mxu1 %v397_v10  ;;  %6277 = vst [vmem:[#allocation19_spill] sm:$0xff] %v4858_v24  ;;  %6278 = vst [vmem:[#allocation20_spill] sm:$0xff] %v4862_v25  ;;  %v547_v26 = vld [vmem:[#allocation2] sm:$0xff]  ;;  %v4865_v27 = vld [vmem:[#allocation11 + $0x170] sm:$0xff] }
  0x8a   : > { %3571 = vmatprep.subr.mxu0 %v6196_v2  ;;  %3550 = vmatpush3.msra.mxu1 %v397_v10  ;;  %v4868_v28 = vld [vmem:[#allocation11 + $0x168] sm:$0xff]  ;;  %v4871_v29 = vld [vmem:[#allocation11 + $0x158] sm:$0xff]  ;;  %v4874_v30 = vld [vmem:[#allocation11 + $0x150] sm:$0xff]  ;;  %p4485_p5 = por %p4484_p8, %p4483_p3 }
  0x8b   : > { %3572 = vmatpush3.msra.mxu0 %v4805_v9  ;;  %3551 = vmatprep.mubr.msk.f32.mxu1 %vm408_vm1, %v389_v12  ;;  %v4877_v31 = vld [vmem:[#allocation11 + $0x140] sm:$0xff]  ;;  %v4883_v32 = vld [vmem:[#allocation11 + $0x138] sm:$0xff]  ;;  %v4885_v33 = vld [vmem:[#allocation11 + $0x148] sm:$0xff] }
  0x8c   : > { %3573 = vmatprep.subr.mxu0 %v6196_v2  ;;  %3552 = vmatmul.mubr.msk.f32.vlgmr.msra.gmra.mxu1 %vm408_vm1, %v390_v13  ;;  %v4887_v34 = vld [vmem:[#allocation11 + $0x128] sm:$0xff]  ;;  %v4893_v35 = vld [vmem:[#allocation11 + $0x120] sm:$0xff]  ;;  %v4895_v36 = vld [vmem:[#allocation11 + $0x130] sm:$0xff]  ;;  %p4486_p6 = pnand %p4485_p5, %p4479_p10 }
  0x8d   : > { %3574 = vmatpush3.msra.mxu0 %v4809_v11  ;;  %3598 = vmatprep.subr.mxu1 %v6196_v2  ;;  %v4897_v37 = vld [vmem:[#allocation11 + $0x110] sm:$0xff]  ;;  %v4901_v38 = vld [vmem:[#allocation11 + $0x108] sm:$0xff]  ;;  %v4903_v39 = vld [vmem:[#allocation11 + $0x118] sm:$0xff] }
  0x8e   : > { %3575 = vmatprep.subr.mxu0 %v6196_v2  ;;  %3599 = vmatpush3.msra.mxu1 %v4819_v15  ;;  %v4905_v40 = vld [vmem:[#allocation11 + $0xf8] sm:$0xff]  ;;  %v4913_v41 = vld [vmem:[#allocation11 + $0xf0] sm:$0xff]  ;;  %v4915_v42 = vld [vmem:[#allocation11 + $0x100] sm:$0xff] }
  0x8f   : > { %3576 = vmatpush3.msra.mxu0 %v4815_v14  ;;  %3600 = vmatprep.subr.mxu1 %v6196_v2  ;;  %6279 = vst [vmem:[#allocation21_spill] sm:$0xff] %v4915_v42  ;;  %v4919_v43 = vld [vmem:[#allocation11 + $0xe0] sm:$0xff]  ;;  %v4923_v44 = vld [vmem:[#allocation11 + $0xd8] sm:$0xff]  ;;  %v4925_v45 = vld [vmem:[#allocation11 + $0xe8] sm:$0xff] }
  0x90   : > { %3577 = vmatprep.subr.mxu0 %v6196_v2  ;;  %3601 = vmatpush3.msra.mxu1 %v4827_v17  ;;  %6280 = vst [vmem:[#allocation22_spill] sm:$0xff] %v4925_v45  ;;  %v4929_v46 = vld [vmem:[#allocation11 + $0xc8] sm:$0xff]  ;;  %v4933_v47 = vld [vmem:[#allocation11 + $0xc0] sm:$0xff]  ;;  %v4935_v48 = vld [vmem:[#allocation11 + $0xd0] sm:$0xff] }
  0x91   : > { %3578 = vmatpush3.msra.mxu0 %v4822_v16  ;;  %3602 = vmatprep.subr.mxu1 %v6196_v2  ;;  %6281 = vst [vmem:[#allocation23_spill] sm:$0xff] %v4935_v48  ;;  %v4939_v49 = vld [vmem:[#allocation11 + $0xb0] sm:$0xff]  ;;  %v4944_v51 = vld [vmem:[#allocation11 + $0xa8] sm:$0xff]  ;;  %v4946_v52 = vld [vmem:[#allocation11 + $0xb8] sm:$0xff] }
  0x92   : > { %3579 = vmatprep.subr.mxu0 %v6196_v2  ;;  %3603 = vmatpush3.msra.mxu1 %v4885_v33  ;;  %v391_v50 = vld [vmem:[%s4770_s25 + $0x10] sm:$0xff]  ;;  %6282 = vst [vmem:[#allocation24_spill] sm:$0xff] %v4946_v52  ;;  %v392_v53 = vld [vmem:[%s4770_s25 + $0x18] sm:$0xff]  ;;  %v4957_v56 = vld [vmem:[#allocation11 + $0xa0] sm:$0xff] }
  0x93   : > { %3580 = vmatpush3.msra.mxu0 %v4830_v18  ;;  %3604 = vmatprep.subr.mxu1 %v6196_v2  ;;  %v4951_v54 = vld [vmem:[#allocation11 + $0x98] sm:$0xff]  ;;  %v4955_v55 = vld [vmem:[#allocation11 + $0x90] sm:$0xff]  ;;  %6283 = vst [vmem:[#allocation25_spill] sm:$0xff] %v4957_v56  ;;  %v4961_v57 = vld [vmem:[#allocation11 + $0x80] sm:$0xff] }
  0x94   : > { %3581 = vmatprep.subr.mxu0 %v6196_v2  ;;  %3605 = vmatpush3.msra.mxu1 %v4895_v36  ;;  %v393_v58 = vld [vmem:[%s4770_s25 + $0x20] sm:$0xff]  ;;  %v4966_v59 = vld [vmem:[#allocation11 + $0x78] sm:$0xff]  ;;  %v4968_v60 = vld [vmem:[#allocation11 + $0x88] sm:$0xff] }
  0x95   : > { %3582 = vmatpush3.msra.mxu0 %v4836_v19  ;;  %3606 = vmatprep.subr.mxu1 %v6196_v2  ;;  %6284 = vst [vmem:[#allocation26_spill] sm:$0xff] %v4968_v60  ;;  %v394_v61 = vld [vmem:[%s4770_s25 + $0x28] sm:$0xff]  ;;  %v4977_v63 = vld [vmem:[#allocation11 + $0x60] sm:$0xff]  ;;  %v4979_v0 = vld [vmem:[#allocation11 + $0x70] sm:$0xff] }
  0x96   : > { %3583 = vmatprep.subr.mxu0 %v6196_v2  ;;  %3607 = vmatpush3.msra.mxu1 %v4903_v39  ;;  %v4973_v62 = vld [vmem:[#allocation11 + $0x68] sm:$0xff]  ;;  %6285 = vst [vmem:[#allocation27_spill] sm:$0xff] %v4979_v0  ;;  %v4983_v5 = vld [vmem:[#allocation11 + $0x50] sm:$0xff]  ;;  %v4992_v10 = vld [vmem:[#allocation11 + $0x58] sm:$0xff] }
  0x97   : > { %3584 = vmatpush3.msra.mxu0 %v4842_v20  ;;  %3608 = vmatprep.subr.mxu1 %v6196_v2  ;;  %v395_v6 = vld [vmem:[%s4770_s25 + $0x30] sm:$0xff]  ;;  %v4988_v8 = vld [vmem:[#allocation11 + $0x48] sm:$0xff]  ;;  %6286 = vst [vmem:[#allocation28_spill] sm:$0xff] %v4992_v10  ;;  %v4994_v12 = vld [vmem:[#allocation11 + $0x38] sm:$0xff] }
  0x98   : > { %3585 = vmatprep.subr.mxu0 %v6196_v2  ;;  %3609 = vmatpush3.msra.mxu1 %v4915_v42  ;;  %6287 = vst [vmem:[#allocation29_spill] sm:$0xff] %v4994_v12  ;;  %v396_v13 = vld [vmem:[%s4770_s25 + $0x38] sm:$0xff]  ;;  %s6110_s25 = scalar_lea.hbm %s6165_s8, %s3234_s21 }
  0x99   : > { %3586 = vmatpush3.msra.mxu0 %v4846_v21  ;;  %3610 = vmatprep.subr.mxu1 %v6196_v2 }
  0x9a   : > { %3587 = vmatprep.subr.mxu0 %v6196_v2  ;;  %3611 = vmatpush3.msra.mxu1 %v4925_v45 }
  0x9b   : > { %3588 = vmatpush3.msra.mxu0 %v4850_v22  ;;  %3612 = vmatprep.subr.mxu1 %v6196_v2 }
  0x9c   : > { %3589 = vmatprep.subr.mxu0 %v6196_v2  ;;  %3613 = vmatpush3.msra.mxu1 %v4935_v48 }
  0x9d   : > { %3590 = vmatpush3.msra.mxu0 %v4854_v23  ;;  %3614 = vmatprep.subr.mxu1 %v6196_v2 }
  0x9e   : > { %3591 = vmatprep.subr.mxu0 %v6196_v2  ;;  %3554 = vmatprep.mubr.msk.f32.mxu1 %vm408_vm1, %v391_v50  ;;  %v5003_v50 = vld [vmem:[#allocation11 + $0x40] sm:$0xff] }
  0x9f   : > { %3592 = vmatpush3.msra.mxu0 %v4858_v24  ;;  %3615 = vmatpush3.msra.mxu1 %v4946_v52  ;;  %6289 = vst [vmem:[#allocation31_spill] sm:$0xff] %v5003_v50 }
  0xa0   : > { %3593 = vmatprep.subr.mxu0 %v6196_v2  ;;  %3555 = vmatmul.mubr.msk.f32.gmra.mxu1 %vm408_vm1, %v392_v53  ;;  %v5007_v53 = vld [vmem:[#allocation11 + $0x20] sm:$0xff] }
  0xa1   : > { %3594 = vmatpush3.msra.mxu0 %v4862_v25  ;;  %3616 = vmatprep.subr.mxu1 %v6196_v2  ;;  %6290 = vst [vmem:[#allocation32_spill] sm:$0xff] %v5007_v53 }
  0xa2   : > { %3596 = vmatmul.mubr.f32.vlgmr.msra.gmra.mxu0 %v547_v26  ;;  %703 = vmatprep.subr.mxu0 %v4865_v27  ;;  %v5001_v26 = vld [vmem:[#allocation11 + $0x30] sm:$0xff] }
  0xa3   : > { %704 = vmatpush1.msra.mxu0 %v4868_v28  ;;  %767 = vmatprep.mubr.f32.mxu0 %v6196_v2  ;;  %6288 = vst [vmem:[#allocation30_spill] sm:$0xff] %v5001_v26 }
  0xa4   : > { %705 = vmatprep.subr.mxu0 %v4871_v29  ;;  %3617 = vmatpush3.msra.mxu1 %v4957_v56 }
  0xa5   : > { %706 = vmatpush1.msra.mxu0 %v4874_v30  ;;  %3618 = vmatprep.subr.mxu1 %v6196_v2 }
  0xa6   : > { %707 = vmatprep.subr.mxu0 %v4877_v31  ;;  %3557 = vmatprep.mubr.msk.f32.mxu1 %vm408_vm1, %v393_v58  ;;  %v5011_v58 = vld [vmem:[#allocation11 + $0x18] sm:$0xff] }
  0xa7   : > { %708 = vmatpush1.msra.mxu0 %v4883_v32  ;;  %3619 = vmatpush3.msra.mxu1 %v4968_v60  ;;  %6291 = vst [vmem:[#allocation33_spill] sm:$0xff] %v5011_v58 }
  0xa8   : > { %709 = vmatprep.subr.mxu0 %v4887_v34  ;;  %3558 = vmatmul.mubr.msk.f32.gmra.mxu1 %vm408_vm1, %v394_v61  ;;  %v5013_v61 = vld [vmem:[#allocation11 + $0x28] sm:$0xff] }
  0xa9   : > { %710 = vmatpush1.msra.mxu0 %v4893_v35  ;;  %3620 = vmatprep.subr.mxu1 %v6196_v2  ;;  %6292 = vst [vmem:[#allocation34_spill] sm:$0xff] %v5013_v61 }
  0xaa   : > { %711 = vmatprep.subr.mxu0 %v4897_v37  ;;  %3621 = vmatpush3.msra.mxu1 %v4979_v0  ;;  %v5023_v0 = vld [vmem:[#allocation11 + $0x10] sm:$0xff] }
  0xab   : > { %712 = vmatpush1.msra.mxu0 %v4901_v38  ;;  %3622 = vmatprep.subr.mxu1 %v6196_v2  ;;  %6295 = vst [vmem:[#allocation37_spill] sm:$0xff] %v5023_v0 }
  0xac   : > { %713 = vmatprep.subr.mxu0 %v4905_v40  ;;  %3560 = vmatprep.mubr.msk.f32.mxu1 %vm408_vm1, %v395_v6  ;;  %v5017_v6 = vld [vmem:[#allocation11 + $0x8] sm:$0xff] }
  0xad   : > { %714 = vmatpush1.msra.mxu0 %v4913_v41  ;;  %3623 = vmatpush3.msra.mxu1 %v4992_v10  ;;  %6293 = vst [vmem:[#allocation35_spill] sm:$0xff] %v5017_v6  ;;  %v5021_v10 = vld [vmem:[#allocation11] sm:$0xff] }
  0xae   : > { %715 = vmatprep.subr.mxu0 %v4919_v43  ;;  %3561 = vmatmul.mubr.msk.f32.gmra.mxu1 %vm408_vm1, %v396_v13  ;;  %6294 = vst [vmem:[#allocation36_spill] sm:$0xff] %v5021_v10 }
  0xaf   : > { %716 = vmatpush1.msra.mxu0 %v4923_v44  ;;  %3624 = vmatprep.subr.mxu1 %v6196_v2 }
  0xb0   : > { %717 = vmatprep.subr.mxu0 %v4929_v46  ;;  %3625 = vmatpush3.msra.mxu1 %v5003_v50 }
  0xb1   : > { %718 = vmatpush1.msra.mxu0 %v4933_v47  ;;  %3626 = vmatprep.subr.mxu1 %v6196_v2 }
  0xb2   : > { %719 = vmatprep.subr.mxu0 %v4939_v49  ;;  %3627 = vmatpush3.msra.mxu1 %v5013_v61  ;;  %v5040_v61 = vld [vmem:[%s6159_s2] ss:$0 sm:$0xff] }
  0xb3   : > { %720 = vmatpush1.msra.mxu0 %v4944_v51  ;;  %3628 = vmatprep.subr.mxu1 %v6196_v2 }
  0xb4   : > { %721 = vmatprep.subr.mxu0 %v4951_v54  ;;  %3629 = vmatpush3.msra.mxu1 %v5023_v0 }
  0xb5   : > { %722 = vmatpush1.msra.mxu0 %v4955_v55  ;;  %3630 = vmatprep.mubr.msk.f32.mxu1 %vm4561_vm0, %v6196_v2 }
  0xb6   : > { %723 = vmatprep.subr.mxu0 %v4961_v57  ;;  %997 = vmatprep.subr.mxu1 %v4865_v27 }
  0xb7   : > { %724 = vmatpush1.msra.mxu0 %v4966_v59 }
  0xb8   : > { %725 = vmatprep.subr.mxu0 %v4973_v62 }
  0xb9   : > { %726 = vmatpush1.msra.mxu0 %v4977_v63 }
  0xba   : > { %727 = vmatprep.subr.mxu0 %v4983_v5 }
  0xbb   : > { %728 = vmatpush1.msra.mxu0 %v4988_v8 }
  0xbc   : > { %729 = vmatprep.subr.mxu0 %v4994_v12 }
  0xbd   : > { %730 = vmatpush1.msra.mxu0 %v5001_v26 }
  0xbe   : > { %731 = vmatprep.subr.mxu0 %v5007_v53 }
  0xbf   : > { %732 = vmatpush1.msra.mxu0 %v5011_v58 }
  0xc0   : > { %733 = vmatprep.subr.mxu0 %v5017_v6 }
  0xc1   : > { %734 = vmatpush1.msra.mxu0 %v5021_v10 }
  0xc2   : > { %3633 = vmatprep.subr.mxu0 %v6196_v2 }
 0x14c   : > { %v5035_v13 = vpop.f32.mrf.mxu1 }
 0x14e   : > { %v499_v50 = vpop.f32.mrf.mxu1 }
 0x14f   : > { %v500_v60 = vadd.f32 %v5040_v61, %v499_v50 }
 0x162   : > { %v631_v56 = vpop.f32.mrf.mxu0 }
 0x163   : > { %v635_v52 = vadd.f32 %v631_v56, %v500_v60 }
 0x164   : > { %v3597_v0 = vpop.f32.mrf.mxu0 }
 0x165   : > { %v636_v48 = vmul.f32 0.666, %v635_v52 }
 0x167   : > { %4263 = vtanh.f32 %v636_v48  ;;  %v688_v48 = vlaneseq }
 0x169   : > { %v689_v56 = vshrl.u32 %v688_v48, 7 }
 0x16b   : > { %v698_v0 = vsub.s32 2, %v689_v56  ;;  %v690_v48 = vsub.s32 0, %v689_v56 }
 0x174   : > { %v4264_v45 = vpop.eup %4263 }
 0x175   : > { %v638_v42 = vmul.f32 1.7159, %v4264_v45 }
 0x177   : > { %768 = vmatmul.mubr.f32.vlgmr.msra.gmra.mxu0 %v638_v42  ;;  %3631 = vmatmul.mubr.f32.vlgmr.msra.gmra.mxu1 %v638_v42  ;;  %v5110_v42 = vpop.f32.mrf.mxu1 }
 0x178   : > { %3634 = vmatpush3.msra.mxu0 %v4788_v1  ;;  %3665 = vmatprep.mubr.msk.f32.mxu0 %vm4561_vm0, %v6196_v2  ;;  %6296 = vst [vmem:[#allocation38_spill] sm:$0xff] %v5110_v42 }
 0x179   : > { %3635 = vmatprep.subr.mxu0 %v6196_v2  ;;  %998 = vmatpush1.msra.mxu1 %v4868_v28  ;;  %v5112_v45 = vpop.f32.mrf.mxu1 }
 0x17a   : > { %3636 = vmatpush3.msra.mxu0 %v4791_v3  ;;  %999 = vmatprep.subr.mxu1 %v4871_v29  ;;  %6297 = vst [vmem:[#allocation39_spill] sm:$0xff] %v5112_v45 }
 0x17b   : > { %3637 = vmatprep.subr.mxu0 %v6196_v2  ;;  %1000 = vmatpush1.msra.mxu1 %v4874_v30  ;;  %v5114_v52 = vpop.f32.mrf.mxu1 }
 0x17c   : > { %3638 = vmatpush3.msra.mxu0 %v4797_v4  ;;  %1001 = vmatprep.subr.mxu1 %v4877_v31  ;;  %6298 = vst [vmem:[#allocation40_spill] sm:$0xff] %v5114_v52  ;;  %v694_v52 = vsub.s32 1, %v689_v56 }
 0x17d   : > { %3639 = vmatprep.subr.mxu0 %v6196_v2  ;;  %1002 = vmatpush1.msra.mxu1 %v4883_v32  ;;  %v5116_v60 = vpop.f32.mrf.mxu1 }
 0x17e   : > { %3640 = vmatpush3.msra.mxu0 %v4801_v7  ;;  %1003 = vmatprep.subr.mxu1 %v4887_v34  ;;  %6299 = vst [vmem:[#allocation41_spill] sm:$0xff] %v5116_v60 }
 0x17f   : > { %3641 = vmatprep.subr.mxu0 %v6196_v2  ;;  %1004 = vmatpush1.msra.mxu1 %v4893_v35  ;;  %v5118_v50 = vpop.f32.mrf.mxu1 }
 0x180   : > { %3642 = vmatpush3.msra.mxu0 %v4805_v9  ;;  %1005 = vmatprep.subr.mxu1 %v4897_v37  ;;  %6300 = vst [vmem:[#allocation42_spill] sm:$0xff] %v5118_v50 }
 0x181   : > { %3643 = vmatprep.subr.mxu0 %v6196_v2  ;;  %1006 = vmatpush1.msra.mxu1 %v4901_v38 }
 0x182   : > { %3644 = vmatpush3.msra.mxu0 %v4809_v11  ;;  %1007 = vmatprep.subr.mxu1 %v4905_v40 }
 0x183   : > { %3645 = vmatprep.subr.mxu0 %v6196_v2  ;;  %1008 = vmatpush1.msra.mxu1 %v4913_v41 }
 0x184   : > { %3646 = vmatpush3.msra.mxu0 %v4815_v14  ;;  %1009 = vmatprep.subr.mxu1 %v4919_v43 }
 0x185   : > { %3647 = vmatprep.subr.mxu0 %v6196_v2  ;;  %1010 = vmatpush1.msra.mxu1 %v4923_v44 }
 0x186   : > { %3648 = vmatpush3.msra.mxu0 %v4822_v16  ;;  %1011 = vmatprep.subr.mxu1 %v4929_v46 }
 0x187   : > { %3649 = vmatprep.subr.mxu0 %v6196_v2  ;;  %1012 = vmatpush1.msra.mxu1 %v4933_v47 }
 0x188   : > { %3650 = vmatpush3.msra.mxu0 %v4830_v18  ;;  %1013 = vmatprep.subr.mxu1 %v4939_v49 }
 0x189   : > { %3651 = vmatprep.subr.mxu0 %v6196_v2  ;;  %1014 = vmatpush1.msra.mxu1 %v4944_v51 }
 0x18a   : > { %3652 = vmatpush3.msra.mxu0 %v4836_v19  ;;  %1015 = vmatprep.subr.mxu1 %v4951_v54 }
 0x18b   : > { %3653 = vmatprep.subr.mxu0 %v6196_v2  ;;  %1016 = vmatpush1.msra.mxu1 %v4955_v55 }
 0x18c   : > { %3654 = vmatpush3.msra.mxu0 %v4842_v20  ;;  %1017 = vmatprep.subr.mxu1 %v4961_v57 }
 0x18d   : > { %3655 = vmatprep.subr.mxu0 %v6196_v2  ;;  %1018 = vmatpush1.msra.mxu1 %v4966_v59 }
 0x18e   : > { %3656 = vmatpush3.msra.mxu0 %v4846_v21  ;;  %1019 = vmatprep.subr.mxu1 %v4973_v62 }
 0x18f   : > { %3657 = vmatprep.subr.mxu0 %v6196_v2  ;;  %1020 = vmatpush1.msra.mxu1 %v4977_v63 }
 0x190   : > { %3658 = vmatpush3.msra.mxu0 %v4850_v22  ;;  %1021 = vmatprep.subr.mxu1 %v4983_v5 }
 0x191   : > { %3659 = vmatprep.subr.mxu0 %v6196_v2  ;;  %1022 = vmatpush1.msra.mxu1 %v4988_v8 }
 0x192   : > { %3660 = vmatpush3.msra.mxu0 %v4854_v23  ;;  %1023 = vmatprep.subr.mxu1 %v4994_v12 }
 0x193   : > { %3661 = vmatprep.subr.mxu0 %v6196_v2  ;;  %1024 = vmatpush1.msra.mxu1 %v5001_v26 }
 0x194   : > { %3662 = vmatpush3.msra.mxu0 %v4858_v24  ;;  %1025 = vmatprep.subr.mxu1 %v5007_v53 }
 0x195   : > { %3663 = vmatprep.subr.mxu0 %v6196_v2  ;;  %1026 = vmatpush1.msra.mxu1 %v5011_v58 }
 0x196   : > { %3664 = vmatpush3.msra.mxu0 %v4862_v25  ;;  %1027 = vmatprep.subr.mxu1 %v5017_v6 }
 0x197   : > { %3668 = vmatprep.subr.mxu0 %v6196_v2  ;;  %1028 = vmatpush1.msra.mxu1 %v5021_v10  ;;  %v546_v10 = vld [vmem:[%s6162_s5] sm:$0x7] }
 0x198   : > { %1061 = vmatprep.mubr.f32.mxu1 %v6196_v2  ;;  %3703 = vmatprep.subr.mxu1 %v6196_v2  ;;  %v5123_v6 = vrot.slane %v546_v10, %v698_v0  ;;  %v5125_v2 = vpop.f32.mrf.mxu1  ;;  %v5128_v53 = vrot.slane %v546_v10, %v690_v48  ;;  %v5130_v50 = vrot.slane %v546_v10, %v694_v52  ;;  %v6304_v10 = vmov 0.0   ;;  %v6310_v52 = vld [vmem:[#allocation26_spill] sm:$0xff] }
 0x199   : > { %6302 = vst [vmem:[#allocation44_spill] sm:$0xff] %v5125_v2 }
 0x19a   : > { %6301 = vst [vmem:[#allocation43_spill] sm:$0xff] %v5123_v6 }
 0x237   : > { %v840_v42 = vpop.f32.mrf.mxu1  ;;  %v769_v60 = vpop.f32.mrf.mxu0 }
 0x238   : > { %v841_v45 = vadd.f32 %v840_v42, %v5123_v6  ;;  %v770_v0 = vadd.f32 %v769_v60, %v5128_v53  ;;  %v6311_v60 = vld [vmem:[#allocation27_spill] sm:$0xff] }
 0x239   : > { %v3632_v25 = vpop.f32.mrf.mxu1  ;;  %v771_v24 = vpop.f32.mrf.mxu0 }
 0x23a   : > { %v3219_v58 = vmul.f32 -1.442695, %v841_v45  ;;  %v772_v2 = vadd.f32 %v771_v24, %v5130_v50  ;;  %v6306_v24 = vld [vmem:[#allocation22_spill] sm:$0xff] }
 0x23c   : > { %4265 = vpow2.f32 %v3219_v58 }
 0x249   : > { %v4266_v26 = vpop.eup %4265 }
 0x24a   : > { %v849_v12 = vadd.f32 1.0, %v4266_v26  ;;  %v6308_v26 = vld [vmem:[#allocation24_spill] sm:$0xff] }
 0x24c   : > { %4267 = vrcp.f32 %v849_v12  ;;  %v6307_v12 = vld [vmem:[#allocation23_spill] sm:$0xff] }
 0x24d   : > { %4269 = vtanh.f32 %v770_v0  ;;  %v6312_v0 = vld [vmem:[#allocation28_spill] sm:$0xff] }
 0x24e   : > { %4271 = vtanh.f32 %v772_v2  ;;  %v6305_v2 = vld [vmem:[#allocation21_spill] sm:$0xff] }
 0x259   : > { %v4268_v25 = vpop.eup %4267 }
 0x25a   : > { %v4270_v42 = vpop.eup %4269  ;;  %v852_v58 = vsub.f32 1.0, %v4268_v25 }
 0x25b   : > { %v4272_v45 = vpop.eup %4271 }
 0x25c   : > { %v853_v56 = vmul.f32 %v4270_v42, %v852_v58  ;;  %v854_v6 = vmul.f32 %v4272_v45, %v4268_v25  ;;  %v6313_v25 = vld [vmem:[#allocation31_spill] sm:$0xff]  ;;  %v6314_v42 = vld [vmem:[#allocation34_spill] sm:$0xff]  ;;  %v6315_v58 = vld [vmem:[#allocation37_spill] sm:$0xff]  ;;  %v505_v45 = vadd.f32 %v5035_v13, %v5040_v61 }
 0x25d   : > { %v5310_v13 = vld [vmem:[#allocation10 + $0x40] sm:$0xff] }
 0x25e   : > { %v5134_v48 = vadd.f32 %v854_v6, %v853_v56  ;;  %v6309_v6 = vld [vmem:[#allocation25_spill] sm:$0xff] }
 0x260   : > { %6303 = vst [vmem:[#allocation45_spill] sm:$0xff] %v5134_v48  ;;  %3666 = vmatmul.mubr.f32.vlgmr.msra.gmra.mxu0 %v5134_v48 }
 0x261   : > { %3669 = vmatpush3.msra.mxu0 %v4819_v15  ;;  %3700 = vmatprep.mubr.msk.f32.mxu0 %vm4561_vm0, %v6304_v10 }
 0x262   : > { %3670 = vmatprep.subr.mxu0 %v6304_v10 }
 0x263   : > { %3671 = vmatpush3.msra.mxu0 %v4827_v17 }
 0x264   : > { %3672 = vmatprep.subr.mxu0 %v6304_v10 }
 0x265   : > { %3673 = vmatpush3.msra.mxu0 %v4885_v33 }
 0x266   : > { %3674 = vmatprep.subr.mxu0 %v6304_v10 }
 0x267   : > { %3675 = vmatpush3.msra.mxu0 %v4895_v36 }
 0x268   : > { %3676 = vmatprep.subr.mxu0 %v6304_v10 }
 0x269   : > { %3677 = vmatpush3.msra.mxu0 %v4903_v39 }
 0x26a   : > { %3678 = vmatprep.subr.mxu0 %v6304_v10 }
 0x26b   : > { %3679 = vmatpush3.msra.mxu0 %v6305_v2 }
 0x26c   : > { %3680 = vmatprep.subr.mxu0 %v6304_v10 }
 0x26d   : > { %3681 = vmatpush3.msra.mxu0 %v6306_v24 }
 0x26e   : > { %3682 = vmatprep.subr.mxu0 %v6304_v10 }
 0x26f   : > { %3683 = vmatpush3.msra.mxu0 %v6307_v12 }
 0x270   : > { %3684 = vmatprep.subr.mxu0 %v6304_v10 }
 0x271   : > { %3685 = vmatpush3.msra.mxu0 %v6308_v26 }
 0x272   : > { %3686 = vmatprep.subr.mxu0 %v6304_v10 }
 0x273   : > { %3687 = vmatpush3.msra.mxu0 %v6309_v6 }
 0x274   : > { %3688 = vmatprep.subr.mxu0 %v6304_v10 }
 0x275   : > { %3689 = vmatpush3.msra.mxu0 %v6310_v52 }
 0x276   : > { %3690 = vmatprep.subr.mxu0 %v6304_v10 }
 0x277   : > { %3691 = vmatpush3.msra.mxu0 %v6311_v60 }
 0x278   : > { %3692 = vmatprep.subr.mxu0 %v6304_v10 }
 0x279   : > { %3693 = vmatpush3.msra.mxu0 %v6312_v0 }
 0x27a   : > { %3694 = vmatprep.subr.mxu0 %v6304_v10 }
 0x27b   : > { %3695 = vmatpush3.msra.mxu0 %v6313_v25 }
 0x27c   : > { %3696 = vmatprep.subr.mxu0 %v6304_v10 }
 0x27d   : > { %3697 = vmatpush3.msra.mxu0 %v6314_v42 }
 0x27e   : > { %3698 = vmatprep.subr.mxu0 %v6304_v10 }
 0x27f   : > { %3699 = vmatpush3.msra.mxu0 %v6315_v58 }
 0x280   : > { %1292 = vmatprep.subr.mxu0 %v4865_v27 }
 0x320   : > { %v941_v56 = vpop.f32.mrf.mxu0 }
 0x321   : > { %v945_v48 = vadd.f32 %v941_v56, %v505_v45  ;;  %v5359_v45 = vld [vmem:[#allocation11 + $0x140] sm:$0xff]  ;;  %v5362_v56 = vld [vmem:[#allocation11 + $0x138] sm:$0xff] }
 0x322   : > { %v3667_v0 = vpop.f32.mrf.mxu0 }
 0x323   : > { %v946_v60 = vmul.f32 0.666, %v945_v48  ;;  %v5314_v48 = vld [vmem:[#allocation10 + $0x38] sm:$0xff]  ;;  %v5347_v0 = vld [vmem:[#allocation11 + $0x170] sm:$0xff] }
 0x325   : > { %4273 = vtanh.f32 %v946_v60  ;;  %v5342_v60 = vld [vmem:[#allocation10] sm:$0xff] }
 0x326   : > { %6332 = vst [vmem:[#allocation23_spill] sm:$0xff] %v5342_v60 }
 0x332   : > { %v4274_v52 = vpop.eup %4273 }
 0x333   : > { %v948_v25 = vmul.f32 1.7159, %v4274_v52  ;;  %v5338_v52 = vld [vmem:[#allocation10 + $0x8] sm:$0xff] }
 0x334   : > { %6331 = vst [vmem:[#allocation22_spill] sm:$0xff] %v5338_v52 }
 0x335   : > { %1062 = vmatmul.mubr.f32.vlgmr.msra.gmra.mxu1 %v948_v25  ;;  %3701 = vmatmul.mubr.f32.vlgmr.msra.gmra.mxu0 %v948_v25  ;;  %v5349_v25 = vld [vmem:[#allocation11 + $0x168] sm:$0xff] }
 0x336   : > { %3704 = vmatpush3.msra.mxu1 %v4788_v1  ;;  %3735 = vmatprep.mubr.msk.f32.mxu1 %vm4561_vm0, %v6304_v10  ;;  %v6316_v1 = vld [vmem:[#allocation29_spill] sm:$0xff] }
 0x337   : > { %3705 = vmatprep.subr.mxu1 %v6304_v10  ;;  %1293 = vmatpush1.msra.mxu0 %v4868_v28 }
 0x338   : > { %3706 = vmatpush3.msra.mxu1 %v4791_v3  ;;  %1294 = vmatprep.subr.mxu0 %v4871_v29  ;;  %v6317_v3 = vld [vmem:[#allocation30_spill] sm:$0xff] }
 0x339   : > { %3707 = vmatprep.subr.mxu1 %v6304_v10  ;;  %1295 = vmatpush1.msra.mxu0 %v4874_v30 }
 0x33a   : > { %3708 = vmatpush3.msra.mxu1 %v4797_v4  ;;  %1296 = vmatprep.subr.mxu0 %v4877_v31  ;;  %v6318_v4 = vld [vmem:[#allocation19_spill] sm:$0xff] }
 0x33b   : > { %3709 = vmatprep.subr.mxu1 %v6304_v10  ;;  %1297 = vmatpush1.msra.mxu0 %v4883_v32 }
 0x33c   : > { %3710 = vmatpush3.msra.mxu1 %v4801_v7  ;;  %1298 = vmatprep.subr.mxu0 %v4887_v34  ;;  %v6319_v7 = vld [vmem:[#allocation32_spill] sm:$0xff] }
 0x33d   : > { %3711 = vmatprep.subr.mxu1 %v6304_v10  ;;  %1299 = vmatpush1.msra.mxu0 %v4893_v35 }
 0x33e   : > { %3712 = vmatpush3.msra.mxu1 %v4805_v9  ;;  %1300 = vmatprep.subr.mxu0 %v4897_v37  ;;  %v6320_v9 = vld [vmem:[#allocation33_spill] sm:$0xff] }
 0x33f   : > { %3713 = vmatprep.subr.mxu1 %v6304_v10  ;;  %1301 = vmatpush1.msra.mxu0 %v4901_v38 }
 0x340   : > { %3714 = vmatpush3.msra.mxu1 %v4809_v11  ;;  %1302 = vmatprep.subr.mxu0 %v4905_v40  ;;  %v6321_v11 = vld [vmem:[#allocation20_spill] sm:$0xff] }
 0x341   : > { %3715 = vmatprep.subr.mxu1 %v6304_v10  ;;  %1303 = vmatpush1.msra.mxu0 %v4913_v41 }
 0x342   : > { %3716 = vmatpush3.msra.mxu1 %v4815_v14  ;;  %1304 = vmatprep.subr.mxu0 %v4919_v43  ;;  %v6322_v14 = vld [vmem:[#allocation35_spill] sm:$0xff] }
 0x343   : > { %3717 = vmatprep.subr.mxu1 %v6304_v10  ;;  %1305 = vmatpush1.msra.mxu0 %v4923_v44 }
 0x344   : > { %3718 = vmatpush3.msra.mxu1 %v4822_v16  ;;  %1306 = vmatprep.subr.mxu0 %v4929_v46  ;;  %v6323_v16 = vld [vmem:[#allocation36_spill] sm:$0xff] }
 0x345   : > { %3719 = vmatprep.subr.mxu1 %v6304_v10  ;;  %1307 = vmatpush1.msra.mxu0 %v4933_v47 }
 0x346   : > { %3720 = vmatpush3.msra.mxu1 %v4830_v18  ;;  %1308 = vmatprep.subr.mxu0 %v4939_v49 }
 0x347   : > { %3721 = vmatprep.subr.mxu1 %v6304_v10  ;;  %1309 = vmatpush1.msra.mxu0 %v4944_v51 }
 0x348   : > { %3722 = vmatpush3.msra.mxu1 %v4836_v19  ;;  %1310 = vmatprep.subr.mxu0 %v4951_v54  ;;  %v6324_v19 = vld [vmem:[#allocation43_spill] sm:$0xff] }
 0x349   : > { %3723 = vmatprep.subr.mxu1 %v6304_v10  ;;  %1311 = vmatpush1.msra.mxu0 %v4955_v55  ;;  %v5284_v55 = vld [vmem:[#allocation10 + $0x78] sm:$0xff] }
 0x34a   : > { %3724 = vmatpush3.msra.mxu1 %v4842_v20  ;;  %1312 = vmatprep.subr.mxu0 %v4961_v57  ;;  %v5288_v57 = vld [vmem:[#allocation10 + $0x70] sm:$0xff] }
 0x34b   : > { %3725 = vmatprep.subr.mxu1 %v6304_v10  ;;  %1313 = vmatpush1.msra.mxu0 %v4966_v59  ;;  %v5292_v59 = vld [vmem:[#allocation10 + $0x68] sm:$0xff] }
 0x34c   : > { %3726 = vmatpush3.msra.mxu1 %v4846_v21  ;;  %1314 = vmatprep.subr.mxu0 %v4973_v62  ;;  %v5296_v62 = vld [vmem:[#allocation10 + $0x60] sm:$0xff] }
 0x34d   : > { %3727 = vmatprep.subr.mxu1 %v6304_v10  ;;  %1315 = vmatpush1.msra.mxu0 %v4977_v63  ;;  %v5300_v63 = vld [vmem:[#allocation10 + $0x58] sm:$0xff] }
 0x34e   : > { %3728 = vmatpush3.msra.mxu1 %v4850_v22  ;;  %1316 = vmatprep.subr.mxu0 %v4983_v5  ;;  %v5304_v5 = vld [vmem:[#allocation10 + $0x50] sm:$0xff] }
 0x34f   : > { %3729 = vmatprep.subr.mxu1 %v6304_v10  ;;  %1317 = vmatpush1.msra.mxu0 %v4988_v8  ;;  %v5307_v8 = vld [vmem:[#allocation10 + $0x48] sm:$0xff] }
 0x350   : > { %3730 = vmatpush3.msra.mxu1 %v4854_v23  ;;  %1318 = vmatprep.subr.mxu0 %v6316_v1  ;;  %v5365_v1 = vld [vmem:[#allocation11 + $0x128] sm:$0xff] }
 0x351   : > { %3731 = vmatprep.subr.mxu1 %v6304_v10  ;;  %1319 = vmatpush1.msra.mxu0 %v6317_v3  ;;  %v5368_v3 = vld [vmem:[#allocation11 + $0x120] sm:$0xff] }
 0x352   : > { %3732 = vmatpush3.msra.mxu1 %v6318_v4  ;;  %1320 = vmatprep.subr.mxu0 %v6319_v7  ;;  %v5371_v4 = vld [vmem:[#allocation11 + $0x110] sm:$0xff]  ;;  %v5374_v7 = vld [vmem:[#allocation11 + $0x108] sm:$0xff] }
 0x353   : > { %3733 = vmatprep.subr.mxu1 %v6304_v10  ;;  %1321 = vmatpush1.msra.mxu0 %v6320_v9  ;;  %v5377_v9 = vld [vmem:[#allocation11 + $0xf8] sm:$0xff] }
 0x354   : > { %3734 = vmatpush3.msra.mxu1 %v6321_v11  ;;  %1322 = vmatprep.subr.mxu0 %v6322_v14 }
 0x355   : > { %3738 = vmatprep.subr.mxu1 %v6304_v10  ;;  %1323 = vmatpush1.msra.mxu0 %v6323_v16 }
 0x356   : > { %1356 = vmatprep.mubr.f32.mxu0 %v6304_v10  ;;  %3773 = vmatprep.subr.mxu0 %v6304_v10 }
 0x3f5   : > { %v1134_v18 = vpop.f32.mrf.mxu0  ;;  %v1063_v23 = vpop.f32.mrf.mxu1 }
 0x3f6   : > { %v1135_v20 = vadd.f32 %v1134_v18, %v6324_v19  ;;  %v1064_v29 = vadd.f32 %v1063_v23, %v5128_v53 }
 0x3f7   : > { %v3702_v21 = vpop.f32.mrf.mxu0  ;;  %v1065_v27 = vpop.f32.mrf.mxu1 }
 0x3f8   : > { %v3220_v22 = vmul.f32 -1.442695, %v1135_v20  ;;  %v1066_v31 = vadd.f32 %v1065_v27, %v5130_v50 }
 0x3fa   : > { %4275 = vpow2.f32 %v3220_v22 }
 0x407   : > { %v4276_v28 = vpop.eup %4275 }
 0x408   : > { %v1143_v30 = vadd.f32 1.0, %v4276_v28 }
 0x40a   : > { %4277 = vrcp.f32 %v1143_v30 }
 0x40b   : > { %4279 = vtanh.f32 %v1064_v29 }
 0x40c   : > { %4281 = vtanh.f32 %v1066_v31 }
 0x417   : > { %v4278_v32 = vpop.eup %4277 }
 0x418   : > { %v4280_v34 = vpop.eup %4279  ;;  %v1146_v35 = vsub.f32 1.0, %v4278_v32 }
 0x419   : > { %v4282_v37 = vpop.eup %4281 }
 0x41a   : > { %v1147_v38 = vmul.f32 %v4280_v34, %v1146_v35  ;;  %v1148_v40 = vmul.f32 %v4282_v37, %v4278_v32 }
 0x41c   : > { %v5243_v41 = vadd.f32 %v1148_v40, %v1147_v38  ;;  %v5386_v38 = vld [vmem:[#allocation11 + $0x178] sm:$0xff]  ;;  %v5389_v40 = vld [vmem:[#allocation11 + $0x160] sm:$0xff] }
 0x41e   : > { %6325 = vst [vmem:[#allocation21_spill] sm:$0xff] %v5243_v41  ;;  %3736 = vmatmul.mubr.f32.vlgmr.msra.gmra.mxu1 %v5243_v41  ;;  %v5495_v41 = vld [vmem:[#allocation11 + $0x20] sm:$0xff] }
 0x41f   : > { %3739 = vmatpush3.msra.mxu1 %v4819_v15  ;;  %3770 = vmatprep.mubr.msk.f32.mxu1 %vm4561_vm0, %v6304_v10  ;;  %v6326_v15 = vld [vmem:[#allocation26_spill] sm:$0xff] }
 0x420   : > { %3740 = vmatprep.subr.mxu1 %v6304_v10  ;;  %6346 = vst [vmem:[#allocation26_spill] sm:$0xff] %v5495_v41 }
 0x421   : > { %3741 = vmatpush3.msra.mxu1 %v4827_v17  ;;  %v6327_v17 = vld [vmem:[#allocation27_spill] sm:$0xff] }
 0x422   : > { %3742 = vmatprep.subr.mxu1 %v6304_v10 }
 0x423   : > { %3743 = vmatpush3.msra.mxu1 %v4885_v33  ;;  %v6328_v33 = vld [vmem:[#allocation28_spill] sm:$0xff] }
 0x424   : > { %3744 = vmatprep.subr.mxu1 %v6304_v10 }
 0x425   : > { %3745 = vmatpush3.msra.mxu1 %v4895_v36  ;;  %v6329_v36 = vld [vmem:[#allocation31_spill] sm:$0xff] }
 0x426   : > { %3746 = vmatprep.subr.mxu1 %v6304_v10 }
 0x427   : > { %3747 = vmatpush3.msra.mxu1 %v4903_v39  ;;  %v6330_v39 = vld [vmem:[#allocation39_spill] sm:$0xff] }
 0x428   : > { %3748 = vmatprep.subr.mxu1 %v6304_v10  ;;  %v510_v43 = vadd.f32 %v5040_v61, %v6330_v39  ;;  %v5411_v39 = vld [vmem:[#allocation11 + $0x100] sm:$0xff] }
 0x429   : > { %3749 = vmatpush3.msra.mxu1 %v6305_v2  ;;  %v5318_v2 = vld [vmem:[#allocation10 + $0x30] sm:$0xff]  ;;  %6337 = vst [vmem:[#allocation29_spill] sm:$0xff] %v5411_v39 }
 0x42a   : > { %3750 = vmatprep.subr.mxu1 %v6304_v10 }
 0x42b   : > { %3751 = vmatpush3.msra.mxu1 %v6306_v24  ;;  %v5322_v24 = vld [vmem:[#allocation10 + $0x28] sm:$0xff] }
 0x42c   : > { %3752 = vmatprep.subr.mxu1 %v6304_v10 }
 0x42d   : > { %3753 = vmatpush3.msra.mxu1 %v6307_v12  ;;  %v5326_v12 = vld [vmem:[#allocation10 + $0x20] sm:$0xff] }
 0x42e   : > { %3754 = vmatprep.subr.mxu1 %v6304_v10 }
 0x42f   : > { %3755 = vmatpush3.msra.mxu1 %v6308_v26  ;;  %v5330_v26 = vld [vmem:[#allocation10 + $0x18] sm:$0xff] }
 0x430   : > { %3756 = vmatprep.subr.mxu1 %v6304_v10 }
 0x431   : > { %3757 = vmatpush3.msra.mxu1 %v6309_v6  ;;  %v5334_v6 = vld [vmem:[#allocation10 + $0x10] sm:$0xff] }
 0x432   : > { %3758 = vmatprep.subr.mxu1 %v6304_v10 }
 0x433   : > { %3759 = vmatpush3.msra.mxu1 %v6326_v15  ;;  %v5395_v15 = vld [vmem:[#allocation11 + $0x148] sm:$0xff] }
 0x434   : > { %3760 = vmatprep.subr.mxu1 %v6304_v10  ;;  %6334 = vst [vmem:[#allocation25_spill] sm:$0xff] %v5395_v15 }
 0x435   : > { %3761 = vmatpush3.msra.mxu1 %v6327_v17  ;;  %v5399_v17 = vld [vmem:[#allocation11 + $0x130] sm:$0xff] }
 0x436   : > { %3762 = vmatprep.subr.mxu1 %v6304_v10  ;;  %6335 = vst [vmem:[#allocation34_spill] sm:$0xff] %v5399_v17 }
 0x437   : > { %3763 = vmatpush3.msra.mxu1 %v6328_v33  ;;  %v5403_v33 = vld [vmem:[#allocation11 + $0x118] sm:$0xff] }
 0x438   : > { %3764 = vmatprep.subr.mxu1 %v6304_v10  ;;  %6336 = vst [vmem:[#allocation37_spill] sm:$0xff] %v5403_v33 }
 0x439   : > { %3765 = vmatpush3.msra.mxu1 %v6329_v36  ;;  %v5409_v36 = vld [vmem:[#allocation11 + $0xf0] sm:$0xff] }
 0x43a   : > { %3766 = vmatprep.subr.mxu1 %v6304_v10 }
 0x43b   : > { %3767 = vmatpush3.msra.mxu1 %v6314_v42  ;;  %v5353_v42 = vld [vmem:[#allocation11 + $0x158] sm:$0xff] }
 0x43c   : > { %3768 = vmatprep.subr.mxu1 %v6304_v10 }
 0x43d   : > { %3769 = vmatpush3.msra.mxu1 %v6315_v58  ;;  %v5356_v58 = vld [vmem:[#allocation11 + $0x150] sm:$0xff] }
 0x43e   : > { %1587 = vmatprep.subr.mxu1 %v5347_v0 }
 0x4de   : > { %v1236_v44 = vpop.f32.mrf.mxu1 }
 0x4df   : > { %v1240_v46 = vadd.f32 %v1236_v44, %v510_v43  ;;  %v5415_v43 = vld [vmem:[#allocation11 + $0xe0] sm:$0xff]  ;;  %v5419_v44 = vld [vmem:[#allocation11 + $0xd8] sm:$0xff] }
 0x4e0   : > { %v3737_v47 = vpop.f32.mrf.mxu1 }
 0x4e1   : > { %v1241_v49 = vmul.f32 0.666, %v1240_v46  ;;  %v5421_v46 = vld [vmem:[#allocation11 + $0xe8] sm:$0xff] }
 0x4e2   : > { %6338 = vst [vmem:[#allocation30_spill] sm:$0xff] %v5421_v46  ;;  %v5425_v47 = vld [vmem:[#allocation11 + $0xc8] sm:$0xff] }
 0x4e3   : > { %4283 = vtanh.f32 %v1241_v49  ;;  %v5429_v49 = vld [vmem:[#allocation11 + $0xc0] sm:$0xff] }
 0x4f0   : > { %v4284_v51 = vpop.eup %4283 }
 0x4f1   : > { %v1243_v54 = vmul.f32 1.7159, %v4284_v51  ;;  %v5431_v51 = vld [vmem:[#allocation11 + $0xd0] sm:$0xff] }
 0x4f2   : > { %6339 = vst [vmem:[#allocation19_spill] sm:$0xff] %v5431_v51 }
 0x4f3   : > { %1357 = vmatmul.mubr.f32.vlgmr.msra.gmra.mxu0 %v1243_v54  ;;  %3771 = vmatmul.mubr.f32.vlgmr.msra.gmra.mxu1 %v1243_v54  ;;  %v5435_v54 = vld [vmem:[#allocation11 + $0xb0] sm:$0xff] }
 0x4f4   : > { %3805 = vmatprep.mubr.msk.f32.mxu0 %vm4561_vm0, %v6304_v10  ;;  %1651 = vmatprep.mubr.f32.mxu1 %v6304_v10 }
 0x4f5   : > { %3774 = vmatpush3.msra.mxu0 %v5284_v55  ;;  %1588 = vmatpush1.msra.mxu1 %v5349_v25 }
 0x4f6   : > { %3775 = vmatprep.subr.mxu0 %v6304_v10  ;;  %1589 = vmatprep.subr.mxu1 %v5353_v42 }
 0x4f7   : > { %3776 = vmatpush3.msra.mxu0 %v5288_v57  ;;  %1590 = vmatpush1.msra.mxu1 %v5356_v58 }
 0x4f8   : > { %3777 = vmatprep.subr.mxu0 %v6304_v10  ;;  %1591 = vmatprep.subr.mxu1 %v5359_v45 }
 0x4f9   : > { %3778 = vmatpush3.msra.mxu0 %v5292_v59  ;;  %1592 = vmatpush1.msra.mxu1 %v5362_v56 }
 0x4fa   : > { %3779 = vmatprep.subr.mxu0 %v6304_v10  ;;  %1593 = vmatprep.subr.mxu1 %v5365_v1 }
 0x4fb   : > { %3780 = vmatpush3.msra.mxu0 %v5296_v62  ;;  %1594 = vmatpush1.msra.mxu1 %v5368_v3 }
 0x4fc   : > { %3781 = vmatprep.subr.mxu0 %v6304_v10  ;;  %1595 = vmatprep.subr.mxu1 %v5371_v4 }
 0x4fd   : > { %3782 = vmatpush3.msra.mxu0 %v5300_v63  ;;  %1596 = vmatpush1.msra.mxu1 %v5374_v7 }
 0x4fe   : > { %3783 = vmatprep.subr.mxu0 %v6304_v10  ;;  %1597 = vmatprep.subr.mxu1 %v5377_v9 }
 0x4ff   : > { %3784 = vmatpush3.msra.mxu0 %v5304_v5  ;;  %1598 = vmatpush1.msra.mxu1 %v5409_v36 }
 0x500   : > { %3785 = vmatprep.subr.mxu0 %v6304_v10  ;;  %1599 = vmatprep.subr.mxu1 %v5415_v43 }
 0x501   : > { %3786 = vmatpush3.msra.mxu0 %v5307_v8  ;;  %1600 = vmatpush1.msra.mxu1 %v5419_v44 }
 0x502   : > { %3787 = vmatprep.subr.mxu0 %v6304_v10  ;;  %1601 = vmatprep.subr.mxu1 %v5425_v47 }
 0x503   : > { %3788 = vmatpush3.msra.mxu0 %v5310_v13  ;;  %1602 = vmatpush1.msra.mxu1 %v5429_v49 }
 0x504   : > { %3789 = vmatprep.subr.mxu0 %v6304_v10  ;;  %1603 = vmatprep.subr.mxu1 %v5435_v54 }
 0x505   : > { %3790 = vmatpush3.msra.mxu0 %v5314_v48 }
 0x506   : > { %3791 = vmatprep.subr.mxu0 %v6304_v10 }
 0x507   : > { %3792 = vmatpush3.msra.mxu0 %v5318_v2 }
 0x508   : > { %3793 = vmatprep.subr.mxu0 %v6304_v10 }
 0x509   : > { %3794 = vmatpush3.msra.mxu0 %v5322_v24 }
 0x50a   : > { %3795 = vmatprep.subr.mxu0 %v6304_v10 }
 0x50b   : > { %3796 = vmatpush3.msra.mxu0 %v5326_v12 }
 0x50c   : > { %3797 = vmatprep.subr.mxu0 %v6304_v10 }
 0x50d   : > { %3798 = vmatpush3.msra.mxu0 %v5330_v26 }
 0x50e   : > { %3799 = vmatprep.subr.mxu0 %v6304_v10 }
 0x50f   : > { %3800 = vmatpush3.msra.mxu0 %v5334_v6 }
 0x510   : > { %3801 = vmatprep.subr.mxu0 %v6304_v10 }
 0x511   : > { %3802 = vmatpush3.msra.mxu0 %v5338_v52 }
 0x512   : > { %3803 = vmatprep.subr.mxu0 %v6304_v10 }
 0x513   : > { %3804 = vmatpush3.msra.mxu0 %v5342_v60 }
 0x514   : > { %3808 = vmatprep.subr.mxu0 %v6304_v10 }
 0x5b3   : > { %v1429_v11 = vpop.f32.mrf.mxu1  ;;  %v1358_v20 = vpop.f32.mrf.mxu0 }
 0x5b4   : > { %v1430_v14 = vadd.f32 %v1429_v11, %v6324_v19  ;;  %v1359_v23 = vadd.f32 %v1358_v20, %v5128_v53  ;;  %v5439_v11 = vld [vmem:[#allocation11 + $0xa8] sm:$0xff]  ;;  %v5451_v20 = vld [vmem:[#allocation11 + $0xa0] sm:$0xff] }
 0x5b5   : > { %v3772_v16 = vpop.f32.mrf.mxu1  ;;  %v1360_v21 = vpop.f32.mrf.mxu0  ;;  %1604 = vmatpush1.msra.mxu1 %v5439_v11  ;;  %6341 = vst [vmem:[#allocation33_spill] sm:$0xff] %v5451_v20 }
 0x5b6   : > { %v3221_v18 = vmul.f32 -1.442695, %v1430_v14  ;;  %v1361_v28 = vadd.f32 %v1360_v21, %v5130_v50  ;;  %v5441_v14 = vld [vmem:[#allocation11 + $0xb8] sm:$0xff]  ;;  %v5455_v21 = vld [vmem:[#allocation11 + $0x80] sm:$0xff] }
 0x5b7   : > { %6340 = vst [vmem:[#allocation32_spill] sm:$0xff] %v5441_v14  ;;  %v5445_v16 = vld [vmem:[#allocation11 + $0x98] sm:$0xff] }
 0x5b8   : > { %4285 = vpow2.f32 %v3221_v18  ;;  %1605 = vmatprep.subr.mxu1 %v5445_v16  ;;  %v5449_v18 = vld [vmem:[#allocation11 + $0x90] sm:$0xff] }
 0x5b9   : > { %1606 = vmatpush1.msra.mxu1 %v5449_v18 }
 0x5ba   : > { %1607 = vmatprep.subr.mxu1 %v5455_v21 }
 0x5c5   : > { %v4286_v22 = vpop.eup %4285 }
 0x5c6   : > { %v1438_v27 = vadd.f32 1.0, %v4286_v22  ;;  %v5459_v22 = vld [vmem:[#allocation11 + $0x78] sm:$0xff] }
 0x5c7   : > { %1608 = vmatpush1.msra.mxu1 %v5459_v22 }
 0x5c8   : > { %4287 = vrcp.f32 %v1438_v27  ;;  %v5465_v27 = vld [vmem:[#allocation11 + $0x68] sm:$0xff] }
 0x5c9   : > { %4289 = vtanh.f32 %v1359_v23  ;;  %v5461_v23 = vld [vmem:[#allocation11 + $0x88] sm:$0xff]  ;;  %1609 = vmatprep.subr.mxu1 %v5465_v27 }
 0x5ca   : > { %4291 = vtanh.f32 %v1361_v28  ;;  %6342 = vst [vmem:[#allocation20_spill] sm:$0xff] %v5461_v23  ;;  %v5469_v28 = vld [vmem:[#allocation11 + $0x60] sm:$0xff] }
 0x5cb   : > { %1610 = vmatpush1.msra.mxu1 %v5469_v28 }
 0x5d5   : > { %v4288_v29 = vpop.eup %4287 }
 0x5d6   : > { %v4290_v30 = vpop.eup %4289  ;;  %v1441_v31 = vsub.f32 1.0, %v4288_v29 }
 0x5d7   : > { %v4292_v32 = vpop.eup %4291 }
 0x5d8   : > { %v1442_v34 = vmul.f32 %v4290_v30, %v1441_v31  ;;  %v1443_v35 = vmul.f32 %v4292_v32, %v4288_v29  ;;  %v5471_v29 = vld [vmem:[#allocation11 + $0x70] sm:$0xff]  ;;  %v5479_v31 = vld [vmem:[#allocation11 + $0x48] sm:$0xff]  ;;  %v5481_v32 = vld [vmem:[#allocation11 + $0x58] sm:$0xff] }
 0x5d9   : > { %6343 = vst [vmem:[#allocation35_spill] sm:$0xff] %v5471_v29  ;;  %v5475_v30 = vld [vmem:[#allocation11 + $0x50] sm:$0xff]  ;;  %6344 = vst [vmem:[#allocation36_spill] sm:$0xff] %v5481_v32 }
 0x5da   : > { %v5384_v37 = vadd.f32 %v1443_v35, %v1442_v34  ;;  %1611 = vmatprep.subr.mxu1 %v5475_v30  ;;  %v5485_v34 = vld [vmem:[#allocation11 + $0x38] sm:$0xff]  ;;  %v5489_v35 = vld [vmem:[#allocation11 + $0x30] sm:$0xff] }
 0x5db   : > { %1612 = vmatpush1.msra.mxu1 %v5479_v31 }
 0x5dc   : > { %6333 = vst [vmem:[#allocation24_spill] sm:$0xff] %v5384_v37  ;;  %3806 = vmatmul.mubr.f32.vlgmr.msra.gmra.mxu0 %v5384_v37  ;;  %1613 = vmatprep.subr.mxu1 %v5485_v34  ;;  %v5491_v37 = vld [vmem:[#allocation11 + $0x40] sm:$0xff] }
 0x5dd   : > { %3809 = vmatpush3.msra.mxu0 %v5386_v38  ;;  %3840 = vmatprep.mubr.msk.f32.mxu0 %vm4561_vm0, %v6304_v10  ;;  %6345 = vst [vmem:[#allocation43_spill] sm:$0xff] %v5491_v37 }
 0x5de   : > { %3810 = vmatprep.subr.mxu0 %v6304_v10  ;;  %1614 = vmatpush1.msra.mxu1 %v5489_v35 }
 0x5df   : > { %3811 = vmatpush3.msra.mxu0 %v5389_v40  ;;  %1615 = vmatprep.subr.mxu1 %v5495_v41 }
 0x5e0   : > { %3812 = vmatprep.subr.mxu0 %v6304_v10 }
 0x5e1   : > { %3813 = vmatpush3.msra.mxu0 %v5395_v15 }
 0x5e2   : > { %3814 = vmatprep.subr.mxu0 %v6304_v10 }
 0x5e3   : > { %3815 = vmatpush3.msra.mxu0 %v5399_v17 }
 0x5e4   : > { %3816 = vmatprep.subr.mxu0 %v6304_v10 }
 0x5e5   : > { %3817 = vmatpush3.msra.mxu0 %v5403_v33 }
 0x5e6   : > { %3818 = vmatprep.subr.mxu0 %v6304_v10 }
 0x5e7   : > { %3819 = vmatpush3.msra.mxu0 %v5411_v39 }
 0x5e8   : > { %3820 = vmatprep.subr.mxu0 %v6304_v10 }
 0x5e9   : > { %3821 = vmatpush3.msra.mxu0 %v5421_v46 }
 0x5ea   : > { %3822 = vmatprep.subr.mxu0 %v6304_v10 }
 0x5eb   : > { %3823 = vmatpush3.msra.mxu0 %v5431_v51 }
 0x5ec   : > { %3824 = vmatprep.subr.mxu0 %v6304_v10 }
 0x5ed   : > { %3825 = vmatpush3.msra.mxu0 %v5441_v14  ;;  %v5509_v14 = vld [vmem:[#allocation11 + $0x10] sm:$0xff] }
 0x5ee   : > { %3826 = vmatprep.subr.mxu0 %v6304_v10 }
 0x5ef   : > { %3827 = vmatpush3.msra.mxu0 %v5451_v20  ;;  %v5507_v20 = vld [vmem:[#allocation11] sm:$0xff] }
 0x5f0   : > { %3828 = vmatprep.subr.mxu0 %v6304_v10  ;;  %6350 = vst [vmem:[#allocation39_spill] sm:$0xff] %v5507_v20 }
 0x5f1   : > { %3829 = vmatpush3.msra.mxu0 %v5461_v23  ;;  %v5505_v23 = vld [vmem:[#allocation11 + $0x8] sm:$0xff] }
 0x5f2   : > { %3830 = vmatprep.subr.mxu0 %v6304_v10  ;;  %6349 = vst [vmem:[#allocation31_spill] sm:$0xff] %v5505_v23 }
 0x5f3   : > { %3831 = vmatpush3.msra.mxu0 %v5471_v29  ;;  %v5501_v29 = vld [vmem:[#allocation11 + $0x28] sm:$0xff] }
 0x5f4   : > { %3832 = vmatprep.subr.mxu0 %v6304_v10  ;;  %6348 = vst [vmem:[#allocation28_spill] sm:$0xff] %v5501_v29 }
 0x5f5   : > { %3833 = vmatpush3.msra.mxu0 %v5481_v32  ;;  %v5499_v32 = vld [vmem:[#allocation11 + $0x18] sm:$0xff] }
 0x5f6   : > { %3834 = vmatprep.subr.mxu0 %v6304_v10  ;;  %6347 = vst [vmem:[#allocation27_spill] sm:$0xff] %v5499_v32  ;;  %1616 = vmatpush1.msra.mxu1 %v5499_v32 }
 0x5f7   : > { %3835 = vmatpush3.msra.mxu0 %v5491_v37  ;;  %1617 = vmatprep.subr.mxu1 %v5505_v23 }
 0x5f8   : > { %3836 = vmatprep.subr.mxu0 %v6304_v10  ;;  %1618 = vmatpush1.msra.mxu1 %v5507_v20 }
 0x5f9   : > { %3837 = vmatpush3.msra.mxu0 %v5501_v29  ;;  %3843 = vmatprep.subr.mxu1 %v6304_v10  ;;  %v6351_v29 = vld [vmem:[#allocation38_spill] sm:$0xff] }
 0x5fa   : > { %3838 = vmatprep.subr.mxu0 %v6304_v10  ;;  %v515_v37 = vadd.f32 %v6351_v29, %v5040_v61 }
 0x5fb   : > { %3839 = vmatpush3.msra.mxu0 %v5509_v14 }
 0x5fc   : > { %1882 = vmatprep.subr.mxu0 %v5347_v0 }
 0x69c   : > { %v1531_v51 = vpop.f32.mrf.mxu0 }
 0x69d   : > { %v1535_v46 = vadd.f32 %v1531_v51, %v515_v37 }
 0x69e   : > { %v3807_v39 = vpop.f32.mrf.mxu0 }
 0x69f   : > { %v1536_v33 = vmul.f32 0.666, %v1535_v46 }
 0x6a1   : > { %4293 = vtanh.f32 %v1536_v33 }
 0x6ae   : > { %v4294_v17 = vpop.eup %4293 }
 0x6af   : > { %v1538_v15 = vmul.f32 1.7159, %v4294_v17 }
 0x6b1   : > { %1652 = vmatmul.mubr.f32.vlgmr.msra.gmra.mxu1 %v1538_v15  ;;  %3841 = vmatmul.mubr.f32.vlgmr.msra.gmra.mxu0 %v1538_v15 }
 0x6b2   : > { %3844 = vmatpush3.msra.mxu1 %v5284_v55  ;;  %3875 = vmatprep.mubr.msk.f32.mxu1 %vm4561_vm0, %v6304_v10 }
 0x6b3   : > { %3845 = vmatprep.subr.mxu1 %v6304_v10  ;;  %1883 = vmatpush1.msra.mxu0 %v5349_v25 }
 0x6b4   : > { %3846 = vmatpush3.msra.mxu1 %v5288_v57  ;;  %1884 = vmatprep.subr.mxu0 %v5353_v42 }
 0x6b5   : > { %3847 = vmatprep.subr.mxu1 %v6304_v10  ;;  %1885 = vmatpush1.msra.mxu0 %v5356_v58 }
 0x6b6   : > { %3848 = vmatpush3.msra.mxu1 %v5292_v59  ;;  %1886 = vmatprep.subr.mxu0 %v5359_v45 }
 0x6b7   : > { %3849 = vmatprep.subr.mxu1 %v6304_v10  ;;  %1887 = vmatpush1.msra.mxu0 %v5362_v56 }
 0x6b8   : > { %3850 = vmatpush3.msra.mxu1 %v5296_v62  ;;  %1888 = vmatprep.subr.mxu0 %v5365_v1 }
 0x6b9   : > { %3851 = vmatprep.subr.mxu1 %v6304_v10  ;;  %1889 = vmatpush1.msra.mxu0 %v5368_v3 }
 0x6ba   : > { %3852 = vmatpush3.msra.mxu1 %v5300_v63  ;;  %1890 = vmatprep.subr.mxu0 %v5371_v4 }
 0x6bb   : > { %3853 = vmatprep.subr.mxu1 %v6304_v10  ;;  %1891 = vmatpush1.msra.mxu0 %v5374_v7 }
 0x6bc   : > { %3854 = vmatpush3.msra.mxu1 %v5304_v5  ;;  %1892 = vmatprep.subr.mxu0 %v5377_v9 }
 0x6bd   : > { %3855 = vmatprep.subr.mxu1 %v6304_v10  ;;  %1893 = vmatpush1.msra.mxu0 %v5409_v36 }
 0x6be   : > { %3856 = vmatpush3.msra.mxu1 %v5307_v8  ;;  %1894 = vmatprep.subr.mxu0 %v5415_v43 }
 0x6bf   : > { %3857 = vmatprep.subr.mxu1 %v6304_v10  ;;  %1895 = vmatpush1.msra.mxu0 %v5419_v44 }
 0x6c0   : > { %3858 = vmatpush3.msra.mxu1 %v5310_v13  ;;  %1896 = vmatprep.subr.mxu0 %v5425_v47 }
 0x6c1   : > { %3859 = vmatprep.subr.mxu1 %v6304_v10  ;;  %1897 = vmatpush1.msra.mxu0 %v5429_v49 }
 0x6c2   : > { %3860 = vmatpush3.msra.mxu1 %v5314_v48  ;;  %1898 = vmatprep.subr.mxu0 %v5435_v54 }
 0x6c3   : > { %3861 = vmatprep.subr.mxu1 %v6304_v10  ;;  %1899 = vmatpush1.msra.mxu0 %v5439_v11 }
 0x6c4   : > { %3862 = vmatpush3.msra.mxu1 %v5318_v2  ;;  %1900 = vmatprep.subr.mxu0 %v5445_v16 }
 0x6c5   : > { %3863 = vmatprep.subr.mxu1 %v6304_v10  ;;  %1901 = vmatpush1.msra.mxu0 %v5449_v18 }
 0x6c6   : > { %3864 = vmatpush3.msra.mxu1 %v5322_v24  ;;  %1902 = vmatprep.subr.mxu0 %v5455_v21 }
 0x6c7   : > { %3865 = vmatprep.subr.mxu1 %v6304_v10  ;;  %1903 = vmatpush1.msra.mxu0 %v5459_v22 }
 0x6c8   : > { %3866 = vmatpush3.msra.mxu1 %v5326_v12  ;;  %1904 = vmatprep.subr.mxu0 %v5465_v27 }
 0x6c9   : > { %3867 = vmatprep.subr.mxu1 %v6304_v10  ;;  %1905 = vmatpush1.msra.mxu0 %v5469_v28 }
 0x6ca   : > { %3868 = vmatpush3.msra.mxu1 %v5330_v26  ;;  %1906 = vmatprep.subr.mxu0 %v5475_v30 }
 0x6cb   : > { %3869 = vmatprep.subr.mxu1 %v6304_v10  ;;  %1907 = vmatpush1.msra.mxu0 %v5479_v31 }
 0x6cc   : > { %3870 = vmatpush3.msra.mxu1 %v5334_v6  ;;  %1908 = vmatprep.subr.mxu0 %v5485_v34 }
 0x6cd   : > { %3871 = vmatprep.subr.mxu1 %v6304_v10  ;;  %1909 = vmatpush1.msra.mxu0 %v5489_v35 }
 0x6ce   : > { %3872 = vmatpush3.msra.mxu1 %v5338_v52  ;;  %1910 = vmatprep.subr.mxu0 %v5495_v41 }
 0x6cf   : > { %3873 = vmatprep.subr.mxu1 %v6304_v10  ;;  %1911 = vmatpush1.msra.mxu0 %v5499_v32 }
 0x6d0   : > { %3874 = vmatpush3.msra.mxu1 %v5342_v60  ;;  %1912 = vmatprep.subr.mxu0 %v5505_v23 }
 0x6d1   : > { %3878 = vmatprep.subr.mxu1 %v6304_v10  ;;  %1913 = vmatpush1.msra.mxu0 %v5507_v20 }
 0x6d2   : > { %1946 = vmatprep.mubr.f32.mxu0 %v6304_v10  ;;  %3913 = vmatprep.subr.mxu0 %v6304_v10 }
 0x771   : > { %v1724_v61 = vpop.f32.mrf.mxu0  ;;  %v1653_v33 = vpop.f32.mrf.mxu1 }
 0x772   : > { %v1725_v37 = vadd.f32 %v1724_v61, %v6324_v19  ;;  %v1654_v51 = vadd.f32 %v1653_v33, %v5128_v53  ;;  %v6361_v33 = vld [vmem:[#allocation20_spill] sm:$0xff] }
 0x773   : > { %v3842_v15 = vpop.f32.mrf.mxu0  ;;  %v1655_v39 = vpop.f32.mrf.mxu1 }
 0x774   : > { %v3222_v17 = vmul.f32 -1.442695, %v1725_v37  ;;  %v1656_v23 = vadd.f32 %v1655_v39, %v5130_v50  ;;  %v6359_v37 = vld [vmem:[#allocation32_spill] sm:$0xff]  ;;  %v6362_v39 = vld [vmem:[#allocation35_spill] sm:$0xff] }
 0x776   : > { %4295 = vpow2.f32 %v3222_v17  ;;  %v6360_v17 = vld [vmem:[#allocation33_spill] sm:$0xff] }
 0x783   : > { %v4296_v46 = vpop.eup %4295 }
 0x784   : > { %v1733_v29 = vadd.f32 1.0, %v4296_v46  ;;  %v6363_v46 = vld [vmem:[#allocation36_spill] sm:$0xff] }
 0x786   : > { %4297 = vrcp.f32 %v1733_v29  ;;  %v6365_v29 = vld [vmem:[#allocation28_spill] sm:$0xff] }
 0x787   : > { %4299 = vtanh.f32 %v1654_v51  ;;  %v6364_v51 = vld [vmem:[#allocation43_spill] sm:$0xff] }
 0x788   : > { %4301 = vtanh.f32 %v1656_v23  ;;  %v6353_v23 = vld [vmem:[#allocation25_spill] sm:$0xff] }
 0x793   : > { %v4298_v20 = vpop.eup %4297 }
 0x794   : > { %v4300_v60 = vpop.eup %4299  ;;  %v1736_v32 = vsub.f32 1.0, %v4298_v20 }
 0x795   : > { %v4302_v41 = vpop.eup %4301 }
 0x796   : > { %v1737_v52 = vmul.f32 %v4300_v60, %v1736_v32  ;;  %v1738_v61 = vmul.f32 %v4302_v41, %v4298_v20  ;;  %v6354_v41 = vld [vmem:[#allocation34_spill] sm:$0xff]  ;;  %v6356_v60 = vld [vmem:[#allocation29_spill] sm:$0xff]  ;;  %v6358_v32 = vld [vmem:[#allocation19_spill] sm:$0xff] }
 0x797   : > { %v6357_v20 = vld [vmem:[#allocation30_spill] sm:$0xff] }
 0x798   : > { %v5589_v15 = vadd.f32 %v1738_v61, %v1737_v52  ;;  %v6355_v52 = vld [vmem:[#allocation37_spill] sm:$0xff]  ;;  %v5629_v61 = vld [vmem:[%s6159_s2] ss:$0 sm:$0xff] }
 0x79a   : > { %6352 = vst [vmem:[#allocation38_spill] sm:$0xff] %v5589_v15  ;;  %3876 = vmatmul.mubr.f32.vlgmr.msra.gmra.mxu1 %v5589_v15  ;;  %v6366_v15 = vld [vmem:[#allocation41_spill] sm:$0xff] }
 0x79b   : > { %3879 = vmatpush3.msra.mxu1 %v5386_v38  ;;  %3910 = vmatprep.mubr.msk.f32.mxu1 %vm4561_vm0, %v6304_v10 }
 0x79c   : > { %3880 = vmatprep.subr.mxu1 %v6304_v10 }
 0x79d   : > { %3881 = vmatpush3.msra.mxu1 %v5389_v40 }
 0x79e   : > { %3882 = vmatprep.subr.mxu1 %v6304_v10 }
 0x79f   : > { %3883 = vmatpush3.msra.mxu1 %v6353_v23 }
 0x7a0   : > { %3884 = vmatprep.subr.mxu1 %v6304_v10 }
 0x7a1   : > { %3885 = vmatpush3.msra.mxu1 %v6354_v41 }
 0x7a2   : > { %3886 = vmatprep.subr.mxu1 %v6304_v10 }
 0x7a3   : > { %3887 = vmatpush3.msra.mxu1 %v6355_v52 }
 0x7a4   : > { %3888 = vmatprep.subr.mxu1 %v6304_v10 }
 0x7a5   : > { %3889 = vmatpush3.msra.mxu1 %v6356_v60 }
 0x7a6   : > { %3890 = vmatprep.subr.mxu1 %v6304_v10 }
 0x7a7   : > { %3891 = vmatpush3.msra.mxu1 %v6357_v20 }
 0x7a8   : > { %3892 = vmatprep.subr.mxu1 %v6304_v10 }
 0x7a9   : > { %3893 = vmatpush3.msra.mxu1 %v6358_v32 }
 0x7aa   : > { %3894 = vmatprep.subr.mxu1 %v6304_v10 }
 0x7ab   : > { %3895 = vmatpush3.msra.mxu1 %v6359_v37 }
 0x7ac   : > { %3896 = vmatprep.subr.mxu1 %v6304_v10 }
 0x7ad   : > { %3897 = vmatpush3.msra.mxu1 %v6360_v17 }
 0x7ae   : > { %3898 = vmatprep.subr.mxu1 %v6304_v10 }
 0x7af   : > { %3899 = vmatpush3.msra.mxu1 %v6361_v33 }
 0x7b0   : > { %3900 = vmatprep.subr.mxu1 %v6304_v10 }
 0x7b1   : > { %3901 = vmatpush3.msra.mxu1 %v6362_v39 }
 0x7b2   : > { %3902 = vmatprep.subr.mxu1 %v6304_v10 }
 0x7b3   : > { %3903 = vmatpush3.msra.mxu1 %v6363_v46  ;;  %v520_v46 = vadd.f32 %v5629_v61, %v6366_v15  ;;  %v5770_v15 = vld [vmem:[#allocation10 + $0x40] sm:$0xff] }
 0x7b4   : > { %3904 = vmatprep.subr.mxu1 %v6304_v10 }
 0x7b5   : > { %3905 = vmatpush3.msra.mxu1 %v6364_v51 }
 0x7b6   : > { %3906 = vmatprep.subr.mxu1 %v6304_v10 }
 0x7b7   : > { %3907 = vmatpush3.msra.mxu1 %v6365_v29 }
 0x7b8   : > { %3908 = vmatprep.subr.mxu1 %v6304_v10 }
 0x7b9   : > { %3909 = vmatpush3.msra.mxu1 %v5509_v14 }
 0x7ba   : > { %2177 = vmatprep.subr.mxu1 %v5347_v0 }
 0x85a   : > { %v1826_v39 = vpop.f32.mrf.mxu1 }
 0x85b   : > { %v1830_v51 = vadd.f32 %v1826_v39, %v520_v46  ;;  %v5809_v39 = vld [vmem:[#allocation11 + $0x168] sm:$0xff]  ;;  %v5813_v46 = vld [vmem:[#allocation11 + $0x158] sm:$0xff] }
 0x85c   : > { %v3877_v33 = vpop.f32.mrf.mxu1 }
 0x85d   : > { %v1831_v17 = vmul.f32 0.666, %v1830_v51  ;;  %v5807_v33 = vld [vmem:[#allocation11 + $0x170] sm:$0xff] }
 0x85e   : > { %v5816_v51 = vld [vmem:[#allocation11 + $0x150] sm:$0xff] }
 0x85f   : > { %4303 = vtanh.f32 %v1831_v17  ;;  %v5802_v17 = vld [vmem:[#allocation10] sm:$0xff] }
 0x86c   : > { %v4304_v29 = vpop.eup %4303 }
 0x86d   : > { %v1833_v37 = vmul.f32 1.7159, %v4304_v29  ;;  %v5819_v29 = vld [vmem:[#allocation11 + $0x140] sm:$0xff] }
 0x86f   : > { %1947 = vmatmul.mubr.f32.vlgmr.msra.gmra.mxu0 %v1833_v37  ;;  %3911 = vmatmul.mubr.f32.vlgmr.msra.gmra.mxu1 %v1833_v37  ;;  %v5798_v37 = vld [vmem:[#allocation10 + $0x8] sm:$0xff] }
 0x870   : > { %3914 = vmatpush3.msra.mxu0 %v5284_v55  ;;  %3945 = vmatprep.mubr.msk.f32.mxu0 %vm4561_vm0, %v6304_v10  ;;  %v6367_v55 = vld [vmem:[#allocation22_spill] sm:$0xff] }
 0x871   : > { %3915 = vmatprep.subr.mxu0 %v6304_v10  ;;  %2178 = vmatpush1.msra.mxu1 %v5349_v25 }
 0x872   : > { %3916 = vmatpush3.msra.mxu0 %v5288_v57  ;;  %2179 = vmatprep.subr.mxu1 %v5353_v42  ;;  %v6368_v57 = vld [vmem:[#allocation26_spill] sm:$0xff] }
 0x873   : > { %3917 = vmatprep.subr.mxu0 %v6304_v10  ;;  %2180 = vmatpush1.msra.mxu1 %v5356_v58 }
 0x874   : > { %3918 = vmatpush3.msra.mxu0 %v5292_v59  ;;  %2181 = vmatprep.subr.mxu1 %v5359_v45  ;;  %v6369_v59 = vld [vmem:[#allocation27_spill] sm:$0xff] }
 0x875   : > { %3919 = vmatprep.subr.mxu0 %v6304_v10  ;;  %2182 = vmatpush1.msra.mxu1 %v5362_v56 }
 0x876   : > { %3920 = vmatpush3.msra.mxu0 %v5296_v62  ;;  %2183 = vmatprep.subr.mxu1 %v5365_v1  ;;  %v6370_v62 = vld [vmem:[#allocation23_spill] sm:$0xff] }
 0x877   : > { %3921 = vmatprep.subr.mxu0 %v6304_v10  ;;  %2184 = vmatpush1.msra.mxu1 %v5368_v3 }
 0x878   : > { %3922 = vmatpush3.msra.mxu0 %v5300_v63  ;;  %2185 = vmatprep.subr.mxu1 %v5371_v4  ;;  %v6371_v63 = vld [vmem:[#allocation31_spill] sm:$0xff] }
 0x879   : > { %3923 = vmatprep.subr.mxu0 %v6304_v10  ;;  %2186 = vmatpush1.msra.mxu1 %v5374_v7  ;;  %v6374_v7 = vld [vmem:[#allocation32_spill] sm:$0xff] }
 0x87a   : > { %3924 = vmatpush3.msra.mxu0 %v5304_v5  ;;  %2187 = vmatprep.subr.mxu1 %v5377_v9  ;;  %v6372_v5 = vld [vmem:[#allocation39_spill] sm:$0xff]  ;;  %v6375_v9 = vld [vmem:[#allocation33_spill] sm:$0xff] }
 0x87b   : > { %3925 = vmatprep.subr.mxu0 %v6304_v10  ;;  %2188 = vmatpush1.msra.mxu1 %v5409_v36  ;;  %v6378_v36 = vld [vmem:[#allocation36_spill] sm:$0xff] }
 0x87c   : > { %3926 = vmatpush3.msra.mxu0 %v5307_v8  ;;  %2189 = vmatprep.subr.mxu1 %v5415_v43  ;;  %v6379_v43 = vld [vmem:[#allocation43_spill] sm:$0xff] }
 0x87d   : > { %3927 = vmatprep.subr.mxu0 %v6304_v10  ;;  %2190 = vmatpush1.msra.mxu1 %v5419_v44  ;;  %v6380_v44 = vld [vmem:[#allocation28_spill] sm:$0xff] }
 0x87e   : > { %3928 = vmatpush3.msra.mxu0 %v5310_v13  ;;  %2191 = vmatprep.subr.mxu1 %v5425_v47  ;;  %v6381_v47 = vld [vmem:[#allocation40_spill] sm:$0xff] }
 0x87f   : > { %3929 = vmatprep.subr.mxu0 %v6304_v10  ;;  %2192 = vmatpush1.msra.mxu1 %v5429_v49  ;;  %v525_v49 = vadd.f32 %v5629_v61, %v6381_v47  ;;  %v5871_v47 = vld [vmem:[#allocation11 + $0x100] sm:$0xff] }
 0x880   : > { %3930 = vmatpush3.msra.mxu0 %v5314_v48  ;;  %2193 = vmatprep.subr.mxu1 %v5435_v54  ;;  %6386 = vst [vmem:[#allocation19_spill] sm:$0xff] %v5871_v47 }
 0x881   : > { %3931 = vmatprep.subr.mxu0 %v6304_v10  ;;  %2194 = vmatpush1.msra.mxu1 %v5439_v11 }
 0x882   : > { %3932 = vmatpush3.msra.mxu0 %v5318_v2  ;;  %2195 = vmatprep.subr.mxu1 %v5445_v16 }
 0x883   : > { %3933 = vmatprep.subr.mxu0 %v6304_v10  ;;  %2196 = vmatpush1.msra.mxu1 %v5449_v18 }
 0x884   : > { %3934 = vmatpush3.msra.mxu0 %v5322_v24  ;;  %2197 = vmatprep.subr.mxu1 %v5455_v21 }
 0x885   : > { %3935 = vmatprep.subr.mxu0 %v6304_v10  ;;  %2198 = vmatpush1.msra.mxu1 %v5459_v22 }
 0x886   : > { %3936 = vmatpush3.msra.mxu0 %v5326_v12  ;;  %2199 = vmatprep.subr.mxu1 %v5465_v27  ;;  %v5744_v27 = vld [vmem:[#allocation10 + $0x78] sm:$0xff] }
 0x887   : > { %3937 = vmatprep.subr.mxu0 %v6304_v10  ;;  %2200 = vmatpush1.msra.mxu1 %v5469_v28  ;;  %v5752_v28 = vld [vmem:[#allocation10 + $0x68] sm:$0xff] }
 0x888   : > { %3938 = vmatpush3.msra.mxu0 %v5330_v26  ;;  %2201 = vmatprep.subr.mxu1 %v5475_v30  ;;  %v5756_v30 = vld [vmem:[#allocation10 + $0x60] sm:$0xff] }
 0x889   : > { %3939 = vmatprep.subr.mxu0 %v6304_v10  ;;  %2202 = vmatpush1.msra.mxu1 %v5479_v31  ;;  %v5760_v31 = vld [vmem:[#allocation10 + $0x58] sm:$0xff] }
 0x88a   : > { %3940 = vmatpush3.msra.mxu0 %v5334_v6  ;;  %2203 = vmatprep.subr.mxu1 %v5485_v34  ;;  %v5764_v34 = vld [vmem:[#allocation10 + $0x50] sm:$0xff] }
 0x88b   : > { %3941 = vmatprep.subr.mxu0 %v6304_v10  ;;  %2204 = vmatpush1.msra.mxu1 %v5489_v35  ;;  %v5767_v35 = vld [vmem:[#allocation10 + $0x48] sm:$0xff] }
 0x88c   : > { %3942 = vmatpush3.msra.mxu0 %v6367_v55  ;;  %2205 = vmatprep.subr.mxu1 %v6368_v57  ;;  %v5822_v55 = vld [vmem:[#allocation11 + $0x138] sm:$0xff]  ;;  %v5825_v57 = vld [vmem:[#allocation11 + $0x128] sm:$0xff] }
 0x88d   : > { %3943 = vmatprep.subr.mxu0 %v6304_v10  ;;  %2206 = vmatpush1.msra.mxu1 %v6369_v59  ;;  %v5828_v59 = vld [vmem:[#allocation11 + $0x120] sm:$0xff] }
 0x88e   : > { %3944 = vmatpush3.msra.mxu0 %v6370_v62  ;;  %2207 = vmatprep.subr.mxu1 %v6371_v63  ;;  %v5831_v62 = vld [vmem:[#allocation11 + $0x110] sm:$0xff]  ;;  %v5834_v63 = vld [vmem:[#allocation11 + $0x108] sm:$0xff] }
 0x88f   : > { %3948 = vmatprep.subr.mxu0 %v6304_v10  ;;  %2208 = vmatpush1.msra.mxu1 %v6372_v5  ;;  %v5837_v5 = vld [vmem:[#allocation11 + $0xf8] sm:$0xff] }
 0x890   : > { %2241 = vmatprep.mubr.f32.mxu1 %v6304_v10  ;;  %3983 = vmatprep.subr.mxu1 %v6304_v10 }
 0x92f   : > { %v2019_v8 = vpop.f32.mrf.mxu1  ;;  %v1948_v24 = vpop.f32.mrf.mxu0 }
 0x930   : > { %v2020_v13 = vadd.f32 %v2019_v8, %v6324_v19  ;;  %v1949_v6 = vadd.f32 %v1948_v24, %v5128_v53 }
 0x931   : > { %v3912_v48 = vpop.f32.mrf.mxu1  ;;  %v1950_v12 = vpop.f32.mrf.mxu0 }
 0x932   : > { %v3223_v2 = vmul.f32 -1.442695, %v2020_v13  ;;  %v1951_v25 = vadd.f32 %v1950_v12, %v5130_v50 }
 0x934   : > { %4305 = vpow2.f32 %v3223_v2 }
 0x941   : > { %v4306_v26 = vpop.eup %4305 }
 0x942   : > { %v2028_v0 = vadd.f32 1.0, %v4306_v26 }
 0x944   : > { %4307 = vrcp.f32 %v2028_v0 }
 0x945   : > { %4309 = vtanh.f32 %v1949_v6 }
 0x946   : > { %4311 = vtanh.f32 %v1951_v25 }
 0x951   : > { %v4308_v42 = vpop.eup %4307 }
 0x952   : > { %v4310_v58 = vpop.eup %4309  ;;  %v2031_v45 = vsub.f32 1.0, %v4308_v42 }
 0x953   : > { %v4312_v56 = vpop.eup %4311 }
 0x954   : > { %v2032_v1 = vmul.f32 %v4310_v58, %v2031_v45  ;;  %v2033_v3 = vmul.f32 %v4312_v56, %v4308_v42 }
 0x956   : > { %v5703_v4 = vadd.f32 %v2033_v3, %v2032_v1 }
 0x958   : > { %6373 = vst [vmem:[#allocation25_spill] sm:$0xff] %v5703_v4  ;;  %3946 = vmatmul.mubr.f32.vlgmr.msra.gmra.mxu0 %v5703_v4  ;;  %v5955_v4 = vld [vmem:[#allocation11 + $0x20] sm:$0xff] }
 0x959   : > { %3949 = vmatpush3.msra.mxu0 %v5386_v38  ;;  %3980 = vmatprep.mubr.msk.f32.mxu0 %vm4561_vm0, %v6304_v10  ;;  %v6376_v38 = vld [vmem:[#allocation20_spill] sm:$0xff] }
 0x95a   : > { %3950 = vmatprep.subr.mxu0 %v6304_v10 }
 0x95b   : > { %3951 = vmatpush3.msra.mxu0 %v5389_v40  ;;  %v6377_v40 = vld [vmem:[#allocation35_spill] sm:$0xff] }
 0x95c   : > { %3952 = vmatprep.subr.mxu0 %v6304_v10 }
 0x95d   : > { %3953 = vmatpush3.msra.mxu0 %v6353_v23  ;;  %v5774_v23 = vld [vmem:[#allocation10 + $0x38] sm:$0xff] }
 0x95e   : > { %3954 = vmatprep.subr.mxu0 %v6304_v10 }
 0x95f   : > { %3955 = vmatpush3.msra.mxu0 %v6354_v41  ;;  %v5778_v41 = vld [vmem:[#allocation10 + $0x30] sm:$0xff] }
 0x960   : > { %3956 = vmatprep.subr.mxu0 %v6304_v10 }
 0x961   : > { %3957 = vmatpush3.msra.mxu0 %v6355_v52  ;;  %v5782_v52 = vld [vmem:[#allocation10 + $0x28] sm:$0xff] }
 0x962   : > { %3958 = vmatprep.subr.mxu0 %v6304_v10 }
 0x963   : > { %3959 = vmatpush3.msra.mxu0 %v6356_v60  ;;  %v5786_v60 = vld [vmem:[#allocation10 + $0x20] sm:$0xff] }
 0x964   : > { %3960 = vmatprep.subr.mxu0 %v6304_v10 }
 0x965   : > { %3961 = vmatpush3.msra.mxu0 %v6357_v20  ;;  %v5790_v20 = vld [vmem:[#allocation10 + $0x18] sm:$0xff] }
 0x966   : > { %3962 = vmatprep.subr.mxu0 %v6304_v10 }
 0x967   : > { %3963 = vmatpush3.msra.mxu0 %v6358_v32  ;;  %v5794_v32 = vld [vmem:[#allocation10 + $0x10] sm:$0xff] }
 0x968   : > { %3964 = vmatprep.subr.mxu0 %v6304_v10 }
 0x969   : > { %3965 = vmatpush3.msra.mxu0 %v6374_v7 }
 0x96a   : > { %3966 = vmatprep.subr.mxu0 %v6304_v10 }
 0x96b   : > { %3967 = vmatpush3.msra.mxu0 %v6375_v9  ;;  %v5846_v9 = vld [vmem:[#allocation11 + $0x178] sm:$0xff] }
 0x96c   : > { %3968 = vmatprep.subr.mxu0 %v6304_v10 }
 0x96d   : > { %3969 = vmatpush3.msra.mxu0 %v6376_v38  ;;  %v5849_v38 = vld [vmem:[#allocation11 + $0x160] sm:$0xff] }
 0x96e   : > { %3970 = vmatprep.subr.mxu0 %v6304_v10 }
 0x96f   : > { %3971 = vmatpush3.msra.mxu0 %v6377_v40  ;;  %v5855_v40 = vld [vmem:[#allocation11 + $0x148] sm:$0xff] }
 0x970   : > { %3972 = vmatprep.subr.mxu0 %v6304_v10  ;;  %6383 = vst [vmem:[#allocation37_spill] sm:$0xff] %v5855_v40 }
 0x971   : > { %3973 = vmatpush3.msra.mxu0 %v6378_v36  ;;  %v5859_v36 = vld [vmem:[#allocation11 + $0x130] sm:$0xff] }
 0x972   : > { %3974 = vmatprep.subr.mxu0 %v6304_v10  ;;  %6384 = vst [vmem:[#allocation29_spill] sm:$0xff] %v5859_v36 }
 0x973   : > { %3975 = vmatpush3.msra.mxu0 %v6379_v43  ;;  %v5863_v43 = vld [vmem:[#allocation11 + $0x118] sm:$0xff] }
 0x974   : > { %3976 = vmatprep.subr.mxu0 %v6304_v10  ;;  %6385 = vst [vmem:[#allocation30_spill] sm:$0xff] %v5863_v43 }
 0x975   : > { %3977 = vmatpush3.msra.mxu0 %v6380_v44  ;;  %v5869_v44 = vld [vmem:[#allocation11 + $0xf0] sm:$0xff] }
 0x976   : > { %3978 = vmatprep.subr.mxu0 %v6304_v10 }
 0x977   : > { %3979 = vmatpush3.msra.mxu0 %v5509_v14  ;;  %v5748_v14 = vld [vmem:[#allocation10 + $0x70] sm:$0xff] }
 0x978   : > { %2472 = vmatprep.subr.mxu0 %v5807_v33 }
 0xa18   : > { %v2121_v54 = vpop.f32.mrf.mxu0 }
 0xa19   : > { %v2125_v11 = vadd.f32 %v2121_v54, %v525_v49  ;;  %v5875_v49 = vld [vmem:[#allocation11 + $0xe0] sm:$0xff]  ;;  %v5879_v54 = vld [vmem:[#allocation11 + $0xd8] sm:$0xff] }
 0xa1a   : > { %v3947_v16 = vpop.f32.mrf.mxu0 }
 0xa1b   : > { %v2126_v18 = vmul.f32 0.666, %v2125_v11  ;;  %v5881_v11 = vld [vmem:[#allocation11 + $0xe8] sm:$0xff] }
 0xa1c   : > { %6387 = vst [vmem:[#allocation41_spill] sm:$0xff] %v5881_v11  ;;  %v5885_v16 = vld [vmem:[#allocation11 + $0xc8] sm:$0xff] }
 0xa1d   : > { %4313 = vtanh.f32 %v2126_v18  ;;  %v5889_v18 = vld [vmem:[#allocation11 + $0xc0] sm:$0xff] }
 0xa2a   : > { %v4314_v21 = vpop.eup %4313 }
 0xa2b   : > { %v2128_v22 = vmul.f32 1.7159, %v4314_v21  ;;  %v5891_v21 = vld [vmem:[#allocation11 + $0xd0] sm:$0xff] }
 0xa2c   : > { %6388 = vst [vmem:[#allocation22_spill] sm:$0xff] %v5891_v21 }
 0xa2d   : > { %2242 = vmatmul.mubr.f32.vlgmr.msra.gmra.mxu1 %v2128_v22  ;;  %3981 = vmatmul.mubr.f32.vlgmr.msra.gmra.mxu0 %v2128_v22  ;;  %v5895_v22 = vld [vmem:[#allocation11 + $0xb0] sm:$0xff] }
 0xa2e   : > { %4015 = vmatprep.mubr.msk.f32.mxu1 %vm4561_vm0, %v6304_v10  ;;  %2536 = vmatprep.mubr.f32.mxu0 %v6304_v10 }
 0xa2f   : > { %3984 = vmatpush3.msra.mxu1 %v5744_v27  ;;  %2473 = vmatpush1.msra.mxu0 %v5809_v39 }
 0xa30   : > { %3985 = vmatprep.subr.mxu1 %v6304_v10  ;;  %2474 = vmatprep.subr.mxu0 %v5813_v46 }
 0xa31   : > { %3986 = vmatpush3.msra.mxu1 %v5748_v14  ;;  %2475 = vmatpush1.msra.mxu0 %v5816_v51 }
 0xa32   : > { %3987 = vmatprep.subr.mxu1 %v6304_v10  ;;  %2476 = vmatprep.subr.mxu0 %v5819_v29 }
 0xa33   : > { %3988 = vmatpush3.msra.mxu1 %v5752_v28  ;;  %2477 = vmatpush1.msra.mxu0 %v5822_v55 }
 0xa34   : > { %3989 = vmatprep.subr.mxu1 %v6304_v10  ;;  %2478 = vmatprep.subr.mxu0 %v5825_v57 }
 0xa35   : > { %3990 = vmatpush3.msra.mxu1 %v5756_v30  ;;  %2479 = vmatpush1.msra.mxu0 %v5828_v59 }
 0xa36   : > { %3991 = vmatprep.subr.mxu1 %v6304_v10  ;;  %2480 = vmatprep.subr.mxu0 %v5831_v62 }
 0xa37   : > { %3992 = vmatpush3.msra.mxu1 %v5760_v31  ;;  %2481 = vmatpush1.msra.mxu0 %v5834_v63 }
 0xa38   : > { %3993 = vmatprep.subr.mxu1 %v6304_v10  ;;  %2482 = vmatprep.subr.mxu0 %v5837_v5 }
 0xa39   : > { %3994 = vmatpush3.msra.mxu1 %v5764_v34  ;;  %2483 = vmatpush1.msra.mxu0 %v5869_v44 }
 0xa3a   : > { %3995 = vmatprep.subr.mxu1 %v6304_v10  ;;  %2484 = vmatprep.subr.mxu0 %v5875_v49 }
 0xa3b   : > { %3996 = vmatpush3.msra.mxu1 %v5767_v35  ;;  %2485 = vmatpush1.msra.mxu0 %v5879_v54 }
 0xa3c   : > { %3997 = vmatprep.subr.mxu1 %v6304_v10  ;;  %2486 = vmatprep.subr.mxu0 %v5885_v16 }
 0xa3d   : > { %3998 = vmatpush3.msra.mxu1 %v5770_v15  ;;  %2487 = vmatpush1.msra.mxu0 %v5889_v18 }
 0xa3e   : > { %3999 = vmatprep.subr.mxu1 %v6304_v10  ;;  %2488 = vmatprep.subr.mxu0 %v5895_v22 }
 0xa3f   : > { %4000 = vmatpush3.msra.mxu1 %v5774_v23 }
 0xa40   : > { %4001 = vmatprep.subr.mxu1 %v6304_v10 }
 0xa41   : > { %4002 = vmatpush3.msra.mxu1 %v5778_v41 }
 0xa42   : > { %4003 = vmatprep.subr.mxu1 %v6304_v10 }
 0xa43   : > { %4004 = vmatpush3.msra.mxu1 %v5782_v52 }
 0xa44   : > { %4005 = vmatprep.subr.mxu1 %v6304_v10 }
 0xa45   : > { %4006 = vmatpush3.msra.mxu1 %v5786_v60 }
 0xa46   : > { %4007 = vmatprep.subr.mxu1 %v6304_v10 }
 0xa47   : > { %4008 = vmatpush3.msra.mxu1 %v5790_v20 }
 0xa48   : > { %4009 = vmatprep.subr.mxu1 %v6304_v10 }
 0xa49   : > { %4010 = vmatpush3.msra.mxu1 %v5794_v32 }
 0xa4a   : > { %4011 = vmatprep.subr.mxu1 %v6304_v10 }
 0xa4b   : > { %4012 = vmatpush3.msra.mxu1 %v5798_v37 }
 0xa4c   : > { %4013 = vmatprep.subr.mxu1 %v6304_v10 }
 0xa4d   : > { %4014 = vmatpush3.msra.mxu1 %v5802_v17 }
 0xa4e   : > { %4018 = vmatprep.subr.mxu1 %v6304_v10 }
 0xaed   : > { %v2314_v8 = vpop.f32.mrf.mxu0  ;;  %v2243_v24 = vpop.f32.mrf.mxu1 }
 0xaee   : > { %v2315_v13 = vadd.f32 %v2314_v8, %v6324_v19  ;;  %v2244_v6 = vadd.f32 %v2243_v24, %v5128_v53  ;;  %v5899_v8 = vld [vmem:[#allocation11 + $0xa8] sm:$0xff]  ;;  %v5911_v24 = vld [vmem:[#allocation11 + $0xa0] sm:$0xff] }
 0xaef   : > { %v3982_v48 = vpop.f32.mrf.mxu0  ;;  %v2245_v12 = vpop.f32.mrf.mxu1  ;;  %2489 = vmatpush1.msra.mxu0 %v5899_v8  ;;  %6390 = vst [vmem:[#allocation27_spill] sm:$0xff] %v5911_v24 }
 0xaf0   : > { %v3224_v2 = vmul.f32 -1.442695, %v2315_v13  ;;  %v2246_v25 = vadd.f32 %v2245_v12, %v5130_v50  ;;  %v5901_v13 = vld [vmem:[#allocation11 + $0xb8] sm:$0xff]  ;;  %v5915_v12 = vld [vmem:[#allocation11 + $0x80] sm:$0xff] }
 0xaf1   : > { %6389 = vst [vmem:[#allocation26_spill] sm:$0xff] %v5901_v13  ;;  %v5905_v48 = vld [vmem:[#allocation11 + $0x98] sm:$0xff] }
 0xaf2   : > { %4315 = vpow2.f32 %v3224_v2  ;;  %2490 = vmatprep.subr.mxu0 %v5905_v48  ;;  %v5909_v2 = vld [vmem:[#allocation11 + $0x90] sm:$0xff] }
 0xaf3   : > { %2491 = vmatpush1.msra.mxu0 %v5909_v2 }
 0xaf4   : > { %2492 = vmatprep.subr.mxu0 %v5915_v12 }
 0xaff   : > { %v4316_v26 = vpop.eup %4315 }
 0xb00   : > { %v2323_v0 = vadd.f32 1.0, %v4316_v26  ;;  %v5919_v26 = vld [vmem:[#allocation11 + $0x78] sm:$0xff] }
 0xb01   : > { %2493 = vmatpush1.msra.mxu0 %v5919_v26 }
 0xb02   : > { %4317 = vrcp.f32 %v2323_v0  ;;  %v5925_v0 = vld [vmem:[#allocation11 + $0x68] sm:$0xff] }
 0xb03   : > { %4319 = vtanh.f32 %v2244_v6  ;;  %v5921_v6 = vld [vmem:[#allocation11 + $0x88] sm:$0xff]  ;;  %2494 = vmatprep.subr.mxu0 %v5925_v0 }
 0xb04   : > { %4321 = vtanh.f32 %v2246_v25  ;;  %6391 = vst [vmem:[#allocation23_spill] sm:$0xff] %v5921_v6  ;;  %v5929_v25 = vld [vmem:[#allocation11 + $0x60] sm:$0xff] }
 0xb05   : > { %2495 = vmatpush1.msra.mxu0 %v5929_v25 }
 0xb0f   : > { %v4318_v42 = vpop.eup %4317 }
 0xb10   : > { %v4320_v58 = vpop.eup %4319  ;;  %v2326_v45 = vsub.f32 1.0, %v4318_v42 }
 0xb11   : > { %v4322_v56 = vpop.eup %4321 }
 0xb12   : > { %v2327_v1 = vmul.f32 %v4320_v58, %v2326_v45  ;;  %v2328_v3 = vmul.f32 %v4322_v56, %v4318_v42  ;;  %v5931_v42 = vld [vmem:[#allocation11 + $0x70] sm:$0xff]  ;;  %v5939_v45 = vld [vmem:[#allocation11 + $0x48] sm:$0xff]  ;;  %v5941_v56 = vld [vmem:[#allocation11 + $0x58] sm:$0xff] }
 0xb13   : > { %6392 = vst [vmem:[#allocation31_spill] sm:$0xff] %v5931_v42  ;;  %v5935_v58 = vld [vmem:[#allocation11 + $0x50] sm:$0xff]  ;;  %6393 = vst [vmem:[#allocation39_spill] sm:$0xff] %v5941_v56 }
 0xb14   : > { %v5844_v7 = vadd.f32 %v2328_v3, %v2327_v1  ;;  %2496 = vmatprep.subr.mxu0 %v5935_v58  ;;  %v5945_v1 = vld [vmem:[#allocation11 + $0x38] sm:$0xff]  ;;  %v5949_v3 = vld [vmem:[#allocation11 + $0x30] sm:$0xff] }
 0xb15   : > { %2497 = vmatpush1.msra.mxu0 %v5939_v45 }
 0xb16   : > { %6382 = vst [vmem:[#allocation34_spill] sm:$0xff] %v5844_v7  ;;  %4016 = vmatmul.mubr.f32.vlgmr.msra.gmra.mxu1 %v5844_v7  ;;  %2498 = vmatprep.subr.mxu0 %v5945_v1  ;;  %v5951_v7 = vld [vmem:[#allocation11 + $0x40] sm:$0xff] }
 0xb17   : > { %4019 = vmatpush3.msra.mxu1 %v5846_v9  ;;  %4050 = vmatprep.mubr.msk.f32.mxu1 %vm4561_vm0, %v6304_v10  ;;  %6394 = vst [vmem:[#allocation32_spill] sm:$0xff] %v5951_v7 }
 0xb18   : > { %4020 = vmatprep.subr.mxu1 %v6304_v10  ;;  %2499 = vmatpush1.msra.mxu0 %v5949_v3 }
 0xb19   : > { %4021 = vmatpush3.msra.mxu1 %v5849_v38  ;;  %2500 = vmatprep.subr.mxu0 %v5955_v4 }
 0xb1a   : > { %4022 = vmatprep.subr.mxu1 %v6304_v10 }
 0xb1b   : > { %4023 = vmatpush3.msra.mxu1 %v5855_v40 }
 0xb1c   : > { %4024 = vmatprep.subr.mxu1 %v6304_v10 }
 0xb1d   : > { %4025 = vmatpush3.msra.mxu1 %v5859_v36 }
 0xb1e   : > { %4026 = vmatprep.subr.mxu1 %v6304_v10 }
 0xb1f   : > { %4027 = vmatpush3.msra.mxu1 %v5863_v43 }
 0xb20   : > { %4028 = vmatprep.subr.mxu1 %v6304_v10 }
 0xb21   : > { %4029 = vmatpush3.msra.mxu1 %v5871_v47 }
 0xb22   : > { %4030 = vmatprep.subr.mxu1 %v6304_v10 }
 0xb23   : > { %4031 = vmatpush3.msra.mxu1 %v5881_v11 }
 0xb24   : > { %4032 = vmatprep.subr.mxu1 %v6304_v10 }
 0xb25   : > { %4033 = vmatpush3.msra.mxu1 %v5891_v21 }
 0xb26   : > { %4034 = vmatprep.subr.mxu1 %v6304_v10 }
 0xb27   : > { %4035 = vmatpush3.msra.mxu1 %v5901_v13  ;;  %v5969_v13 = vld [vmem:[#allocation11 + $0x10] sm:$0xff] }
 0xb28   : > { %4036 = vmatprep.subr.mxu1 %v6304_v10 }
 0xb29   : > { %4037 = vmatpush3.msra.mxu1 %v5911_v24  ;;  %v5967_v24 = vld [vmem:[#allocation11] sm:$0xff] }
 0xb2a   : > { %4038 = vmatprep.subr.mxu1 %v6304_v10 }
 0xb2b   : > { %4039 = vmatpush3.msra.mxu1 %v5921_v6  ;;  %v5965_v6 = vld [vmem:[#allocation11 + $0x8] sm:$0xff] }
 0xb2c   : > { %4040 = vmatprep.subr.mxu1 %v6304_v10 }
 0xb2d   : > { %4041 = vmatpush3.msra.mxu1 %v5931_v42  ;;  %v5961_v42 = vld [vmem:[#allocation11 + $0x28] sm:$0xff] }
 0xb2e   : > { %4042 = vmatprep.subr.mxu1 %v6304_v10  ;;  %6395 = vst [vmem:[#allocation33_spill] sm:$0xff] %v5961_v42 }
 0xb2f   : > { %4043 = vmatpush3.msra.mxu1 %v5941_v56  ;;  %v5959_v56 = vld [vmem:[#allocation11 + $0x18] sm:$0xff] }
 0xb30   : > { %4044 = vmatprep.subr.mxu1 %v6304_v10  ;;  %2501 = vmatpush1.msra.mxu0 %v5959_v56 }
 0xb31   : > { %4045 = vmatpush3.msra.mxu1 %v5951_v7  ;;  %2502 = vmatprep.subr.mxu0 %v5965_v6  ;;  %v6396_v7 = vld [vmem:[#allocation44_spill] sm:$0xff] }
 0xb32   : > { %4046 = vmatprep.subr.mxu1 %v6304_v10  ;;  %2503 = vmatpush1.msra.mxu0 %v5967_v24 }
 0xb33   : > { %4047 = vmatpush3.msra.mxu1 %v5961_v42  ;;  %4053 = vmatprep.subr.mxu0 %v6304_v10  ;;  %v530_v42 = vadd.f32 %v5629_v61, %v6396_v7  ;;  %v6408_v7 = vld [vmem:[#allocation32_spill] sm:$0xff] }
 0xb34   : > { %4048 = vmatprep.subr.mxu1 %v6304_v10 }
 0xb35   : > { %4049 = vmatpush3.msra.mxu1 %v5969_v13 }
 0xb36   : > { %2767 = vmatprep.subr.mxu1 %v5807_v33  ;;  %v6397_v33 = vld [vmem:[#allocation37_spill] sm:$0xff] }
 0xbd6   : > { %v2416_v21 = vpop.f32.mrf.mxu1 }
 0xbd7   : > { %v2420_v11 = vadd.f32 %v2416_v21, %v530_v42  ;;  %v2943_v21 = vld [vmem:[#allocation13 + $0x60] sm:$0xff]  ;;  %v6412_v42 = vld [vmem:[#allocation21_spill] sm:$0xff] }
 0xbd8   : > { %v4017_v47 = vpop.f32.mrf.mxu1 }
 0xbd9   : > { %v2421_v43 = vmul.f32 0.666, %v2420_v11 }
 0xbdb   : > { %4323 = vtanh.f32 %v2421_v43 }
 0xbe8   : > { %v4324_v36 = vpop.eup %4323 }
 0xbe9   : > { %v2423_v40 = vmul.f32 1.7159, %v4324_v36 }
 0xbeb   : > { %2537 = vmatmul.mubr.f32.vlgmr.msra.gmra.mxu0 %v2423_v40  ;;  %4051 = vmatmul.mubr.f32.vlgmr.msra.gmra.mxu1 %v2423_v40  ;;  %v6410_v40 = vld [vmem:[#allocation42_spill] sm:$0xff] }
 0xbec   : > { %4054 = vmatpush3.msra.mxu0 %v5744_v27  ;;  %4085 = vmatprep.mubr.msk.f32.mxu0 %vm4561_vm0, %v6304_v10  ;;  %v535_v36 = vadd.f32 %v5629_v61, %v6410_v40  ;;  %v2942_v61 = vld [vmem:[#allocation13 + $0x58] sm:$0xff] }
 0xbed   : > { %4055 = vmatprep.subr.mxu0 %v6304_v10  ;;  %2768 = vmatpush1.msra.mxu1 %v5809_v39  ;;  %v6398_v39 = vld [vmem:[#allocation29_spill] sm:$0xff] }
 0xbee   : > { %4056 = vmatpush3.msra.mxu0 %v5748_v14  ;;  %2769 = vmatprep.subr.mxu1 %v5813_v46  ;;  %v6399_v46 = vld [vmem:[#allocation30_spill] sm:$0xff] }
 0xbef   : > { %4057 = vmatprep.subr.mxu0 %v6304_v10  ;;  %2770 = vmatpush1.msra.mxu1 %v5816_v51  ;;  %v6400_v51 = vld [vmem:[#allocation19_spill] sm:$0xff] }
 0xbf0   : > { %4058 = vmatpush3.msra.mxu0 %v5752_v28  ;;  %2771 = vmatprep.subr.mxu1 %v5819_v29  ;;  %v6401_v29 = vld [vmem:[#allocation41_spill] sm:$0xff] }
 0xbf1   : > { %4059 = vmatprep.subr.mxu0 %v6304_v10  ;;  %2772 = vmatpush1.msra.mxu1 %v5822_v55  ;;  %v6402_v55 = vld [vmem:[#allocation22_spill] sm:$0xff] }
 0xbf2   : > { %4060 = vmatpush3.msra.mxu0 %v5756_v30  ;;  %2773 = vmatprep.subr.mxu1 %v5825_v57  ;;  %v6403_v57 = vld [vmem:[#allocation26_spill] sm:$0xff] }
 0xbf3   : > { %4061 = vmatprep.subr.mxu0 %v6304_v10  ;;  %2774 = vmatpush1.msra.mxu1 %v5828_v59  ;;  %v6404_v59 = vld [vmem:[#allocation27_spill] sm:$0xff] }
 0xbf4   : > { %4062 = vmatpush3.msra.mxu0 %v5760_v31  ;;  %2775 = vmatprep.subr.mxu1 %v5831_v62  ;;  %v6405_v62 = vld [vmem:[#allocation23_spill] sm:$0xff] }
 0xbf5   : > { %4063 = vmatprep.subr.mxu0 %v6304_v10  ;;  %2776 = vmatpush1.msra.mxu1 %v5834_v63  ;;  %v6406_v63 = vld [vmem:[#allocation31_spill] sm:$0xff] }
 0xbf6   : > { %4064 = vmatpush3.msra.mxu0 %v5764_v34  ;;  %2777 = vmatprep.subr.mxu1 %v5837_v5  ;;  %v6407_v5 = vld [vmem:[#allocation39_spill] sm:$0xff] }
 0xbf7   : > { %4065 = vmatprep.subr.mxu0 %v6304_v10  ;;  %2778 = vmatpush1.msra.mxu1 %v5869_v44 }
 0xbf8   : > { %4066 = vmatpush3.msra.mxu0 %v5767_v35  ;;  %2779 = vmatprep.subr.mxu1 %v5875_v49 }
 0xbf9   : > { %4067 = vmatprep.subr.mxu0 %v6304_v10  ;;  %2780 = vmatpush1.msra.mxu1 %v5879_v54 }
 0xbfa   : > { %4068 = vmatpush3.msra.mxu0 %v5770_v15  ;;  %2781 = vmatprep.subr.mxu1 %v5885_v16  ;;  %v2945_v16 = vld [vmem:[#allocation13 + $0x70] sm:$0xff] }
 0xbfb   : > { %4069 = vmatprep.subr.mxu0 %v6304_v10  ;;  %2782 = vmatpush1.msra.mxu1 %v5889_v18  ;;  %v6411_v18 = vld [vmem:[#allocation45_spill] sm:$0xff] }
 0xbfc   : > { %4070 = vmatpush3.msra.mxu0 %v5774_v23  ;;  %2783 = vmatprep.subr.mxu1 %v5895_v22  ;;  %v2941_v22 = vld [vmem:[#allocation13 + $0x50] sm:$0xff] }
 0xbfd   : > { %4071 = vmatprep.subr.mxu0 %v6304_v10  ;;  %2784 = vmatpush1.msra.mxu1 %v5899_v8  ;;  %v2940_v8 = vld [vmem:[#allocation13 + $0x48] sm:$0xff] }
 0xbfe   : > { %4072 = vmatpush3.msra.mxu0 %v5778_v41  ;;  %2785 = vmatprep.subr.mxu1 %v5905_v48  ;;  %v2938_v48 = vld [vmem:[#allocation13 + $0x38] sm:$0xff] }
 0xbff   : > { %4073 = vmatprep.subr.mxu0 %v6304_v10  ;;  %2786 = vmatpush1.msra.mxu1 %v5909_v2  ;;  %v2937_v2 = vld [vmem:[#allocation13 + $0x30] sm:$0xff] }
 0xc00   : > { %4074 = vmatpush3.msra.mxu0 %v5782_v52  ;;  %2787 = vmatprep.subr.mxu1 %v5915_v12  ;;  %v2935_v12 = vld [vmem:[#allocation13 + $0x20] sm:$0xff] }
 0xc01   : > { %4075 = vmatprep.subr.mxu0 %v6304_v10  ;;  %2788 = vmatpush1.msra.mxu1 %v5919_v26  ;;  %v2934_v26 = vld [vmem:[#allocation13 + $0x18] sm:$0xff] }
 0xc02   : > { %4076 = vmatpush3.msra.mxu0 %v5786_v60  ;;  %2789 = vmatprep.subr.mxu1 %v5925_v0  ;;  %v2932_v0 = vld [vmem:[#allocation13 + $0x8] sm:$0xff] }
 0xc03   : > { %4077 = vmatprep.subr.mxu0 %v6304_v10  ;;  %2790 = vmatpush1.msra.mxu1 %v5929_v25  ;;  %v2931_v25 = vld [vmem:[#allocation13] sm:$0xff] }
 0xc04   : > { %4078 = vmatpush3.msra.mxu0 %v5790_v20  ;;  %2791 = vmatprep.subr.mxu1 %v5935_v58  ;;  %v6413_v58 = vld [vmem:[#allocation24_spill] sm:$0xff] }
 0xc05   : > { %4079 = vmatprep.subr.mxu0 %v6304_v10  ;;  %2792 = vmatpush1.msra.mxu1 %v5939_v45  ;;  %v6414_v45 = vld [vmem:[#allocation38_spill] sm:$0xff] }
 0xc06   : > { %4080 = vmatpush3.msra.mxu0 %v5794_v32  ;;  %2793 = vmatprep.subr.mxu1 %v5945_v1  ;;  %v6416_v1 = vld [vmem:[#allocation34_spill] sm:$0xff] }
 0xc07   : > { %4081 = vmatprep.subr.mxu0 %v6304_v10  ;;  %2794 = vmatpush1.msra.mxu1 %v5949_v3 }
 0xc08   : > { %4082 = vmatpush3.msra.mxu0 %v5798_v37  ;;  %2795 = vmatprep.subr.mxu1 %v5955_v4 }
 0xc09   : > { %4083 = vmatprep.subr.mxu0 %v6304_v10  ;;  %2796 = vmatpush1.msra.mxu1 %v5959_v56  ;;  %v6415_v56 = vld [vmem:[#allocation25_spill] sm:$0xff] }
 0xc0a   : > { %4084 = vmatpush3.msra.mxu0 %v5802_v17  ;;  %2797 = vmatprep.subr.mxu1 %v5965_v6  ;;  %v2933_v6 = vld [vmem:[#allocation13 + $0x10] sm:$0xff] }
 0xc0b   : > { %4088 = vmatprep.subr.mxu0 %v6304_v10  ;;  %2798 = vmatpush1.msra.mxu1 %v5967_v24  ;;  %v2936_v24 = vld [vmem:[#allocation13 + $0x28] sm:$0xff] }
 0xc0c   : > { %2831 = vmatprep.mubr.f32.mxu1 %v6304_v10 }
 0xcab   : > { %v2609_v27 = vpop.f32.mrf.mxu1  ;;  %v2538_v4 = vpop.f32.mrf.mxu0 }
 0xcac   : > { %v2610_v14 = vadd.f32 %v2609_v27, %v6324_v19  ;;  %v2539_v35 = vadd.f32 %v2538_v4, %v5128_v53 }
 0xcad   : > { %v4052_v28 = vpop.f32.mrf.mxu1  ;;  %v2540_v31 = vpop.f32.mrf.mxu0 }
 0xcae   : > { %v3225_v30 = vmul.f32 -1.442695, %v2610_v14  ;;  %v2541_v23 = vadd.f32 %v2540_v31, %v5130_v50 }
 0xcb0   : > { %4325 = vpow2.f32 %v3225_v30 }
 0xcbd   : > { %v4326_v34 = vpop.eup %4325 }
 0xcbe   : > { %v2618_v15 = vadd.f32 1.0, %v4326_v34 }
 0xcc0   : > { %4327 = vrcp.f32 %v2618_v15 }
 0xcc1   : > { %4329 = vtanh.f32 %v2539_v35 }
 0xcc2   : > { %4331 = vtanh.f32 %v2541_v23 }
 0xccd   : > { %v4328_v41 = vpop.eup %4327 }
 0xcce   : > { %v4330_v52 = vpop.eup %4329  ;;  %v2621_v60 = vsub.f32 1.0, %v4328_v41 }
 0xccf   : > { %v4332_v20 = vpop.eup %4331 }
 0xcd0   : > { %v2622_v32 = vmul.f32 %v4330_v52, %v2621_v60  ;;  %v2623_v37 = vmul.f32 %v4332_v20, %v4328_v41 }
 0xcd2   : > { %v6048_v17 = vadd.f32 %v2623_v37, %v2622_v32 }
 0xcd4   : > { %4086 = vmatmul.mubr.f32.vlgmr.msra.gmra.mxu0 %v6048_v17 }
 0xcd5   : > { %4089 = vmatpush3.msra.mxu0 %v5846_v9  ;;  %4120 = vmatprep.mubr.msk.f32.mxu0 %vm4561_vm0, %v6304_v10  ;;  %v6409_v9 = vld [vmem:[#allocation33_spill] sm:$0xff] }
 0xcd6   : > { %4090 = vmatprep.subr.mxu0 %v6304_v10 }
 0xcd7   : > { %4091 = vmatpush3.msra.mxu0 %v5849_v38  ;;  %v2946_v38 = vld [vmem:[#allocation13 + $0x78] sm:$0xff] }
 0xcd8   : > { %4092 = vmatprep.subr.mxu0 %v6304_v10  ;;  %4123 = vmatprep.subr.mxu1 %v2946_v38 }
 0xcd9   : > { %4093 = vmatpush3.msra.mxu0 %v6397_v33 }
 0xcda   : > { %4094 = vmatprep.subr.mxu0 %v6304_v10 }
 0xcdb   : > { %4095 = vmatpush3.msra.mxu0 %v6398_v39 }
 0xcdc   : > { %4096 = vmatprep.subr.mxu0 %v6304_v10 }
 0xcdd   : > { %4097 = vmatpush3.msra.mxu0 %v6399_v46 }
 0xcde   : > { %4098 = vmatprep.subr.mxu0 %v6304_v10 }
 0xcdf   : > { %4099 = vmatpush3.msra.mxu0 %v6400_v51 }
 0xce0   : > { %4100 = vmatprep.subr.mxu0 %v6304_v10 }
 0xce1   : > { %4101 = vmatpush3.msra.mxu0 %v6401_v29 }
 0xce2   : > { %4102 = vmatprep.subr.mxu0 %v6304_v10 }
 0xce3   : > { %4103 = vmatpush3.msra.mxu0 %v6402_v55 }
 0xce4   : > { %4104 = vmatprep.subr.mxu0 %v6304_v10 }
 0xce5   : > { %4105 = vmatpush3.msra.mxu0 %v6403_v57 }
 0xce6   : > { %4106 = vmatprep.subr.mxu0 %v6304_v10 }
 0xce7   : > { %4107 = vmatpush3.msra.mxu0 %v6404_v59 }
 0xce8   : > { %4108 = vmatprep.subr.mxu0 %v6304_v10 }
 0xce9   : > { %4109 = vmatpush3.msra.mxu0 %v6405_v62 }
 0xcea   : > { %4110 = vmatprep.subr.mxu0 %v6304_v10 }
 0xceb   : > { %4111 = vmatpush3.msra.mxu0 %v6406_v63 }
 0xcec   : > { %4112 = vmatprep.subr.mxu0 %v6304_v10 }
 0xced   : > { %4113 = vmatpush3.msra.mxu0 %v6407_v5 }
 0xcee   : > { %4114 = vmatprep.subr.mxu0 %v6304_v10 }
 0xcef   : > { %4115 = vmatpush3.msra.mxu0 %v6408_v7 }
 0xcf0   : > { %4116 = vmatprep.subr.mxu0 %v6304_v10 }
 0xcf1   : > { %4117 = vmatpush3.msra.mxu0 %v6409_v9 }
 0xcf2   : > { %4118 = vmatprep.subr.mxu0 %v6304_v10  ;;  %v2944_v10 = vld [vmem:[#allocation13 + $0x68] sm:$0xff] }
 0xcf3   : > { %4119 = vmatpush3.msra.mxu0 %v5969_v13  ;;  %v2939_v13 = vld [vmem:[#allocation13 + $0x40] sm:$0xff] }
 0xd94   : > { %v2711_v43 = vpop.f32.mrf.mxu0 }
 0xd95   : > { %v2715_v44 = vadd.f32 %v2711_v43, %v535_v36 }
 0xd96   : > { %v4087_v47 = vpop.f32.mrf.mxu0 }
 0xd97   : > { %v2716_v49 = vmul.f32 0.666, %v2715_v44 }
 0xd99   : > { %4333 = vtanh.f32 %v2716_v49 }
 0xda6   : > { %v4334_v54 = vpop.eup %4333 }
 0xda7   : > { %v2718_v11 = vmul.f32 1.7159, %v4334_v54 }
 0xda9   : > { %2832 = vmatmul.mubr.f32.vlgmr.msra.gmra.mxu1 %v2718_v11  ;;  %4121 = vmatmul.mubr.f32.vlgmr.msra.gmra.mxu0 %v2718_v11 }
 0xdaa   : > { %4124 = vmatpush3.msra.mxu1 %v2946_v38  ;;  %4155 = vmatprep.mubr.f32.mxu1 %v6411_v18 }
 0xdab   : > { %4125 = vmatprep.subr.mxu1 %v2945_v16 }
 0xdac   : > { %4126 = vmatpush3.msra.mxu1 %v2945_v16 }
 0xdad   : > { %4127 = vmatprep.subr.mxu1 %v2944_v10 }
 0xdae   : > { %4128 = vmatpush3.msra.mxu1 %v2944_v10 }
 0xdaf   : > { %4129 = vmatprep.subr.mxu1 %v2943_v21 }
 0xdb0   : > { %4130 = vmatpush3.msra.mxu1 %v2943_v21 }
 0xdb1   : > { %4131 = vmatprep.subr.mxu1 %v2942_v61 }
 0xdb2   : > { %4132 = vmatpush3.msra.mxu1 %v2942_v61 }
 0xdb3   : > { %4133 = vmatprep.subr.mxu1 %v2941_v22 }
 0xdb4   : > { %4134 = vmatpush3.msra.mxu1 %v2941_v22 }
 0xdb5   : > { %4135 = vmatprep.subr.mxu1 %v2940_v8 }
 0xdb6   : > { %4136 = vmatpush3.msra.mxu1 %v2940_v8 }
 0xdb7   : > { %4137 = vmatprep.subr.mxu1 %v2939_v13 }
 0xdb8   : > { %4138 = vmatpush3.msra.mxu1 %v2939_v13 }
 0xdb9   : > { %4139 = vmatprep.subr.mxu1 %v2938_v48 }
 0xdba   : > { %4140 = vmatpush3.msra.mxu1 %v2938_v48 }
 0xdbb   : > { %4141 = vmatprep.subr.mxu1 %v2937_v2 }
 0xdbc   : > { %4142 = vmatpush3.msra.mxu1 %v2937_v2 }
 0xdbd   : > { %4143 = vmatprep.subr.mxu1 %v2936_v24 }
 0xdbe   : > { %4144 = vmatpush3.msra.mxu1 %v2936_v24 }
 0xdbf   : > { %4145 = vmatprep.subr.mxu1 %v2935_v12 }
 0xdc0   : > { %4146 = vmatpush3.msra.mxu1 %v2935_v12 }
 0xdc1   : > { %4147 = vmatprep.subr.mxu1 %v2934_v26 }
 0xdc2   : > { %4148 = vmatpush3.msra.mxu1 %v2934_v26 }
 0xdc3   : > { %4149 = vmatprep.subr.mxu1 %v2933_v6 }
 0xdc4   : > { %4150 = vmatpush3.msra.mxu1 %v2933_v6 }
 0xdc5   : > { %4151 = vmatprep.subr.mxu1 %v2932_v0 }
 0xdc6   : > { %4152 = vmatpush3.msra.mxu1 %v2932_v0 }
 0xdc7   : > { %4153 = vmatprep.subr.mxu1 %v2931_v25 }
 0xdc8   : > { %4154 = vmatpush3.msra.mxu1 %v2931_v25 }
 0xdc9   : > { %4156 = vmatmul.mubr.f32.vlgmr.msra.gmra.mxu1 %v6412_v42 }
 0xdca   : > { %4158 = vmatprep.mubr.f32.mxu1 %v6413_v58 }
 0xdcd   : > { %4159 = vmatmul.mubr.f32.gmra.mxu1 %v6414_v45 }
 0xdce   : > { %4161 = vmatprep.mubr.f32.mxu1 %v6415_v56 }
 0xdd1   : > { %4162 = vmatmul.mubr.f32.gmra.mxu1 %v6416_v1 }
 0xdd2   : > { %4164 = vmatprep.mubr.f32.mxu1 %v6048_v17 }
 0xe69   : > { %v2904_v3 = vpop.f32.mrf.mxu0  ;;  %v2833_v30 = vpop.f32.mrf.mxu1 }
 0xe6a   : > { %v2905_v27 = vadd.f32 %v2904_v3, %v6324_v19  ;;  %v2834_v34 = vadd.f32 %v2833_v30, %v5128_v53  ;;  %v3227_v19 = vld [vmem:[%s6164_s7] ss:$0 sm:$0xff] }
 0xe6b   : > { %v4122_v14 = vpop.f32.mrf.mxu0  ;;  %v2835_v4 = vpop.f32.mrf.mxu1 }
 0xe6c   : > { %v3226_v28 = vmul.f32 -1.442695, %v2905_v27  ;;  %v2836_v15 = vadd.f32 %v2835_v4, %v5130_v50 }
 0xe6e   : > { %4335 = vpow2.f32 %v3226_v28 }
 0xe7b   : > { %v4336_v31 = vpop.eup %4335 }
 0xe7c   : > { %v2913_v35 = vadd.f32 1.0, %v4336_v31 }
 0xe7e   : > { %4337 = vrcp.f32 %v2913_v35 }
 0xe7f   : > { %4339 = vtanh.f32 %v2834_v34 }
 0xe80   : > { %4341 = vtanh.f32 %v2836_v15 }
 0xe89   : > { %v4157_v23 = vpop.f32.mrf.mxu1 }
 0xe8a   : > { %v3026_v41 = vadd.f32 %v4157_v23, %v3227_v19 }
 0xe8b   : > { %v4338_v52 = vpop.eup %4337  ;;  %v3020_v60 = vpop.f32.mrf.mxu1 }
 0xe8c   : > { %v4340_v20 = vpop.eup %4339  ;;  %3060 = vst [vmem:[%s4784_s13 + $0x8] sm:$0xff] %v3026_v41  ;;  %v3021_v53 = vadd.f32 %v3227_v19, %v3020_v60  ;;  %v2916_v32 = vsub.f32 1.0, %v4338_v52 }
 0xe8d   : > { %v4342_v37 = vpop.eup %4341  ;;  %v4160_v50 = vpop.f32.mrf.mxu1 }
 0xe8e   : > { %3059 = vst [vmem:[%s4784_s13] sm:$0xff] %v3021_v53  ;;  %v3036_v17 = vadd.f32 %v4160_v50, %v3227_v19  ;;  %v2917_v33 = vmul.f32 %v4340_v20, %v2916_v32  ;;  %v2918_v39 = vmul.f32 %v4342_v37, %v4338_v52 }
 0xe8f   : > { %v3030_v46 = vpop.f32.mrf.mxu1 }
 0xe90   : > { %3062 = vst [vmem:[%s4784_s13 + $0x18] sm:$0xff] %v3036_v17  ;;  %v3031_v51 = vadd.f32 %v3227_v19, %v3030_v46  ;;  %v2919_v29 = vadd.f32 %v2918_v39, %v2917_v33 }
 0xe91   : > { %v4163_v55 = vpop.f32.mrf.mxu1 }
 0xe92   : > { %3061 = vst [vmem:[%s4784_s13 + $0x10] sm:$0xff] %v3031_v51  ;;  %v3046_v57 = vadd.f32 %v4163_v55, %v3227_v19  ;;  %2922 = vst [vmem:[#allocation2] sm:$0xff] %v2919_v29  ;;  %4165 = vmatmul.mubr.f32.gmra.mxu1 %v2919_v29 }
 0xe93   : > { %v3040_v59 = vpop.f32.mrf.mxu1 }
 0xe94   : > { %3064 = vst [vmem:[%s4784_s13 + $0x28] sm:$0xff] %v3046_v57  ;;  %v3041_v62 = vadd.f32 %v3227_v19, %v3040_v59 }
 0xe96   : > { %3063 = vst [vmem:[%s4784_s13 + $0x20] sm:$0xff] %v3041_v62 }
 0xf52   : > { %v4166_v63 = vpop.f32.mrf.mxu1 }
 0xf53   : > { %v3056_v5 = vadd.f32 %v4166_v63, %v3227_v19 }
 0xf54   : > { %v3050_v7 = vpop.f32.mrf.mxu1 }
 0xf55   : > { %3066 = vst [vmem:[%s4784_s13 + $0x38] sm:$0xff] %v3056_v5  ;;  %v3051_v9 = vadd.f32 %v3227_v19, %v3050_v7 }
 0xf57   : > { %3065 = vst [vmem:[%s4784_s13 + $0x30] sm:$0xff] %v3051_v9 }
 0xf58   : > { %4489 = shalt.err (!%p4486_p6)
}
 0xf59   : > { %s4490_s13 = scalar_lea.hbm %s6110_s25, 1024  ;;  %s4494_s23 = scalar_lea.hbm %s6165_s8, 2048 }
 0xf5a   : > { %p4491_p4 = scmp.ne.s32.totalorder %s6110_s25, %s4490_s13  ;;  %p4495_p12 = scmp.lt.s32.totalorder %s6110_s25, %s6165_s8 }
 0xf5b   : > { %p4496_p11 = scmp.lt.s32.totalorder %s4494_s23, %s4490_s13 }
 0xf5c   : > { %p4492_p9 = pnand %p4491_p4, %p6417_p13 }
 0xf5d   : > { %p4497_p1 = por %p4496_p11, %p4495_p12 }
 0xf5e   : > { %p4493_p0 = pneg %p4492_p9 }
 0xf60   : > { %p4498_p2 = pnand %p4497_p1, %p4493_p0 }
 0xf62   : > { %4501 = shalt.err (!%p4498_p2)
}
 0xf63   : > { %s4563_s3 = smov 128   ;;  %s4564_s18 = smov 8  }
 0xf64   : > { %4185 = dma.vmem_to_hbm [thread:$0]  (%p6417_p13), %s6112_s24, 1024, %s6110_s25, %s3068_s11, %s4563_s3, %s4563_s3, %s4564_s18  }
 0xf65 PF: > { %s3096_s20 = sand.u32 1, %s4536_s27   ;;  %p6418_p7 = scmp.ne.s32.totalorder %s6260_s12, 0 }
 0xf66   : > { %p6419_p10 = scmp.ge.s32.totalorder %s4548_s30, 2  ;;  %s3097_s9 = scalar_lea.sflag [#allocation7], %s3096_s20 }
 0xf68   : > { %p4205_p3 = pnand %p6419_p10, %p6418_p7 }
 0xf6a   : > { %p4206_p8 = pneg %p4205_p3 }
 0xf6c   : > { %4531 = dma.done.wait (%p4206_p8), %s3097_s9, 1024  }
 0xf6d   : > { %4533 = vsyncadd (%p4206_p8), %s3097_s9, 4294966272  ;;  %p23_p5 = scmp.ge.s32.totalorder %s4708_s14, 4   ;;  %s6420_s27 = smov %s4540_s28 }
 0xf6e   : > { %s6421_s28 = smov %s4544_s29  ;;  %s6422_s29 = smov %s4717_s17 }
 0xf6f   : > { %s6423_s30 = smov %s4708_s14  ;;  %25 = sbr.rel (!%p23_p5) target bundleno = 10 (0xa), region = 131 }
 0xf74   :  { %3102 = vsyncpa [#allocation6], 1 }
 0xf75   :  { %3104 = vsyncpa [#allocation6 + $0x1], 1 }
 0xf76   :  { %3105 = vsyncpa [#allocation9], 1 }
 0xf77   :  { %3106 = vsyncpa [#allocation12], 1 }
 0xf78   :  { %3107 = vsyncpa [#allocation7], 1 }
 0xf79   :  { %3109 = vsyncpa [#allocation7 + $0x1], 1 }

</bundles_post_ra>
